<compile_context>
chip_gen: v6e
topology: v6e:2x2x1
jax: 0.10.0
libtpu: 0.0.40
codegen_flags: <defaults>
</compile_context>

<pallas_src>
import functools
import math

import jax
import jax.numpy as jnp
from jax import lax
from jax.experimental import pallas as pl
from jax.experimental.pallas import tpu as pltpu


def _layer_norm(v, eps):
    """One-pass LN over the last axis: sum(v) and sum(v*v) are independent
    reductions (co-issuable), unlike mean -> subtract -> square -> mean."""
    inv_n = 1.0 / v.shape[-1]
    s1 = jnp.sum(v, axis=-1, keepdims=True)
    s2 = jnp.sum(v * v, axis=-1, keepdims=True)
    mu = s1 * inv_n
    var = jnp.maximum(s2 * inv_n - mu * mu, 0.0)
    return (v - mu) * lax.rsqrt(var + eps)


def _ln_peephole_lstm_kernel(
    h0_ref, c0_ref,                                   # (Bb, H)
    gxf_ref, gxi_ref, gxg_ref, gxo_ref,               # (Tb, Bb, H) x-proj (+bias), per gate
    whhf_ref, whhi_ref, whhg_ref, whho_ref,           # (H, H) W_hh^T per gate
    wcf_ref, wci_ref, wco_ref,                        # (1, H) peepholes
    gf_ref, gi_ref, gg_ref, go_ref, gc_ref, bc_ref,   # (1, H) LN gammas / beta_cell
    out_ref,                                          # (Tb, Bb, H)
    newc_ref,                                         # (Bb, H), written only on last block
    h_sc, c_sc,                                       # (Bb, H) f32 recurrent carries
    *, time_block, eps,
):
    t_blk = pl.program_id(1)
    Bb, H = h_sc.shape

    @pl.when(t_blk == 0)
    def _():
        h_sc[...] = h0_ref[...].astype(jnp.float32)
        c_sc[...] = c0_ref[...].astype(jnp.float32)

    # Hoisted per-grid-step loads / broadcasts (not re-done per timestep).
    whh_f = whhf_ref[...]
    whh_i = whhi_ref[...]
    whh_g = whhg_ref[...]
    whh_o = whho_ref[...]
    mm_dtype = whh_f.dtype

    bcast = lambda r: jnp.broadcast_to(r[...], (Bb, H))
    w_cf, w_ci, w_co = bcast(wcf_ref), bcast(wci_ref), bcast(wco_ref)
    g_f, g_i, g_g, g_o = bcast(gf_ref), bcast(gi_ref), bcast(gg_ref), bcast(go_ref)
    g_c, b_c = bcast(gc_ref), bcast(bc_ref)

    def step(tb, carry):
        h, c = carry
        hm = h.astype(mm_dtype)
        hf = jnp.dot(hm, whh_f, preferred_element_type=jnp.float32)
        hi = jnp.dot(hm, whh_i, preferred_element_type=jnp.float32)
        hg = jnp.dot(hm, whh_g, preferred_element_type=jnp.float32)
        ho = jnp.dot(hm, whh_o, preferred_element_type=jnp.float32)

        f = jax.nn.sigmoid(_layer_norm(gxf_ref[tb] + hf + c * w_cf, eps) * g_f)
        i = jax.nn.sigmoid(_layer_norm(gxi_ref[tb] + hi + c * w_ci, eps) * g_i)
        g = jnp.tanh(_layer_norm(gxg_ref[tb] + hg, eps) * g_g)
        c_new = f * c + i * g
        o = jax.nn.sigmoid(_layer_norm(gxo_ref[tb] + ho + c_new * w_co, eps) * g_o)
        h_new = o * jnp.tanh(_layer_norm(c_new, eps) * g_c + b_c)

        out_ref[tb] = h_new.astype(out_ref.dtype)
        return h_new, c_new

    h_fin, c_fin = lax.fori_loop(
        0, time_block, step, (h_sc[...], c_sc[...]), unroll=True)

    h_sc[...] = h_fin
    c_sc[...] = c_fin

    @pl.when(t_blk == pl.num_programs(1) - 1)
    def _():
        newc_ref[...] = c_fin.astype(newc_ref.dtype)


def _largest_divisor_at_most(n, cap):
    cap = max(1, min(cap, n))
    for d in range(cap, 0, -1):
        if n % d == 0:
            return d
    return 1


def ln_peephole_lstm_forward(x, h0, c0, params, *, eps=1e-5, time_block=8,
                             batch_block=None, matmul_dtype=jnp.bfloat16):
    """LNPeepholeLSTM forward (eval path).

    x: (T, B, I) time-major; h0/c0: (B, H).
    Returns (out (T, B, H), (new_h (B, H), new_cell (B, H))).
    """
    T, B, I = x.shape
    H = h0.shape[1]
    f32 = jnp.float32

    Tb = _largest_divisor_at_most(T, time_block)
    Bb = B if batch_block is None else batch_block
    assert B % Bb == 0 and (Bb == B or Bb % 8 == 0), \
        "batch_block must divide B (and be a multiple of 8 when splitting)"

    x = x.astype(f32)
    h0 = h0.astype(f32)
    c0 = c0.astype(f32)

    # ---- hoisted input projection: one big matmul at M=T*B, bias folded in ----
    wih_t = params["weight_ih"].astype(f32).T                        # (I, 4H)
    gates_x = (x.reshape(T * B, I) @ wih_t
               + params["bias"].astype(f32)).reshape(T, B, 4 * H)
    gx_f = gates_x[:, :, 0 * H:1 * H]
    gx_i = gates_x[:, :, 1 * H:2 * H]
    gx_g = gates_x[:, :, 2 * H:3 * H]
    gx_o = gates_x[:, :, 3 * H:4 * H]

    # per-gate recurrent weights, transposed for h @ W^T, cast to the MXU dtype
    whh = params["weight_hh"].astype(f32)                            # (4H, H)
    whh_f = whh[0 * H:1 * H].T.astype(matmul_dtype)
    whh_i = whh[1 * H:2 * H].T.astype(matmul_dtype)
    whh_g = whh[2 * H:3 * H].T.astype(matmul_dtype)
    whh_o = whh[3 * H:4 * H].T.astype(matmul_dtype)

    wch = params["weight_ch"].astype(f32)
    w_cf = wch[0 * H:1 * H].reshape(1, H)
    w_ci = wch[1 * H:2 * H].reshape(1, H)
    w_co = wch[2 * H:3 * H].reshape(1, H)

    row = lambda name: params[name].astype(f32).reshape(1, H)
    gf, gi, gg, go = row("gamma_f"), row("gamma_i"), row("gamma_g"), row("gamma_o")
    gc, bc = row("gamma_cell"), row("beta_cell")

    kernel = functools.partial(_ln_peephole_lstm_kernel, time_block=Tb, eps=eps)

    const2 = lambda b, t: (0, 0)
    bh = lambda b, t: (b, 0)
    tbh = lambda b, t: (t, b, 0)

    out, new_c = pl.pallas_call(
        kernel,
        out_shape=(
            jax.ShapeDtypeStruct((T, B, H), f32),
            jax.ShapeDtypeStruct((B, H), f32),
        ),
        grid_spec=pltpu.PrefetchScalarGridSpec(
            num_scalar_prefetch=0,
            grid=(B // Bb, T // Tb),
            in_specs=[
                pl.BlockSpec((Bb, H), bh),            # h0
                pl.BlockSpec((Bb, H), bh),            # c0
                pl.BlockSpec((Tb, Bb, H), tbh),       # gx_f
                pl.BlockSpec((Tb, Bb, H), tbh),       # gx_i
                pl.BlockSpec((Tb, Bb, H), tbh),       # gx_g
                pl.BlockSpec((Tb, Bb, H), tbh),       # gx_o
                pl.BlockSpec((H, H), const2),         # W_hh_f^T
                pl.BlockSpec((H, H), const2),         # W_hh_i^T
                pl.BlockSpec((H, H), const2),         # W_hh_g^T
                pl.BlockSpec((H, H), const2),         # W_hh_o^T
                pl.BlockSpec((1, H), const2),         # w_cf
                pl.BlockSpec((1, H), const2),         # w_ci
                pl.BlockSpec((1, H), const2),         # w_co
                pl.BlockSpec((1, H), const2),         # gamma_f
                pl.BlockSpec((1, H), const2),         # gamma_i
                pl.BlockSpec((1, H), const2),         # gamma_g
                pl.BlockSpec((1, H), const2),         # gamma_o
                pl.BlockSpec((1, H), const2),         # gamma_cell
                pl.BlockSpec((1, H), const2),         # beta_cell
            ],
            out_specs=[
                pl.BlockSpec((Tb, Bb, H), tbh),       # output sequence
                pl.BlockSpec((Bb, H), bh),            # new_cell
            ],
            scratch_shapes=[
                pltpu.VMEM((Bb, H), f32),             # h carry
                pltpu.VMEM((Bb, H), f32),             # c carry
            ],
        ),
        compiler_params=pltpu.CompilerParams(
            # batch blocks are independent -> parallel (2 TCs on v7x);
            # the time axis is the recurrence -> arbitrary (sequential).
            dimension_semantics=("parallel", "arbitrary"),
        ),
    )(h0, c0, gx_f, gx_i, gx_g, gx_o,
      whh_f, whh_i, whh_g, whh_o,
      w_cf, w_ci, w_co, gf, gi, gg, go, gc, bc)

    new_h = out[-1]   # h_T is exactly the last output row
    return out, (new_h, new_c)


# ---------------------------------------------------------------------------
# Pure-JAX reference (module semantics, two-pass LN) for correctness checks.
# ---------------------------------------------------------------------------
def _ln_ref(v, eps):
    mu = jnp.mean(v, axis=-1, keepdims=True)
    var = jnp.mean((v - mu) ** 2, axis=-1, keepdims=True)
    return (v - mu) * lax.rsqrt(var + eps)


def _reference_forward(x, h0, c0, p, eps=1e-5):
    H = h0.shape[1]
    wih_t, whh_t = p["weight_ih"].T, p["weight_hh"].T
    w_cf, w_ci, w_co = (p["weight_ch"][:H], p["weight_ch"][H:2 * H],
                        p["weight_ch"][2 * H:])

    def step(carry, x_t):
        h, c = carry
        gates = x_t @ wih_t + h @ whh_t + p["bias"]
        f = jax.nn.sigmoid(_ln_ref(gates[:, :H] + c * w_cf, eps) * p["gamma_f"])
        i = jax.nn.sigmoid(_ln_ref(gates[:, H:2 * H] + c * w_ci, eps) * p["gamma_i"])
        g = jnp.tanh(_ln_ref(gates[:, 2 * H:3 * H], eps) * p["gamma_g"])
        c_new = f * c + i * g
        o = jax.nn.sigmoid(_ln_ref(gates[:, 3 * H:] + c_new * w_co, eps) * p["gamma_o"])
        h_new = o * jnp.tanh(_ln_ref(c_new, eps) * p["gamma_cell"] + p["beta_cell"])
        return (h_new, c_new), h_new

    (h_T, c_T), ys = lax.scan(step, (h0, c0), x)
    return ys, (h_T, c_T)


def init_params(key, input_size, hidden_size):
    """Deterministic init mirroring LNPeepholeLSTM.reset_parameters()."""
    I, H = input_size, hidden_size
    stdv = 1.0 / math.sqrt(I + 2 * H)
    ks = jax.random.split(key, 8)
    u = lambda k, shape: jax.random.uniform(k, shape, jnp.float32, -stdv, stdv)
    bias = jnp.zeros((4 * H,), jnp.float32).at[:H].set(1.0)
    return {
        "weight_ih": u(ks[0], (4 * H, I)),
        "weight_hh": u(ks[1], (4 * H, H)),
        "weight_ch": u(ks[2], (3 * H,)),
        "bias": bias,
        "gamma_f": jax.random.uniform(ks[3], (H,), jnp.float32),
        "gamma_i": jax.random.uniform(ks[4], (H,), jnp.float32),
        "gamma_g": jax.random.uniform(ks[5], (H,), jnp.float32),
        "gamma_o": jax.random.uniform(ks[6], (H,), jnp.float32),
        "gamma_cell": jax.random.uniform(ks[7], (H,), jnp.float32),
        "beta_cell": jnp.zeros((H,), jnp.float32),
    }


if __name__ == "__main__":
    T, B, I, H = 8, 2, 16, 32
    key = jax.random.PRNGKey(0)
    k_p, k_x, k_h, k_c = jax.random.split(key, 4)

    params = init_params(k_p, I, H)
    x = jax.random.normal(k_x, (T, B, I), jnp.float32)    # time-major (T, B, I)
    h0 = jax.random.normal(k_h, (B, H), jnp.float32)
    c0 = jax.random.normal(k_c, (B, H), jnp.float32)

    ref_out, (ref_h, ref_c) = _reference_forward(x, h0, c0, params)

    # Exact-semantics path: f32 recurrent matmuls, tight tolerance.
    out, (new_h, new_c) = ln_peephole_lstm_forward(
        x, h0, c0, params, time_block=4, matmul_dtype=jnp.float32)
    jax.block_until_ready((out, new_h, new_c))
    assert jnp.allclose(out, ref_out, atol=1e-4, rtol=1e-4)
    assert jnp.allclose(new_h, ref_h, atol=1e-4, rtol=1e-4)
    assert jnp.allclose(new_c, ref_c, atol=1e-4, rtol=1e-4)

    # MXU-friendly path: bf16 recurrent matmuls with f32 accumulate.
    out_bf, (new_h_bf, new_c_bf) = ln_peephole_lstm_forward(
        x, h0, c0, params, time_block=4, matmul_dtype=jnp.bfloat16)
    jax.block_until_ready((out_bf, new_h_bf, new_c_bf))
    assert jnp.allclose(out_bf, ref_out, atol=3e-2, rtol=3e-2)
    assert jnp.allclose(new_h_bf, ref_h, atol=3e-2, rtol=3e-2)
    assert jnp.allclose(new_c_bf, ref_c, atol=3e-2, rtol=3e-2)

    print("KERNEL_OK")
</pallas_src>

<mosaic_0001>
module attributes {stable_mosaic.version = 11 : i64} {
  func.func @_ln_peephole_lstm_kernel(%arg0: i32, %arg1: i32, %arg2: memref<2x32xf32, #tpu.memory_space<vmem>>, %arg3: memref<2x32xf32, #tpu.memory_space<vmem>>, %arg4: memref<4x2x32xf32, #tpu.memory_space<vmem>>, %arg5: memref<4x2x32xf32, #tpu.memory_space<vmem>>, %arg6: memref<4x2x32xf32, #tpu.memory_space<vmem>>, %arg7: memref<4x2x32xf32, #tpu.memory_space<vmem>>, %arg8: memref<32x32xf32, #tpu.memory_space<vmem>>, %arg9: memref<32x32xf32, #tpu.memory_space<vmem>>, %arg10: memref<32x32xf32, #tpu.memory_space<vmem>>, %arg11: memref<32x32xf32, #tpu.memory_space<vmem>>, %arg12: memref<1x32xf32, #tpu.memory_space<vmem>>, %arg13: memref<1x32xf32, #tpu.memory_space<vmem>>, %arg14: memref<1x32xf32, #tpu.memory_space<vmem>>, %arg15: memref<1x32xf32, #tpu.memory_space<vmem>>, %arg16: memref<1x32xf32, #tpu.memory_space<vmem>>, %arg17: memref<1x32xf32, #tpu.memory_space<vmem>>, %arg18: memref<1x32xf32, #tpu.memory_space<vmem>>, %arg19: memref<1x32xf32, #tpu.memory_space<vmem>>, %arg20: memref<1x32xf32, #tpu.memory_space<vmem>>, %arg21: memref<4x2x32xf32, #tpu.memory_space<vmem>>, %arg22: memref<2x32xf32, #tpu.memory_space<vmem>>, %arg23: memref<2x32xf32, #tpu.memory_space<vmem>>, %arg24: memref<2x32xf32, #tpu.memory_space<vmem>>) attributes {dimension_semantics = [#tpu.dimension_semantics<parallel>, #tpu.dimension_semantics<arbitrary>], iteration_bounds = array<i64: 1, 2>, scalar_prefetch = 0 : i64, scratch_operands = 2 : i64, tpu.core_type = #tpu.core_type<tc>, window_params = [{transform_indices = @transform_0, window_bounds = array<i64: 2, 32>}, {transform_indices = @transform_1, window_bounds = array<i64: 2, 32>}, {transform_indices = @transform_2, window_bounds = array<i64: 4, 2, 32>}, {transform_indices = @transform_3, window_bounds = array<i64: 4, 2, 32>}, {transform_indices = @transform_4, window_bounds = array<i64: 4, 2, 32>}, {transform_indices = @transform_5, window_bounds = array<i64: 4, 2, 32>}, {pipeline_mode = #tpu.pipeline_mode<synchronous>, transform_indices = @transform_6, window_bounds = array<i64: 32, 32>}, {pipeline_mode = #tpu.pipeline_mode<synchronous>, transform_indices = @transform_7, window_bounds = array<i64: 32, 32>}, {pipeline_mode = #tpu.pipeline_mode<synchronous>, transform_indices = @transform_8, window_bounds = array<i64: 32, 32>}, {pipeline_mode = #tpu.pipeline_mode<synchronous>, transform_indices = @transform_9, window_bounds = array<i64: 32, 32>}, {pipeline_mode = #tpu.pipeline_mode<synchronous>, transform_indices = @transform_10, window_bounds = array<i64: 1, 32>}, {pipeline_mode = #tpu.pipeline_mode<synchronous>, transform_indices = @transform_11, window_bounds = array<i64: 1, 32>}, {pipeline_mode = #tpu.pipeline_mode<synchronous>, transform_indices = @transform_12, window_bounds = array<i64: 1, 32>}, {pipeline_mode = #tpu.pipeline_mode<synchronous>, transform_indices = @transform_13, window_bounds = array<i64: 1, 32>}, {pipeline_mode = #tpu.pipeline_mode<synchronous>, transform_indices = @transform_14, window_bounds = array<i64: 1, 32>}, {pipeline_mode = #tpu.pipeline_mode<synchronous>, transform_indices = @transform_15, window_bounds = array<i64: 1, 32>}, {pipeline_mode = #tpu.pipeline_mode<synchronous>, transform_indices = @transform_16, window_bounds = array<i64: 1, 32>}, {pipeline_mode = #tpu.pipeline_mode<synchronous>, transform_indices = @transform_17, window_bounds = array<i64: 1, 32>}, {pipeline_mode = #tpu.pipeline_mode<synchronous>, transform_indices = @transform_18, window_bounds = array<i64: 1, 32>}, {transform_indices = @transform_19, window_bounds = array<i64: 4, 2, 32>}, {transform_indices = @transform_20, window_bounds = array<i64: 2, 32>}]} {
    %c0_i32 = arith.constant 0 : i32
    %0 = arith.cmpi eq, %arg1, %c0_i32 : i32
    %1 = arith.extui %0 : i1 to i32
    %c0_i32_0 = arith.constant 0 : i32
    %2 = arith.cmpi ne, %1, %c0_i32_0 : i32
    scf.if %2 {
      %c0_224 = arith.constant 0 : index
      %c0_225 = arith.constant 0 : index
      %669 = vector.load %arg2[%c0_224, %c0_225] : memref<2x32xf32, #tpu.memory_space<vmem>>, vector<2x32xf32>
      %c0_226 = arith.constant 0 : index
      %c0_227 = arith.constant 0 : index
      %670 = vector.load %arg23[%c0_226, %c0_227] : memref<2x32xf32, #tpu.memory_space<vmem>>, vector<2x32xf32>
      tpu.vector_store %arg23[%c0_226, %c0_227], %669 {strides = array<i32>} : memref<2x32xf32, #tpu.memory_space<vmem>>, vector<2x32xf32>,
      %c0_228 = arith.constant 0 : index
      %c0_229 = arith.constant 0 : index
      %671 = vector.load %arg3[%c0_228, %c0_229] : memref<2x32xf32, #tpu.memory_space<vmem>>, vector<2x32xf32>
      %c0_230 = arith.constant 0 : index
      %c0_231 = arith.constant 0 : index
      %672 = vector.load %arg24[%c0_230, %c0_231] : memref<2x32xf32, #tpu.memory_space<vmem>>, vector<2x32xf32>
      tpu.vector_store %arg24[%c0_230, %c0_231], %671 {strides = array<i32>} : memref<2x32xf32, #tpu.memory_space<vmem>>, vector<2x32xf32>,
    } else {
    }
    %c0 = arith.constant 0 : index
    %c0_1 = arith.constant 0 : index
    %3 = vector.load %arg8[%c0, %c0_1] : memref<32x32xf32, #tpu.memory_space<vmem>>, vector<32x32xf32>
    %c0_2 = arith.constant 0 : index
    %c0_3 = arith.constant 0 : index
    %4 = vector.load %arg9[%c0_2, %c0_3] : memref<32x32xf32, #tpu.memory_space<vmem>>, vector<32x32xf32>
    %c0_4 = arith.constant 0 : index
    %c0_5 = arith.constant 0 : index
    %5 = vector.load %arg10[%c0_4, %c0_5] : memref<32x32xf32, #tpu.memory_space<vmem>>, vector<32x32xf32>
    %c0_6 = arith.constant 0 : index
    %c0_7 = arith.constant 0 : index
    %6 = vector.load %arg11[%c0_6, %c0_7] : memref<32x32xf32, #tpu.memory_space<vmem>>, vector<32x32xf32>
    %c0_8 = arith.constant 0 : index
    %c0_9 = arith.constant 0 : index
    %7 = vector.load %arg12[%c0_8, %c0_9] : memref<1x32xf32, #tpu.memory_space<vmem>>, vector<1x32xf32>
    %8 = vector.shape_cast %7 : vector<1x32xf32> to vector<1x32xf32>
    %9 = vector.broadcast %8 : vector<1x32xf32> to vector<2x32xf32>
    %c0_10 = arith.constant 0 : index
    %c0_11 = arith.constant 0 : index
    %10 = vector.load %arg13[%c0_10, %c0_11] : memref<1x32xf32, #tpu.memory_space<vmem>>, vector<1x32xf32>
    %11 = vector.shape_cast %10 : vector<1x32xf32> to vector<1x32xf32>
    %12 = vector.broadcast %11 : vector<1x32xf32> to vector<2x32xf32>
    %c0_12 = arith.constant 0 : index
    %c0_13 = arith.constant 0 : index
    %13 = vector.load %arg14[%c0_12, %c0_13] : memref<1x32xf32, #tpu.memory_space<vmem>>, vector<1x32xf32>
    %14 = vector.shape_cast %13 : vector<1x32xf32> to vector<1x32xf32>
    %15 = vector.broadcast %14 : vector<1x32xf32> to vector<2x32xf32>
    %c0_14 = arith.constant 0 : index
    %c0_15 = arith.constant 0 : index
    %16 = vector.load %arg15[%c0_14, %c0_15] : memref<1x32xf32, #tpu.memory_space<vmem>>, vector<1x32xf32>
    %17 = vector.shape_cast %16 : vector<1x32xf32> to vector<1x32xf32>
    %18 = vector.broadcast %17 : vector<1x32xf32> to vector<2x32xf32>
    %c0_16 = arith.constant 0 : index
    %c0_17 = arith.constant 0 : index
    %19 = vector.load %arg16[%c0_16, %c0_17] : memref<1x32xf32, #tpu.memory_space<vmem>>, vector<1x32xf32>
    %20 = vector.shape_cast %19 : vector<1x32xf32> to vector<1x32xf32>
    %21 = vector.broadcast %20 : vector<1x32xf32> to vector<2x32xf32>
    %c0_18 = arith.constant 0 : index
    %c0_19 = arith.constant 0 : index
    %22 = vector.load %arg17[%c0_18, %c0_19] : memref<1x32xf32, #tpu.memory_space<vmem>>, vector<1x32xf32>
    %23 = vector.shape_cast %22 : vector<1x32xf32> to vector<1x32xf32>
    %24 = vector.broadcast %23 : vector<1x32xf32> to vector<2x32xf32>
    %c0_20 = arith.constant 0 : index
    %c0_21 = arith.constant 0 : index
    %25 = vector.load %arg18[%c0_20, %c0_21] : memref<1x32xf32, #tpu.memory_space<vmem>>, vector<1x32xf32>
    %26 = vector.shape_cast %25 : vector<1x32xf32> to vector<1x32xf32>
    %27 = vector.broadcast %26 : vector<1x32xf32> to vector<2x32xf32>
    %c0_22 = arith.constant 0 : index
    %c0_23 = arith.constant 0 : index
    %28 = vector.load %arg19[%c0_22, %c0_23] : memref<1x32xf32, #tpu.memory_space<vmem>>, vector<1x32xf32>
    %29 = vector.shape_cast %28 : vector<1x32xf32> to vector<1x32xf32>
    %30 = vector.broadcast %29 : vector<1x32xf32> to vector<2x32xf32>
    %c0_24 = arith.constant 0 : index
    %c0_25 = arith.constant 0 : index
    %31 = vector.load %arg20[%c0_24, %c0_25] : memref<1x32xf32, #tpu.memory_space<vmem>>, vector<1x32xf32>
    %32 = vector.shape_cast %31 : vector<1x32xf32> to vector<1x32xf32>
    %33 = vector.broadcast %32 : vector<1x32xf32> to vector<2x32xf32>
    %c0_26 = arith.constant 0 : index
    %c0_27 = arith.constant 0 : index
    %34 = vector.load %arg23[%c0_26, %c0_27] : memref<2x32xf32, #tpu.memory_space<vmem>>, vector<2x32xf32>
    %c0_28 = arith.constant 0 : index
    %c0_29 = arith.constant 0 : index
    %35 = vector.load %arg24[%c0_28, %c0_29] : memref<2x32xf32, #tpu.memory_space<vmem>>, vector<2x32xf32>
    %c0_i32_30 = arith.constant 0 : i32
    %cst = arith.constant dense<0.000000e+00> : vector<2x32xf32>
    %36 = tpu.matmul %34, %3, %cst {dimension_numbers = #tpu.dot_dimension_numbers<[1], [0], [0], [1], [0, 0, 1, 1], [], []>} : vector<2x32xf32>, vector<32x32xf32>, vector<2x32xf32> -> vector<2x32xf32>
    %cst_31 = arith.constant dense<0.000000e+00> : vector<2x32xf32>
    %37 = tpu.matmul %34, %4, %cst_31 {dimension_numbers = #tpu.dot_dimension_numbers<[1], [0], [0], [1], [0, 0, 1, 1], [], []>} : vector<2x32xf32>, vector<32x32xf32>, vector<2x32xf32> -> vector<2x32xf32>
    %cst_32 = arith.constant dense<0.000000e+00> : vector<2x32xf32>
    %38 = tpu.matmul %34, %5, %cst_32 {dimension_numbers = #tpu.dot_dimension_numbers<[1], [0], [0], [1], [0, 0, 1, 1], [], []>} : vector<2x32xf32>, vector<32x32xf32>, vector<2x32xf32> -> vector<2x32xf32>
    %cst_33 = arith.constant dense<0.000000e+00> : vector<2x32xf32>
    %39 = tpu.matmul %34, %6, %cst_33 {dimension_numbers = #tpu.dot_dimension_numbers<[1], [0], [0], [1], [0, 0, 1, 1], [], []>} : vector<2x32xf32>, vector<32x32xf32>, vector<2x32xf32> -> vector<2x32xf32>
    %40 = arith.index_cast %c0_i32_30 : i32 to index
    %c0_34 = arith.constant 0 : index
    %c0_35 = arith.constant 0 : index
    %41 = vector.load %arg4[%40, %c0_34, %c0_35] : memref<4x2x32xf32, #tpu.memory_space<vmem>>, vector<1x2x32xf32>
    %42 = vector.shape_cast %41 : vector<1x2x32xf32> to vector<2x32xf32>
    %43 = arith.addf %42, %36 : vector<2x32xf32>
    %44 = arith.mulf %35, %9 : vector<2x32xf32>
    %45 = arith.addf %43, %44 : vector<2x32xf32>
    %cst_36 = arith.constant dense<0.000000e+00> : vector<2xf32>
    %46 = vector.multi_reduction <add>, %45, %cst_36 [1] : vector<2x32xf32> to vector<2xf32>
    %47 = vector.shape_cast %46 : vector<2xf32> to vector<2x1xf32>
    %48 = arith.mulf %45, %45 : vector<2x32xf32>
    %cst_37 = arith.constant dense<0.000000e+00> : vector<2xf32>
    %49 = vector.multi_reduction <add>, %48, %cst_37 [1] : vector<2x32xf32> to vector<2xf32>
    %50 = vector.shape_cast %49 : vector<2xf32> to vector<2x1xf32>
    %cst_38 = arith.constant 3.125000e-02 : f32
    %51 = vector.broadcast %cst_38 : f32 to vector<2x1xf32>
    %52 = arith.mulf %47, %51 : vector<2x1xf32>
    %cst_39 = arith.constant 3.125000e-02 : f32
    %53 = vector.broadcast %cst_39 : f32 to vector<2x1xf32>
    %54 = arith.mulf %50, %53 : vector<2x1xf32>
    %55 = arith.mulf %52, %52 : vector<2x1xf32>
    %56 = arith.subf %54, %55 : vector<2x1xf32>
    %cst_40 = arith.constant 0.000000e+00 : f32
    %57 = vector.broadcast %cst_40 : f32 to vector<2x1xf32>
    %58 = arith.maximumf %56, %57 : vector<2x1xf32>
    %59 = vector.broadcast %52 : vector<2x1xf32> to vector<2x32xf32>
    %60 = arith.subf %45, %59 : vector<2x32xf32>
    %cst_41 = arith.constant 9.99999974E-6 : f32
    %61 = vector.broadcast %cst_41 : f32 to vector<2x1xf32>
    %62 = arith.addf %58, %61 : vector<2x1xf32>
    %63 = math.rsqrt %62 : vector<2x1xf32>
    %64 = vector.broadcast %63 : vector<2x1xf32> to vector<2x32xf32>
    %65 = arith.mulf %60, %64 : vector<2x32xf32>
    %66 = arith.mulf %65, %18 : vector<2x32xf32>
    %67 = arith.negf %66 : vector<2x32xf32>
    %68 = math.exp %67 : vector<2x32xf32>
    %cst_42 = arith.constant 1.000000e+00 : f32
    %69 = vector.broadcast %cst_42 : f32 to vector<2x32xf32>
    %70 = arith.addf %69, %68 : vector<2x32xf32>
    %71 = arith.divf %69, %70 : vector<2x32xf32>
    %72 = arith.index_cast %c0_i32_30 : i32 to index
    %c0_43 = arith.constant 0 : index
    %c0_44 = arith.constant 0 : index
    %73 = vector.load %arg5[%72, %c0_43, %c0_44] : memref<4x2x32xf32, #tpu.memory_space<vmem>>, vector<1x2x32xf32>
    %74 = vector.shape_cast %73 : vector<1x2x32xf32> to vector<2x32xf32>
    %75 = arith.addf %74, %37 : vector<2x32xf32>
    %76 = arith.mulf %35, %12 : vector<2x32xf32>
    %77 = arith.addf %75, %76 : vector<2x32xf32>
    %cst_45 = arith.constant dense<0.000000e+00> : vector<2xf32>
    %78 = vector.multi_reduction <add>, %77, %cst_45 [1] : vector<2x32xf32> to vector<2xf32>
    %79 = vector.shape_cast %78 : vector<2xf32> to vector<2x1xf32>
    %80 = arith.mulf %77, %77 : vector<2x32xf32>
    %cst_46 = arith.constant dense<0.000000e+00> : vector<2xf32>
    %81 = vector.multi_reduction <add>, %80, %cst_46 [1] : vector<2x32xf32> to vector<2xf32>
    %82 = vector.shape_cast %81 : vector<2xf32> to vector<2x1xf32>
    %cst_47 = arith.constant 3.125000e-02 : f32
    %83 = vector.broadcast %cst_47 : f32 to vector<2x1xf32>
    %84 = arith.mulf %79, %83 : vector<2x1xf32>
    %cst_48 = arith.constant 3.125000e-02 : f32
    %85 = vector.broadcast %cst_48 : f32 to vector<2x1xf32>
    %86 = arith.mulf %82, %85 : vector<2x1xf32>
    %87 = arith.mulf %84, %84 : vector<2x1xf32>
    %88 = arith.subf %86, %87 : vector<2x1xf32>
    %cst_49 = arith.constant 0.000000e+00 : f32
    %89 = vector.broadcast %cst_49 : f32 to vector<2x1xf32>
    %90 = arith.maximumf %88, %89 : vector<2x1xf32>
    %91 = vector.broadcast %84 : vector<2x1xf32> to vector<2x32xf32>
    %92 = arith.subf %77, %91 : vector<2x32xf32>
    %cst_50 = arith.constant 9.99999974E-6 : f32
    %93 = vector.broadcast %cst_50 : f32 to vector<2x1xf32>
    %94 = arith.addf %90, %93 : vector<2x1xf32>
    %95 = math.rsqrt %94 : vector<2x1xf32>
    %96 = vector.broadcast %95 : vector<2x1xf32> to vector<2x32xf32>
    %97 = arith.mulf %92, %96 : vector<2x32xf32>
    %98 = arith.mulf %97, %21 : vector<2x32xf32>
    %99 = arith.negf %98 : vector<2x32xf32>
    %100 = math.exp %99 : vector<2x32xf32>
    %cst_51 = arith.constant 1.000000e+00 : f32
    %101 = vector.broadcast %cst_51 : f32 to vector<2x32xf32>
    %102 = arith.addf %101, %100 : vector<2x32xf32>
    %103 = arith.divf %101, %102 : vector<2x32xf32>
    %104 = arith.index_cast %c0_i32_30 : i32 to index
    %c0_52 = arith.constant 0 : index
    %c0_53 = arith.constant 0 : index
    %105 = vector.load %arg6[%104, %c0_52, %c0_53] : memref<4x2x32xf32, #tpu.memory_space<vmem>>, vector<1x2x32xf32>
    %106 = vector.shape_cast %105 : vector<1x2x32xf32> to vector<2x32xf32>
    %107 = arith.addf %106, %38 : vector<2x32xf32>
    %cst_54 = arith.constant dense<0.000000e+00> : vector<2xf32>
    %108 = vector.multi_reduction <add>, %107, %cst_54 [1] : vector<2x32xf32> to vector<2xf32>
    %109 = vector.shape_cast %108 : vector<2xf32> to vector<2x1xf32>
    %110 = arith.mulf %107, %107 : vector<2x32xf32>
    %cst_55 = arith.constant dense<0.000000e+00> : vector<2xf32>
    %111 = vector.multi_reduction <add>, %110, %cst_55 [1] : vector<2x32xf32> to vector<2xf32>
    %112 = vector.shape_cast %111 : vector<2xf32> to vector<2x1xf32>
    %cst_56 = arith.constant 3.125000e-02 : f32
    %113 = vector.broadcast %cst_56 : f32 to vector<2x1xf32>
    %114 = arith.mulf %109, %113 : vector<2x1xf32>
    %cst_57 = arith.constant 3.125000e-02 : f32
    %115 = vector.broadcast %cst_57 : f32 to vector<2x1xf32>
    %116 = arith.mulf %112, %115 : vector<2x1xf32>
    %117 = arith.mulf %114, %114 : vector<2x1xf32>
    %118 = arith.subf %116, %117 : vector<2x1xf32>
    %cst_58 = arith.constant 0.000000e+00 : f32
    %119 = vector.broadcast %cst_58 : f32 to vector<2x1xf32>
    %120 = arith.maximumf %118, %119 : vector<2x1xf32>
    %121 = vector.broadcast %114 : vector<2x1xf32> to vector<2x32xf32>
    %122 = arith.subf %107, %121 : vector<2x32xf32>
    %cst_59 = arith.constant 9.99999974E-6 : f32
    %123 = vector.broadcast %cst_59 : f32 to vector<2x1xf32>
    %124 = arith.addf %120, %123 : vector<2x1xf32>
    %125 = math.rsqrt %124 : vector<2x1xf32>
    %126 = vector.broadcast %125 : vector<2x1xf32> to vector<2x32xf32>
    %127 = arith.mulf %122, %126 : vector<2x32xf32>
    %128 = arith.mulf %127, %24 : vector<2x32xf32>
    %129 = math.tanh %128 : vector<2x32xf32>
    %130 = arith.mulf %71, %35 : vector<2x32xf32>
    %131 = arith.mulf %103, %129 : vector<2x32xf32>
    %132 = arith.addf %130, %131 : vector<2x32xf32>
    %133 = arith.index_cast %c0_i32_30 : i32 to index
    %c0_60 = arith.constant 0 : index
    %c0_61 = arith.constant 0 : index
    %134 = vector.load %arg7[%133, %c0_60, %c0_61] : memref<4x2x32xf32, #tpu.memory_space<vmem>>, vector<1x2x32xf32>
    %135 = vector.shape_cast %134 : vector<1x2x32xf32> to vector<2x32xf32>
    %136 = arith.addf %135, %39 : vector<2x32xf32>
    %137 = arith.mulf %132, %15 : vector<2x32xf32>
    %138 = arith.addf %136, %137 : vector<2x32xf32>
    %cst_62 = arith.constant dense<0.000000e+00> : vector<2xf32>
    %139 = vector.multi_reduction <add>, %138, %cst_62 [1] : vector<2x32xf32> to vector<2xf32>
    %140 = vector.shape_cast %139 : vector<2xf32> to vector<2x1xf32>
    %141 = arith.mulf %138, %138 : vector<2x32xf32>
    %cst_63 = arith.constant dense<0.000000e+00> : vector<2xf32>
    %142 = vector.multi_reduction <add>, %141, %cst_63 [1] : vector<2x32xf32> to vector<2xf32>
    %143 = vector.shape_cast %142 : vector<2xf32> to vector<2x1xf32>
    %cst_64 = arith.constant 3.125000e-02 : f32
    %144 = vector.broadcast %cst_64 : f32 to vector<2x1xf32>
    %145 = arith.mulf %140, %144 : vector<2x1xf32>
    %cst_65 = arith.constant 3.125000e-02 : f32
    %146 = vector.broadcast %cst_65 : f32 to vector<2x1xf32>
    %147 = arith.mulf %143, %146 : vector<2x1xf32>
    %148 = arith.mulf %145, %145 : vector<2x1xf32>
    %149 = arith.subf %147, %148 : vector<2x1xf32>
    %cst_66 = arith.constant 0.000000e+00 : f32
    %150 = vector.broadcast %cst_66 : f32 to vector<2x1xf32>
    %151 = arith.maximumf %149, %150 : vector<2x1xf32>
    %152 = vector.broadcast %145 : vector<2x1xf32> to vector<2x32xf32>
    %153 = arith.subf %138, %152 : vector<2x32xf32>
    %cst_67 = arith.constant 9.99999974E-6 : f32
    %154 = vector.broadcast %cst_67 : f32 to vector<2x1xf32>
    %155 = arith.addf %151, %154 : vector<2x1xf32>
    %156 = math.rsqrt %155 : vector<2x1xf32>
    %157 = vector.broadcast %156 : vector<2x1xf32> to vector<2x32xf32>
    %158 = arith.mulf %153, %157 : vector<2x32xf32>
    %159 = arith.mulf %158, %27 : vector<2x32xf32>
    %160 = arith.negf %159 : vector<2x32xf32>
    %161 = math.exp %160 : vector<2x32xf32>
    %cst_68 = arith.constant 1.000000e+00 : f32
    %162 = vector.broadcast %cst_68 : f32 to vector<2x32xf32>
    %163 = arith.addf %162, %161 : vector<2x32xf32>
    %164 = arith.divf %162, %163 : vector<2x32xf32>
    %cst_69 = arith.constant dense<0.000000e+00> : vector<2xf32>
    %165 = vector.multi_reduction <add>, %132, %cst_69 [1] : vector<2x32xf32> to vector<2xf32>
    %166 = vector.shape_cast %165 : vector<2xf32> to vector<2x1xf32>
    %167 = arith.mulf %132, %132 : vector<2x32xf32>
    %cst_70 = arith.constant dense<0.000000e+00> : vector<2xf32>
    %168 = vector.multi_reduction <add>, %167, %cst_70 [1] : vector<2x32xf32> to vector<2xf32>
    %169 = vector.shape_cast %168 : vector<2xf32> to vector<2x1xf32>
    %cst_71 = arith.constant 3.125000e-02 : f32
    %170 = vector.broadcast %cst_71 : f32 to vector<2x1xf32>
    %171 = arith.mulf %166, %170 : vector<2x1xf32>
    %cst_72 = arith.constant 3.125000e-02 : f32
    %172 = vector.broadcast %cst_72 : f32 to vector<2x1xf32>
    %173 = arith.mulf %169, %172 : vector<2x1xf32>
    %174 = arith.mulf %171, %171 : vector<2x1xf32>
    %175 = arith.subf %173, %174 : vector<2x1xf32>
    %cst_73 = arith.constant 0.000000e+00 : f32
    %176 = vector.broadcast %cst_73 : f32 to vector<2x1xf32>
    %177 = arith.maximumf %175, %176 : vector<2x1xf32>
    %178 = vector.broadcast %171 : vector<2x1xf32> to vector<2x32xf32>
    %179 = arith.subf %132, %178 : vector<2x32xf32>
    %cst_74 = arith.constant 9.99999974E-6 : f32
    %180 = vector.broadcast %cst_74 : f32 to vector<2x1xf32>
    %181 = arith.addf %177, %180 : vector<2x1xf32>
    %182 = math.rsqrt %181 : vector<2x1xf32>
    %183 = vector.broadcast %182 : vector<2x1xf32> to vector<2x32xf32>
    %184 = arith.mulf %179, %183 : vector<2x32xf32>
    %185 = arith.mulf %184, %30 : vector<2x32xf32>
    %186 = arith.addf %185, %33 : vector<2x32xf32>
    %187 = math.tanh %186 : vector<2x32xf32>
    %188 = arith.mulf %164, %187 : vector<2x32xf32>
    %189 = arith.index_cast %c0_i32_30 : i32 to index
    %c0_75 = arith.constant 0 : index
    %c0_76 = arith.constant 0 : index
    %190 = vector.load %arg21[%189, %c0_75, %c0_76] : memref<4x2x32xf32, #tpu.memory_space<vmem>>, vector<1x2x32xf32>
    %191 = vector.shape_cast %190 : vector<1x2x32xf32> to vector<2x32xf32>
    %192 = vector.shape_cast %188 : vector<2x32xf32> to vector<1x2x32xf32>
    tpu.vector_store %arg21[%189, %c0_75, %c0_76], %192 {strides = array<i32>} : memref<4x2x32xf32, #tpu.memory_space<vmem>>, vector<1x2x32xf32>,
    %c1_i32 = arith.constant 1 : i32
    %cst_77 = arith.constant dense<0.000000e+00> : vector<2x32xf32>
    %193 = tpu.matmul %188, %3, %cst_77 {dimension_numbers = #tpu.dot_dimension_numbers<[1], [0], [0], [1], [0, 0, 1, 1], [], []>} : vector<2x32xf32>, vector<32x32xf32>, vector<2x32xf32> -> vector<2x32xf32>
    %cst_78 = arith.constant dense<0.000000e+00> : vector<2x32xf32>
    %194 = tpu.matmul %188, %4, %cst_78 {dimension_numbers = #tpu.dot_dimension_numbers<[1], [0], [0], [1], [0, 0, 1, 1], [], []>} : vector<2x32xf32>, vector<32x32xf32>, vector<2x32xf32> -> vector<2x32xf32>
    %cst_79 = arith.constant dense<0.000000e+00> : vector<2x32xf32>
    %195 = tpu.matmul %188, %5, %cst_79 {dimension_numbers = #tpu.dot_dimension_numbers<[1], [0], [0], [1], [0, 0, 1, 1], [], []>} : vector<2x32xf32>, vector<32x32xf32>, vector<2x32xf32> -> vector<2x32xf32>
    %cst_80 = arith.constant dense<0.000000e+00> : vector<2x32xf32>
    %196 = tpu.matmul %188, %6, %cst_80 {dimension_numbers = #tpu.dot_dimension_numbers<[1], [0], [0], [1], [0, 0, 1, 1], [], []>} : vector<2x32xf32>, vector<32x32xf32>, vector<2x32xf32> -> vector<2x32xf32>
    %197 = arith.index_cast %c1_i32 : i32 to index
    %c0_81 = arith.constant 0 : index
    %c0_82 = arith.constant 0 : index
    %198 = vector.load %arg4[%197, %c0_81, %c0_82] : memref<4x2x32xf32, #tpu.memory_space<vmem>>, vector<1x2x32xf32>
    %199 = vector.shape_cast %198 : vector<1x2x32xf32> to vector<2x32xf32>
    %200 = arith.addf %199, %193 : vector<2x32xf32>
    %201 = arith.mulf %132, %9 : vector<2x32xf32>
    %202 = arith.addf %200, %201 : vector<2x32xf32>
    %cst_83 = arith.constant dense<0.000000e+00> : vector<2xf32>
    %203 = vector.multi_reduction <add>, %202, %cst_83 [1] : vector<2x32xf32> to vector<2xf32>
    %204 = vector.shape_cast %203 : vector<2xf32> to vector<2x1xf32>
    %205 = arith.mulf %202, %202 : vector<2x32xf32>
    %cst_84 = arith.constant dense<0.000000e+00> : vector<2xf32>
    %206 = vector.multi_reduction <add>, %205, %cst_84 [1] : vector<2x32xf32> to vector<2xf32>
    %207 = vector.shape_cast %206 : vector<2xf32> to vector<2x1xf32>
    %cst_85 = arith.constant 3.125000e-02 : f32
    %208 = vector.broadcast %cst_85 : f32 to vector<2x1xf32>
    %209 = arith.mulf %204, %208 : vector<2x1xf32>
    %cst_86 = arith.constant 3.125000e-02 : f32
    %210 = vector.broadcast %cst_86 : f32 to vector<2x1xf32>
    %211 = arith.mulf %207, %210 : vector<2x1xf32>
    %212 = arith.mulf %209, %209 : vector<2x1xf32>
    %213 = arith.subf %211, %212 : vector<2x1xf32>
    %cst_87 = arith.constant 0.000000e+00 : f32
    %214 = vector.broadcast %cst_87 : f32 to vector<2x1xf32>
    %215 = arith.maximumf %213, %214 : vector<2x1xf32>
    %216 = vector.broadcast %209 : vector<2x1xf32> to vector<2x32xf32>
    %217 = arith.subf %202, %216 : vector<2x32xf32>
    %cst_88 = arith.constant 9.99999974E-6 : f32
    %218 = vector.broadcast %cst_88 : f32 to vector<2x1xf32>
    %219 = arith.addf %215, %218 : vector<2x1xf32>
    %220 = math.rsqrt %219 : vector<2x1xf32>
    %221 = vector.broadcast %220 : vector<2x1xf32> to vector<2x32xf32>
    %222 = arith.mulf %217, %221 : vector<2x32xf32>
    %223 = arith.mulf %222, %18 : vector<2x32xf32>
    %224 = arith.negf %223 : vector<2x32xf32>
    %225 = math.exp %224 : vector<2x32xf32>
    %cst_89 = arith.constant 1.000000e+00 : f32
    %226 = vector.broadcast %cst_89 : f32 to vector<2x32xf32>
    %227 = arith.addf %226, %225 : vector<2x32xf32>
    %228 = arith.divf %226, %227 : vector<2x32xf32>
    %229 = arith.index_cast %c1_i32 : i32 to index
    %c0_90 = arith.constant 0 : index
    %c0_91 = arith.constant 0 : index
    %230 = vector.load %arg5[%229, %c0_90, %c0_91] : memref<4x2x32xf32, #tpu.memory_space<vmem>>, vector<1x2x32xf32>
    %231 = vector.shape_cast %230 : vector<1x2x32xf32> to vector<2x32xf32>
    %232 = arith.addf %231, %194 : vector<2x32xf32>
    %233 = arith.mulf %132, %12 : vector<2x32xf32>
    %234 = arith.addf %232, %233 : vector<2x32xf32>
    %cst_92 = arith.constant dense<0.000000e+00> : vector<2xf32>
    %235 = vector.multi_reduction <add>, %234, %cst_92 [1] : vector<2x32xf32> to vector<2xf32>
    %236 = vector.shape_cast %235 : vector<2xf32> to vector<2x1xf32>
    %237 = arith.mulf %234, %234 : vector<2x32xf32>
    %cst_93 = arith.constant dense<0.000000e+00> : vector<2xf32>
    %238 = vector.multi_reduction <add>, %237, %cst_93 [1] : vector<2x32xf32> to vector<2xf32>
    %239 = vector.shape_cast %238 : vector<2xf32> to vector<2x1xf32>
    %cst_94 = arith.constant 3.125000e-02 : f32
    %240 = vector.broadcast %cst_94 : f32 to vector<2x1xf32>
    %241 = arith.mulf %236, %240 : vector<2x1xf32>
    %cst_95 = arith.constant 3.125000e-02 : f32
    %242 = vector.broadcast %cst_95 : f32 to vector<2x1xf32>
    %243 = arith.mulf %239, %242 : vector<2x1xf32>
    %244 = arith.mulf %241, %241 : vector<2x1xf32>
    %245 = arith.subf %243, %244 : vector<2x1xf32>
    %cst_96 = arith.constant 0.000000e+00 : f32
    %246 = vector.broadcast %cst_96 : f32 to vector<2x1xf32>
    %247 = arith.maximumf %245, %246 : vector<2x1xf32>
    %248 = vector.broadcast %241 : vector<2x1xf32> to vector<2x32xf32>
    %249 = arith.subf %234, %248 : vector<2x32xf32>
    %cst_97 = arith.constant 9.99999974E-6 : f32
    %250 = vector.broadcast %cst_97 : f32 to vector<2x1xf32>
    %251 = arith.addf %247, %250 : vector<2x1xf32>
    %252 = math.rsqrt %251 : vector<2x1xf32>
    %253 = vector.broadcast %252 : vector<2x1xf32> to vector<2x32xf32>
    %254 = arith.mulf %249, %253 : vector<2x32xf32>
    %255 = arith.mulf %254, %21 : vector<2x32xf32>
    %256 = arith.negf %255 : vector<2x32xf32>
    %257 = math.exp %256 : vector<2x32xf32>
    %cst_98 = arith.constant 1.000000e+00 : f32
    %258 = vector.broadcast %cst_98 : f32 to vector<2x32xf32>
    %259 = arith.addf %258, %257 : vector<2x32xf32>
    %260 = arith.divf %258, %259 : vector<2x32xf32>
    %261 = arith.index_cast %c1_i32 : i32 to index
    %c0_99 = arith.constant 0 : index
    %c0_100 = arith.constant 0 : index
    %262 = vector.load %arg6[%261, %c0_99, %c0_100] : memref<4x2x32xf32, #tpu.memory_space<vmem>>, vector<1x2x32xf32>
    %263 = vector.shape_cast %262 : vector<1x2x32xf32> to vector<2x32xf32>
    %264 = arith.addf %263, %195 : vector<2x32xf32>
    %cst_101 = arith.constant dense<0.000000e+00> : vector<2xf32>
    %265 = vector.multi_reduction <add>, %264, %cst_101 [1] : vector<2x32xf32> to vector<2xf32>
    %266 = vector.shape_cast %265 : vector<2xf32> to vector<2x1xf32>
    %267 = arith.mulf %264, %264 : vector<2x32xf32>
    %cst_102 = arith.constant dense<0.000000e+00> : vector<2xf32>
    %268 = vector.multi_reduction <add>, %267, %cst_102 [1] : vector<2x32xf32> to vector<2xf32>
    %269 = vector.shape_cast %268 : vector<2xf32> to vector<2x1xf32>
    %cst_103 = arith.constant 3.125000e-02 : f32
    %270 = vector.broadcast %cst_103 : f32 to vector<2x1xf32>
    %271 = arith.mulf %266, %270 : vector<2x1xf32>
    %cst_104 = arith.constant 3.125000e-02 : f32
    %272 = vector.broadcast %cst_104 : f32 to vector<2x1xf32>
    %273 = arith.mulf %269, %272 : vector<2x1xf32>
    %274 = arith.mulf %271, %271 : vector<2x1xf32>
    %275 = arith.subf %273, %274 : vector<2x1xf32>
    %cst_105 = arith.constant 0.000000e+00 : f32
    %276 = vector.broadcast %cst_105 : f32 to vector<2x1xf32>
    %277 = arith.maximumf %275, %276 : vector<2x1xf32>
    %278 = vector.broadcast %271 : vector<2x1xf32> to vector<2x32xf32>
    %279 = arith.subf %264, %278 : vector<2x32xf32>
    %cst_106 = arith.constant 9.99999974E-6 : f32
    %280 = vector.broadcast %cst_106 : f32 to vector<2x1xf32>
    %281 = arith.addf %277, %280 : vector<2x1xf32>
    %282 = math.rsqrt %281 : vector<2x1xf32>
    %283 = vector.broadcast %282 : vector<2x1xf32> to vector<2x32xf32>
    %284 = arith.mulf %279, %283 : vector<2x32xf32>
    %285 = arith.mulf %284, %24 : vector<2x32xf32>
    %286 = math.tanh %285 : vector<2x32xf32>
    %287 = arith.mulf %228, %132 : vector<2x32xf32>
    %288 = arith.mulf %260, %286 : vector<2x32xf32>
    %289 = arith.addf %287, %288 : vector<2x32xf32>
    %290 = arith.index_cast %c1_i32 : i32 to index
    %c0_107 = arith.constant 0 : index
    %c0_108 = arith.constant 0 : index
    %291 = vector.load %arg7[%290, %c0_107, %c0_108] : memref<4x2x32xf32, #tpu.memory_space<vmem>>, vector<1x2x32xf32>
    %292 = vector.shape_cast %291 : vector<1x2x32xf32> to vector<2x32xf32>
    %293 = arith.addf %292, %196 : vector<2x32xf32>
    %294 = arith.mulf %289, %15 : vector<2x32xf32>
    %295 = arith.addf %293, %294 : vector<2x32xf32>
    %cst_109 = arith.constant dense<0.000000e+00> : vector<2xf32>
    %296 = vector.multi_reduction <add>, %295, %cst_109 [1] : vector<2x32xf32> to vector<2xf32>
    %297 = vector.shape_cast %296 : vector<2xf32> to vector<2x1xf32>
    %298 = arith.mulf %295, %295 : vector<2x32xf32>
    %cst_110 = arith.constant dense<0.000000e+00> : vector<2xf32>
    %299 = vector.multi_reduction <add>, %298, %cst_110 [1] : vector<2x32xf32> to vector<2xf32>
    %300 = vector.shape_cast %299 : vector<2xf32> to vector<2x1xf32>
    %cst_111 = arith.constant 3.125000e-02 : f32
    %301 = vector.broadcast %cst_111 : f32 to vector<2x1xf32>
    %302 = arith.mulf %297, %301 : vector<2x1xf32>
    %cst_112 = arith.constant 3.125000e-02 : f32
    %303 = vector.broadcast %cst_112 : f32 to vector<2x1xf32>
    %304 = arith.mulf %300, %303 : vector<2x1xf32>
    %305 = arith.mulf %302, %302 : vector<2x1xf32>
    %306 = arith.subf %304, %305 : vector<2x1xf32>
    %cst_113 = arith.constant 0.000000e+00 : f32
    %307 = vector.broadcast %cst_113 : f32 to vector<2x1xf32>
    %308 = arith.maximumf %306, %307 : vector<2x1xf32>
    %309 = vector.broadcast %302 : vector<2x1xf32> to vector<2x32xf32>
    %310 = arith.subf %295, %309 : vector<2x32xf32>
    %cst_114 = arith.constant 9.99999974E-6 : f32
    %311 = vector.broadcast %cst_114 : f32 to vector<2x1xf32>
    %312 = arith.addf %308, %311 : vector<2x1xf32>
    %313 = math.rsqrt %312 : vector<2x1xf32>
    %314 = vector.broadcast %313 : vector<2x1xf32> to vector<2x32xf32>
    %315 = arith.mulf %310, %314 : vector<2x32xf32>
    %316 = arith.mulf %315, %27 : vector<2x32xf32>
    %317 = arith.negf %316 : vector<2x32xf32>
    %318 = math.exp %317 : vector<2x32xf32>
    %cst_115 = arith.constant 1.000000e+00 : f32
    %319 = vector.broadcast %cst_115 : f32 to vector<2x32xf32>
    %320 = arith.addf %319, %318 : vector<2x32xf32>
    %321 = arith.divf %319, %320 : vector<2x32xf32>
    %cst_116 = arith.constant dense<0.000000e+00> : vector<2xf32>
    %322 = vector.multi_reduction <add>, %289, %cst_116 [1] : vector<2x32xf32> to vector<2xf32>
    %323 = vector.shape_cast %322 : vector<2xf32> to vector<2x1xf32>
    %324 = arith.mulf %289, %289 : vector<2x32xf32>
    %cst_117 = arith.constant dense<0.000000e+00> : vector<2xf32>
    %325 = vector.multi_reduction <add>, %324, %cst_117 [1] : vector<2x32xf32> to vector<2xf32>
    %326 = vector.shape_cast %325 : vector<2xf32> to vector<2x1xf32>
    %cst_118 = arith.constant 3.125000e-02 : f32
    %327 = vector.broadcast %cst_118 : f32 to vector<2x1xf32>
    %328 = arith.mulf %323, %327 : vector<2x1xf32>
    %cst_119 = arith.constant 3.125000e-02 : f32
    %329 = vector.broadcast %cst_119 : f32 to vector<2x1xf32>
    %330 = arith.mulf %326, %329 : vector<2x1xf32>
    %331 = arith.mulf %328, %328 : vector<2x1xf32>
    %332 = arith.subf %330, %331 : vector<2x1xf32>
    %cst_120 = arith.constant 0.000000e+00 : f32
    %333 = vector.broadcast %cst_120 : f32 to vector<2x1xf32>
    %334 = arith.maximumf %332, %333 : vector<2x1xf32>
    %335 = vector.broadcast %328 : vector<2x1xf32> to vector<2x32xf32>
    %336 = arith.subf %289, %335 : vector<2x32xf32>
    %cst_121 = arith.constant 9.99999974E-6 : f32
    %337 = vector.broadcast %cst_121 : f32 to vector<2x1xf32>
    %338 = arith.addf %334, %337 : vector<2x1xf32>
    %339 = math.rsqrt %338 : vector<2x1xf32>
    %340 = vector.broadcast %339 : vector<2x1xf32> to vector<2x32xf32>
    %341 = arith.mulf %336, %340 : vector<2x32xf32>
    %342 = arith.mulf %341, %30 : vector<2x32xf32>
    %343 = arith.addf %342, %33 : vector<2x32xf32>
    %344 = math.tanh %343 : vector<2x32xf32>
    %345 = arith.mulf %321, %344 : vector<2x32xf32>
    %346 = arith.index_cast %c1_i32 : i32 to index
    %c0_122 = arith.constant 0 : index
    %c0_123 = arith.constant 0 : index
    %347 = vector.load %arg21[%346, %c0_122, %c0_123] : memref<4x2x32xf32, #tpu.memory_space<vmem>>, vector<1x2x32xf32>
    %348 = vector.shape_cast %347 : vector<1x2x32xf32> to vector<2x32xf32>
    %349 = vector.shape_cast %345 : vector<2x32xf32> to vector<1x2x32xf32>
    tpu.vector_store %arg21[%346, %c0_122, %c0_123], %349 {strides = array<i32>} : memref<4x2x32xf32, #tpu.memory_space<vmem>>, vector<1x2x32xf32>,
    %c2_i32 = arith.constant 2 : i32
    %cst_124 = arith.constant dense<0.000000e+00> : vector<2x32xf32>
    %350 = tpu.matmul %345, %3, %cst_124 {dimension_numbers = #tpu.dot_dimension_numbers<[1], [0], [0], [1], [0, 0, 1, 1], [], []>} : vector<2x32xf32>, vector<32x32xf32>, vector<2x32xf32> -> vector<2x32xf32>
    %cst_125 = arith.constant dense<0.000000e+00> : vector<2x32xf32>
    %351 = tpu.matmul %345, %4, %cst_125 {dimension_numbers = #tpu.dot_dimension_numbers<[1], [0], [0], [1], [0, 0, 1, 1], [], []>} : vector<2x32xf32>, vector<32x32xf32>, vector<2x32xf32> -> vector<2x32xf32>
    %cst_126 = arith.constant dense<0.000000e+00> : vector<2x32xf32>
    %352 = tpu.matmul %345, %5, %cst_126 {dimension_numbers = #tpu.dot_dimension_numbers<[1], [0], [0], [1], [0, 0, 1, 1], [], []>} : vector<2x32xf32>, vector<32x32xf32>, vector<2x32xf32> -> vector<2x32xf32>
    %cst_127 = arith.constant dense<0.000000e+00> : vector<2x32xf32>
    %353 = tpu.matmul %345, %6, %cst_127 {dimension_numbers = #tpu.dot_dimension_numbers<[1], [0], [0], [1], [0, 0, 1, 1], [], []>} : vector<2x32xf32>, vector<32x32xf32>, vector<2x32xf32> -> vector<2x32xf32>
    %354 = arith.index_cast %c2_i32 : i32 to index
    %c0_128 = arith.constant 0 : index
    %c0_129 = arith.constant 0 : index
    %355 = vector.load %arg4[%354, %c0_128, %c0_129] : memref<4x2x32xf32, #tpu.memory_space<vmem>>, vector<1x2x32xf32>
    %356 = vector.shape_cast %355 : vector<1x2x32xf32> to vector<2x32xf32>
    %357 = arith.addf %356, %350 : vector<2x32xf32>
    %358 = arith.mulf %289, %9 : vector<2x32xf32>
    %359 = arith.addf %357, %358 : vector<2x32xf32>
    %cst_130 = arith.constant dense<0.000000e+00> : vector<2xf32>
    %360 = vector.multi_reduction <add>, %359, %cst_130 [1] : vector<2x32xf32> to vector<2xf32>
    %361 = vector.shape_cast %360 : vector<2xf32> to vector<2x1xf32>
    %362 = arith.mulf %359, %359 : vector<2x32xf32>
    %cst_131 = arith.constant dense<0.000000e+00> : vector<2xf32>
    %363 = vector.multi_reduction <add>, %362, %cst_131 [1] : vector<2x32xf32> to vector<2xf32>
    %364 = vector.shape_cast %363 : vector<2xf32> to vector<2x1xf32>
    %cst_132 = arith.constant 3.125000e-02 : f32
    %365 = vector.broadcast %cst_132 : f32 to vector<2x1xf32>
    %366 = arith.mulf %361, %365 : vector<2x1xf32>
    %cst_133 = arith.constant 3.125000e-02 : f32
    %367 = vector.broadcast %cst_133 : f32 to vector<2x1xf32>
    %368 = arith.mulf %364, %367 : vector<2x1xf32>
    %369 = arith.mulf %366, %366 : vector<2x1xf32>
    %370 = arith.subf %368, %369 : vector<2x1xf32>
    %cst_134 = arith.constant 0.000000e+00 : f32
    %371 = vector.broadcast %cst_134 : f32 to vector<2x1xf32>
    %372 = arith.maximumf %370, %371 : vector<2x1xf32>
    %373 = vector.broadcast %366 : vector<2x1xf32> to vector<2x32xf32>
    %374 = arith.subf %359, %373 : vector<2x32xf32>
    %cst_135 = arith.constant 9.99999974E-6 : f32
    %375 = vector.broadcast %cst_135 : f32 to vector<2x1xf32>
    %376 = arith.addf %372, %375 : vector<2x1xf32>
    %377 = math.rsqrt %376 : vector<2x1xf32>
    %378 = vector.broadcast %377 : vector<2x1xf32> to vector<2x32xf32>
    %379 = arith.mulf %374, %378 : vector<2x32xf32>
    %380 = arith.mulf %379, %18 : vector<2x32xf32>
    %381 = arith.negf %380 : vector<2x32xf32>
    %382 = math.exp %381 : vector<2x32xf32>
    %cst_136 = arith.constant 1.000000e+00 : f32
    %383 = vector.broadcast %cst_136 : f32 to vector<2x32xf32>
    %384 = arith.addf %383, %382 : vector<2x32xf32>
    %385 = arith.divf %383, %384 : vector<2x32xf32>
    %386 = arith.index_cast %c2_i32 : i32 to index
    %c0_137 = arith.constant 0 : index
    %c0_138 = arith.constant 0 : index
    %387 = vector.load %arg5[%386, %c0_137, %c0_138] : memref<4x2x32xf32, #tpu.memory_space<vmem>>, vector<1x2x32xf32>
    %388 = vector.shape_cast %387 : vector<1x2x32xf32> to vector<2x32xf32>
    %389 = arith.addf %388, %351 : vector<2x32xf32>
    %390 = arith.mulf %289, %12 : vector<2x32xf32>
    %391 = arith.addf %389, %390 : vector<2x32xf32>
    %cst_139 = arith.constant dense<0.000000e+00> : vector<2xf32>
    %392 = vector.multi_reduction <add>, %391, %cst_139 [1] : vector<2x32xf32> to vector<2xf32>
    %393 = vector.shape_cast %392 : vector<2xf32> to vector<2x1xf32>
    %394 = arith.mulf %391, %391 : vector<2x32xf32>
    %cst_140 = arith.constant dense<0.000000e+00> : vector<2xf32>
    %395 = vector.multi_reduction <add>, %394, %cst_140 [1] : vector<2x32xf32> to vector<2xf32>
    %396 = vector.shape_cast %395 : vector<2xf32> to vector<2x1xf32>
    %cst_141 = arith.constant 3.125000e-02 : f32
    %397 = vector.broadcast %cst_141 : f32 to vector<2x1xf32>
    %398 = arith.mulf %393, %397 : vector<2x1xf32>
    %cst_142 = arith.constant 3.125000e-02 : f32
    %399 = vector.broadcast %cst_142 : f32 to vector<2x1xf32>
    %400 = arith.mulf %396, %399 : vector<2x1xf32>
    %401 = arith.mulf %398, %398 : vector<2x1xf32>
    %402 = arith.subf %400, %401 : vector<2x1xf32>
    %cst_143 = arith.constant 0.000000e+00 : f32
    %403 = vector.broadcast %cst_143 : f32 to vector<2x1xf32>
    %404 = arith.maximumf %402, %403 : vector<2x1xf32>
    %405 = vector.broadcast %398 : vector<2x1xf32> to vector<2x32xf32>
    %406 = arith.subf %391, %405 : vector<2x32xf32>
    %cst_144 = arith.constant 9.99999974E-6 : f32
    %407 = vector.broadcast %cst_144 : f32 to vector<2x1xf32>
    %408 = arith.addf %404, %407 : vector<2x1xf32>
    %409 = math.rsqrt %408 : vector<2x1xf32>
    %410 = vector.broadcast %409 : vector<2x1xf32> to vector<2x32xf32>
    %411 = arith.mulf %406, %410 : vector<2x32xf32>
    %412 = arith.mulf %411, %21 : vector<2x32xf32>
    %413 = arith.negf %412 : vector<2x32xf32>
    %414 = math.exp %413 : vector<2x32xf32>
    %cst_145 = arith.constant 1.000000e+00 : f32
    %415 = vector.broadcast %cst_145 : f32 to vector<2x32xf32>
    %416 = arith.addf %415, %414 : vector<2x32xf32>
    %417 = arith.divf %415, %416 : vector<2x32xf32>
    %418 = arith.index_cast %c2_i32 : i32 to index
    %c0_146 = arith.constant 0 : index
    %c0_147 = arith.constant 0 : index
    %419 = vector.load %arg6[%418, %c0_146, %c0_147] : memref<4x2x32xf32, #tpu.memory_space<vmem>>, vector<1x2x32xf32>
    %420 = vector.shape_cast %419 : vector<1x2x32xf32> to vector<2x32xf32>
    %421 = arith.addf %420, %352 : vector<2x32xf32>
    %cst_148 = arith.constant dense<0.000000e+00> : vector<2xf32>
    %422 = vector.multi_reduction <add>, %421, %cst_148 [1] : vector<2x32xf32> to vector<2xf32>
    %423 = vector.shape_cast %422 : vector<2xf32> to vector<2x1xf32>
    %424 = arith.mulf %421, %421 : vector<2x32xf32>
    %cst_149 = arith.constant dense<0.000000e+00> : vector<2xf32>
    %425 = vector.multi_reduction <add>, %424, %cst_149 [1] : vector<2x32xf32> to vector<2xf32>
    %426 = vector.shape_cast %425 : vector<2xf32> to vector<2x1xf32>
    %cst_150 = arith.constant 3.125000e-02 : f32
    %427 = vector.broadcast %cst_150 : f32 to vector<2x1xf32>
    %428 = arith.mulf %423, %427 : vector<2x1xf32>
    %cst_151 = arith.constant 3.125000e-02 : f32
    %429 = vector.broadcast %cst_151 : f32 to vector<2x1xf32>
    %430 = arith.mulf %426, %429 : vector<2x1xf32>
    %431 = arith.mulf %428, %428 : vector<2x1xf32>
    %432 = arith.subf %430, %431 : vector<2x1xf32>
    %cst_152 = arith.constant 0.000000e+00 : f32
    %433 = vector.broadcast %cst_152 : f32 to vector<2x1xf32>
    %434 = arith.maximumf %432, %433 : vector<2x1xf32>
    %435 = vector.broadcast %428 : vector<2x1xf32> to vector<2x32xf32>
    %436 = arith.subf %421, %435 : vector<2x32xf32>
    %cst_153 = arith.constant 9.99999974E-6 : f32
    %437 = vector.broadcast %cst_153 : f32 to vector<2x1xf32>
    %438 = arith.addf %434, %437 : vector<2x1xf32>
    %439 = math.rsqrt %438 : vector<2x1xf32>
    %440 = vector.broadcast %439 : vector<2x1xf32> to vector<2x32xf32>
    %441 = arith.mulf %436, %440 : vector<2x32xf32>
    %442 = arith.mulf %441, %24 : vector<2x32xf32>
    %443 = math.tanh %442 : vector<2x32xf32>
    %444 = arith.mulf %385, %289 : vector<2x32xf32>
    %445 = arith.mulf %417, %443 : vector<2x32xf32>
    %446 = arith.addf %444, %445 : vector<2x32xf32>
    %447 = arith.index_cast %c2_i32 : i32 to index
    %c0_154 = arith.constant 0 : index
    %c0_155 = arith.constant 0 : index
    %448 = vector.load %arg7[%447, %c0_154, %c0_155] : memref<4x2x32xf32, #tpu.memory_space<vmem>>, vector<1x2x32xf32>
    %449 = vector.shape_cast %448 : vector<1x2x32xf32> to vector<2x32xf32>
    %450 = arith.addf %449, %353 : vector<2x32xf32>
    %451 = arith.mulf %446, %15 : vector<2x32xf32>
    %452 = arith.addf %450, %451 : vector<2x32xf32>
    %cst_156 = arith.constant dense<0.000000e+00> : vector<2xf32>
    %453 = vector.multi_reduction <add>, %452, %cst_156 [1] : vector<2x32xf32> to vector<2xf32>
    %454 = vector.shape_cast %453 : vector<2xf32> to vector<2x1xf32>
    %455 = arith.mulf %452, %452 : vector<2x32xf32>
    %cst_157 = arith.constant dense<0.000000e+00> : vector<2xf32>
    %456 = vector.multi_reduction <add>, %455, %cst_157 [1] : vector<2x32xf32> to vector<2xf32>
    %457 = vector.shape_cast %456 : vector<2xf32> to vector<2x1xf32>
    %cst_158 = arith.constant 3.125000e-02 : f32
    %458 = vector.broadcast %cst_158 : f32 to vector<2x1xf32>
    %459 = arith.mulf %454, %458 : vector<2x1xf32>
    %cst_159 = arith.constant 3.125000e-02 : f32
    %460 = vector.broadcast %cst_159 : f32 to vector<2x1xf32>
    %461 = arith.mulf %457, %460 : vector<2x1xf32>
    %462 = arith.mulf %459, %459 : vector<2x1xf32>
    %463 = arith.subf %461, %462 : vector<2x1xf32>
    %cst_160 = arith.constant 0.000000e+00 : f32
    %464 = vector.broadcast %cst_160 : f32 to vector<2x1xf32>
    %465 = arith.maximumf %463, %464 : vector<2x1xf32>
    %466 = vector.broadcast %459 : vector<2x1xf32> to vector<2x32xf32>
    %467 = arith.subf %452, %466 : vector<2x32xf32>
    %cst_161 = arith.constant 9.99999974E-6 : f32
    %468 = vector.broadcast %cst_161 : f32 to vector<2x1xf32>
    %469 = arith.addf %465, %468 : vector<2x1xf32>
    %470 = math.rsqrt %469 : vector<2x1xf32>
    %471 = vector.broadcast %470 : vector<2x1xf32> to vector<2x32xf32>
    %472 = arith.mulf %467, %471 : vector<2x32xf32>
    %473 = arith.mulf %472, %27 : vector<2x32xf32>
    %474 = arith.negf %473 : vector<2x32xf32>
    %475 = math.exp %474 : vector<2x32xf32>
    %cst_162 = arith.constant 1.000000e+00 : f32
    %476 = vector.broadcast %cst_162 : f32 to vector<2x32xf32>
    %477 = arith.addf %476, %475 : vector<2x32xf32>
    %478 = arith.divf %476, %477 : vector<2x32xf32>
    %cst_163 = arith.constant dense<0.000000e+00> : vector<2xf32>
    %479 = vector.multi_reduction <add>, %446, %cst_163 [1] : vector<2x32xf32> to vector<2xf32>
    %480 = vector.shape_cast %479 : vector<2xf32> to vector<2x1xf32>
    %481 = arith.mulf %446, %446 : vector<2x32xf32>
    %cst_164 = arith.constant dense<0.000000e+00> : vector<2xf32>
    %482 = vector.multi_reduction <add>, %481, %cst_164 [1] : vector<2x32xf32> to vector<2xf32>
    %483 = vector.shape_cast %482 : vector<2xf32> to vector<2x1xf32>
    %cst_165 = arith.constant 3.125000e-02 : f32
    %484 = vector.broadcast %cst_165 : f32 to vector<2x1xf32>
    %485 = arith.mulf %480, %484 : vector<2x1xf32>
    %cst_166 = arith.constant 3.125000e-02 : f32
    %486 = vector.broadcast %cst_166 : f32 to vector<2x1xf32>
    %487 = arith.mulf %483, %486 : vector<2x1xf32>
    %488 = arith.mulf %485, %485 : vector<2x1xf32>
    %489 = arith.subf %487, %488 : vector<2x1xf32>
    %cst_167 = arith.constant 0.000000e+00 : f32
    %490 = vector.broadcast %cst_167 : f32 to vector<2x1xf32>
    %491 = arith.maximumf %489, %490 : vector<2x1xf32>
    %492 = vector.broadcast %485 : vector<2x1xf32> to vector<2x32xf32>
    %493 = arith.subf %446, %492 : vector<2x32xf32>
    %cst_168 = arith.constant 9.99999974E-6 : f32
    %494 = vector.broadcast %cst_168 : f32 to vector<2x1xf32>
    %495 = arith.addf %491, %494 : vector<2x1xf32>
    %496 = math.rsqrt %495 : vector<2x1xf32>
    %497 = vector.broadcast %496 : vector<2x1xf32> to vector<2x32xf32>
    %498 = arith.mulf %493, %497 : vector<2x32xf32>
    %499 = arith.mulf %498, %30 : vector<2x32xf32>
    %500 = arith.addf %499, %33 : vector<2x32xf32>
    %501 = math.tanh %500 : vector<2x32xf32>
    %502 = arith.mulf %478, %501 : vector<2x32xf32>
    %503 = arith.index_cast %c2_i32 : i32 to index
    %c0_169 = arith.constant 0 : index
    %c0_170 = arith.constant 0 : index
    %504 = vector.load %arg21[%503, %c0_169, %c0_170] : memref<4x2x32xf32, #tpu.memory_space<vmem>>, vector<1x2x32xf32>
    %505 = vector.shape_cast %504 : vector<1x2x32xf32> to vector<2x32xf32>
    %506 = vector.shape_cast %502 : vector<2x32xf32> to vector<1x2x32xf32>
    tpu.vector_store %arg21[%503, %c0_169, %c0_170], %506 {strides = array<i32>} : memref<4x2x32xf32, #tpu.memory_space<vmem>>, vector<1x2x32xf32>,
    %c3_i32 = arith.constant 3 : i32
    %cst_171 = arith.constant dense<0.000000e+00> : vector<2x32xf32>
    %507 = tpu.matmul %502, %3, %cst_171 {dimension_numbers = #tpu.dot_dimension_numbers<[1], [0], [0], [1], [0, 0, 1, 1], [], []>} : vector<2x32xf32>, vector<32x32xf32>, vector<2x32xf32> -> vector<2x32xf32>
    %cst_172 = arith.constant dense<0.000000e+00> : vector<2x32xf32>
    %508 = tpu.matmul %502, %4, %cst_172 {dimension_numbers = #tpu.dot_dimension_numbers<[1], [0], [0], [1], [0, 0, 1, 1], [], []>} : vector<2x32xf32>, vector<32x32xf32>, vector<2x32xf32> -> vector<2x32xf32>
    %cst_173 = arith.constant dense<0.000000e+00> : vector<2x32xf32>
    %509 = tpu.matmul %502, %5, %cst_173 {dimension_numbers = #tpu.dot_dimension_numbers<[1], [0], [0], [1], [0, 0, 1, 1], [], []>} : vector<2x32xf32>, vector<32x32xf32>, vector<2x32xf32> -> vector<2x32xf32>
    %cst_174 = arith.constant dense<0.000000e+00> : vector<2x32xf32>
    %510 = tpu.matmul %502, %6, %cst_174 {dimension_numbers = #tpu.dot_dimension_numbers<[1], [0], [0], [1], [0, 0, 1, 1], [], []>} : vector<2x32xf32>, vector<32x32xf32>, vector<2x32xf32> -> vector<2x32xf32>
    %511 = arith.index_cast %c3_i32 : i32 to index
    %c0_175 = arith.constant 0 : index
    %c0_176 = arith.constant 0 : index
    %512 = vector.load %arg4[%511, %c0_175, %c0_176] : memref<4x2x32xf32, #tpu.memory_space<vmem>>, vector<1x2x32xf32>
    %513 = vector.shape_cast %512 : vector<1x2x32xf32> to vector<2x32xf32>
    %514 = arith.addf %513, %507 : vector<2x32xf32>
    %515 = arith.mulf %446, %9 : vector<2x32xf32>
    %516 = arith.addf %514, %515 : vector<2x32xf32>
    %cst_177 = arith.constant dense<0.000000e+00> : vector<2xf32>
    %517 = vector.multi_reduction <add>, %516, %cst_177 [1] : vector<2x32xf32> to vector<2xf32>
    %518 = vector.shape_cast %517 : vector<2xf32> to vector<2x1xf32>
    %519 = arith.mulf %516, %516 : vector<2x32xf32>
    %cst_178 = arith.constant dense<0.000000e+00> : vector<2xf32>
    %520 = vector.multi_reduction <add>, %519, %cst_178 [1] : vector<2x32xf32> to vector<2xf32>
    %521 = vector.shape_cast %520 : vector<2xf32> to vector<2x1xf32>
    %cst_179 = arith.constant 3.125000e-02 : f32
    %522 = vector.broadcast %cst_179 : f32 to vector<2x1xf32>
    %523 = arith.mulf %518, %522 : vector<2x1xf32>
    %cst_180 = arith.constant 3.125000e-02 : f32
    %524 = vector.broadcast %cst_180 : f32 to vector<2x1xf32>
    %525 = arith.mulf %521, %524 : vector<2x1xf32>
    %526 = arith.mulf %523, %523 : vector<2x1xf32>
    %527 = arith.subf %525, %526 : vector<2x1xf32>
    %cst_181 = arith.constant 0.000000e+00 : f32
    %528 = vector.broadcast %cst_181 : f32 to vector<2x1xf32>
    %529 = arith.maximumf %527, %528 : vector<2x1xf32>
    %530 = vector.broadcast %523 : vector<2x1xf32> to vector<2x32xf32>
    %531 = arith.subf %516, %530 : vector<2x32xf32>
    %cst_182 = arith.constant 9.99999974E-6 : f32
    %532 = vector.broadcast %cst_182 : f32 to vector<2x1xf32>
    %533 = arith.addf %529, %532 : vector<2x1xf32>
    %534 = math.rsqrt %533 : vector<2x1xf32>
    %535 = vector.broadcast %534 : vector<2x1xf32> to vector<2x32xf32>
    %536 = arith.mulf %531, %535 : vector<2x32xf32>
    %537 = arith.mulf %536, %18 : vector<2x32xf32>
    %538 = arith.negf %537 : vector<2x32xf32>
    %539 = math.exp %538 : vector<2x32xf32>
    %cst_183 = arith.constant 1.000000e+00 : f32
    %540 = vector.broadcast %cst_183 : f32 to vector<2x32xf32>
    %541 = arith.addf %540, %539 : vector<2x32xf32>
    %542 = arith.divf %540, %541 : vector<2x32xf32>
    %543 = arith.index_cast %c3_i32 : i32 to index
    %c0_184 = arith.constant 0 : index
    %c0_185 = arith.constant 0 : index
    %544 = vector.load %arg5[%543, %c0_184, %c0_185] : memref<4x2x32xf32, #tpu.memory_space<vmem>>, vector<1x2x32xf32>
    %545 = vector.shape_cast %544 : vector<1x2x32xf32> to vector<2x32xf32>
    %546 = arith.addf %545, %508 : vector<2x32xf32>
    %547 = arith.mulf %446, %12 : vector<2x32xf32>
    %548 = arith.addf %546, %547 : vector<2x32xf32>
    %cst_186 = arith.constant dense<0.000000e+00> : vector<2xf32>
    %549 = vector.multi_reduction <add>, %548, %cst_186 [1] : vector<2x32xf32> to vector<2xf32>
    %550 = vector.shape_cast %549 : vector<2xf32> to vector<2x1xf32>
    %551 = arith.mulf %548, %548 : vector<2x32xf32>
    %cst_187 = arith.constant dense<0.000000e+00> : vector<2xf32>
    %552 = vector.multi_reduction <add>, %551, %cst_187 [1] : vector<2x32xf32> to vector<2xf32>
    %553 = vector.shape_cast %552 : vector<2xf32> to vector<2x1xf32>
    %cst_188 = arith.constant 3.125000e-02 : f32
    %554 = vector.broadcast %cst_188 : f32 to vector<2x1xf32>
    %555 = arith.mulf %550, %554 : vector<2x1xf32>
    %cst_189 = arith.constant 3.125000e-02 : f32
    %556 = vector.broadcast %cst_189 : f32 to vector<2x1xf32>
    %557 = arith.mulf %553, %556 : vector<2x1xf32>
    %558 = arith.mulf %555, %555 : vector<2x1xf32>
    %559 = arith.subf %557, %558 : vector<2x1xf32>
    %cst_190 = arith.constant 0.000000e+00 : f32
    %560 = vector.broadcast %cst_190 : f32 to vector<2x1xf32>
    %561 = arith.maximumf %559, %560 : vector<2x1xf32>
    %562 = vector.broadcast %555 : vector<2x1xf32> to vector<2x32xf32>
    %563 = arith.subf %548, %562 : vector<2x32xf32>
    %cst_191 = arith.constant 9.99999974E-6 : f32
    %564 = vector.broadcast %cst_191 : f32 to vector<2x1xf32>
    %565 = arith.addf %561, %564 : vector<2x1xf32>
    %566 = math.rsqrt %565 : vector<2x1xf32>
    %567 = vector.broadcast %566 : vector<2x1xf32> to vector<2x32xf32>
    %568 = arith.mulf %563, %567 : vector<2x32xf32>
    %569 = arith.mulf %568, %21 : vector<2x32xf32>
    %570 = arith.negf %569 : vector<2x32xf32>
    %571 = math.exp %570 : vector<2x32xf32>
    %cst_192 = arith.constant 1.000000e+00 : f32
    %572 = vector.broadcast %cst_192 : f32 to vector<2x32xf32>
    %573 = arith.addf %572, %571 : vector<2x32xf32>
    %574 = arith.divf %572, %573 : vector<2x32xf32>
    %575 = arith.index_cast %c3_i32 : i32 to index
    %c0_193 = arith.constant 0 : index
    %c0_194 = arith.constant 0 : index
    %576 = vector.load %arg6[%575, %c0_193, %c0_194] : memref<4x2x32xf32, #tpu.memory_space<vmem>>, vector<1x2x32xf32>
    %577 = vector.shape_cast %576 : vector<1x2x32xf32> to vector<2x32xf32>
    %578 = arith.addf %577, %509 : vector<2x32xf32>
    %cst_195 = arith.constant dense<0.000000e+00> : vector<2xf32>
    %579 = vector.multi_reduction <add>, %578, %cst_195 [1] : vector<2x32xf32> to vector<2xf32>
    %580 = vector.shape_cast %579 : vector<2xf32> to vector<2x1xf32>
    %581 = arith.mulf %578, %578 : vector<2x32xf32>
    %cst_196 = arith.constant dense<0.000000e+00> : vector<2xf32>
    %582 = vector.multi_reduction <add>, %581, %cst_196 [1] : vector<2x32xf32> to vector<2xf32>
    %583 = vector.shape_cast %582 : vector<2xf32> to vector<2x1xf32>
    %cst_197 = arith.constant 3.125000e-02 : f32
    %584 = vector.broadcast %cst_197 : f32 to vector<2x1xf32>
    %585 = arith.mulf %580, %584 : vector<2x1xf32>
    %cst_198 = arith.constant 3.125000e-02 : f32
    %586 = vector.broadcast %cst_198 : f32 to vector<2x1xf32>
    %587 = arith.mulf %583, %586 : vector<2x1xf32>
    %588 = arith.mulf %585, %585 : vector<2x1xf32>
    %589 = arith.subf %587, %588 : vector<2x1xf32>
    %cst_199 = arith.constant 0.000000e+00 : f32
    %590 = vector.broadcast %cst_199 : f32 to vector<2x1xf32>
    %591 = arith.maximumf %589, %590 : vector<2x1xf32>
    %592 = vector.broadcast %585 : vector<2x1xf32> to vector<2x32xf32>
    %593 = arith.subf %578, %592 : vector<2x32xf32>
    %cst_200 = arith.constant 9.99999974E-6 : f32
    %594 = vector.broadcast %cst_200 : f32 to vector<2x1xf32>
    %595 = arith.addf %591, %594 : vector<2x1xf32>
    %596 = math.rsqrt %595 : vector<2x1xf32>
    %597 = vector.broadcast %596 : vector<2x1xf32> to vector<2x32xf32>
    %598 = arith.mulf %593, %597 : vector<2x32xf32>
    %599 = arith.mulf %598, %24 : vector<2x32xf32>
    %600 = math.tanh %599 : vector<2x32xf32>
    %601 = arith.mulf %542, %446 : vector<2x32xf32>
    %602 = arith.mulf %574, %600 : vector<2x32xf32>
    %603 = arith.addf %601, %602 : vector<2x32xf32>
    %604 = arith.index_cast %c3_i32 : i32 to index
    %c0_201 = arith.constant 0 : index
    %c0_202 = arith.constant 0 : index
    %605 = vector.load %arg7[%604, %c0_201, %c0_202] : memref<4x2x32xf32, #tpu.memory_space<vmem>>, vector<1x2x32xf32>
    %606 = vector.shape_cast %605 : vector<1x2x32xf32> to vector<2x32xf32>
    %607 = arith.addf %606, %510 : vector<2x32xf32>
    %608 = arith.mulf %603, %15 : vector<2x32xf32>
    %609 = arith.addf %607, %608 : vector<2x32xf32>
    %cst_203 = arith.constant dense<0.000000e+00> : vector<2xf32>
    %610 = vector.multi_reduction <add>, %609, %cst_203 [1] : vector<2x32xf32> to vector<2xf32>
    %611 = vector.shape_cast %610 : vector<2xf32> to vector<2x1xf32>
    %612 = arith.mulf %609, %609 : vector<2x32xf32>
    %cst_204 = arith.constant dense<0.000000e+00> : vector<2xf32>
    %613 = vector.multi_reduction <add>, %612, %cst_204 [1] : vector<2x32xf32> to vector<2xf32>
    %614 = vector.shape_cast %613 : vector<2xf32> to vector<2x1xf32>
    %cst_205 = arith.constant 3.125000e-02 : f32
    %615 = vector.broadcast %cst_205 : f32 to vector<2x1xf32>
    %616 = arith.mulf %611, %615 : vector<2x1xf32>
    %cst_206 = arith.constant 3.125000e-02 : f32
    %617 = vector.broadcast %cst_206 : f32 to vector<2x1xf32>
    %618 = arith.mulf %614, %617 : vector<2x1xf32>
    %619 = arith.mulf %616, %616 : vector<2x1xf32>
    %620 = arith.subf %618, %619 : vector<2x1xf32>
    %cst_207 = arith.constant 0.000000e+00 : f32
    %621 = vector.broadcast %cst_207 : f32 to vector<2x1xf32>
    %622 = arith.maximumf %620, %621 : vector<2x1xf32>
    %623 = vector.broadcast %616 : vector<2x1xf32> to vector<2x32xf32>
    %624 = arith.subf %609, %623 : vector<2x32xf32>
    %cst_208 = arith.constant 9.99999974E-6 : f32
    %625 = vector.broadcast %cst_208 : f32 to vector<2x1xf32>
    %626 = arith.addf %622, %625 : vector<2x1xf32>
    %627 = math.rsqrt %626 : vector<2x1xf32>
    %628 = vector.broadcast %627 : vector<2x1xf32> to vector<2x32xf32>
    %629 = arith.mulf %624, %628 : vector<2x32xf32>
    %630 = arith.mulf %629, %27 : vector<2x32xf32>
    %631 = arith.negf %630 : vector<2x32xf32>
    %632 = math.exp %631 : vector<2x32xf32>
    %cst_209 = arith.constant 1.000000e+00 : f32
    %633 = vector.broadcast %cst_209 : f32 to vector<2x32xf32>
    %634 = arith.addf %633, %632 : vector<2x32xf32>
    %635 = arith.divf %633, %634 : vector<2x32xf32>
    %cst_210 = arith.constant dense<0.000000e+00> : vector<2xf32>
    %636 = vector.multi_reduction <add>, %603, %cst_210 [1] : vector<2x32xf32> to vector<2xf32>
    %637 = vector.shape_cast %636 : vector<2xf32> to vector<2x1xf32>
    %638 = arith.mulf %603, %603 : vector<2x32xf32>
    %cst_211 = arith.constant dense<0.000000e+00> : vector<2xf32>
    %639 = vector.multi_reduction <add>, %638, %cst_211 [1] : vector<2x32xf32> to vector<2xf32>
    %640 = vector.shape_cast %639 : vector<2xf32> to vector<2x1xf32>
    %cst_212 = arith.constant 3.125000e-02 : f32
    %641 = vector.broadcast %cst_212 : f32 to vector<2x1xf32>
    %642 = arith.mulf %637, %641 : vector<2x1xf32>
    %cst_213 = arith.constant 3.125000e-02 : f32
    %643 = vector.broadcast %cst_213 : f32 to vector<2x1xf32>
    %644 = arith.mulf %640, %643 : vector<2x1xf32>
    %645 = arith.mulf %642, %642 : vector<2x1xf32>
    %646 = arith.subf %644, %645 : vector<2x1xf32>
    %cst_214 = arith.constant 0.000000e+00 : f32
    %647 = vector.broadcast %cst_214 : f32 to vector<2x1xf32>
    %648 = arith.maximumf %646, %647 : vector<2x1xf32>
    %649 = vector.broadcast %642 : vector<2x1xf32> to vector<2x32xf32>
    %650 = arith.subf %603, %649 : vector<2x32xf32>
    %cst_215 = arith.constant 9.99999974E-6 : f32
    %651 = vector.broadcast %cst_215 : f32 to vector<2x1xf32>
    %652 = arith.addf %648, %651 : vector<2x1xf32>
    %653 = math.rsqrt %652 : vector<2x1xf32>
    %654 = vector.broadcast %653 : vector<2x1xf32> to vector<2x32xf32>
    %655 = arith.mulf %650, %654 : vector<2x32xf32>
    %656 = arith.mulf %655, %30 : vector<2x32xf32>
    %657 = arith.addf %656, %33 : vector<2x32xf32>
    %658 = math.tanh %657 : vector<2x32xf32>
    %659 = arith.mulf %635, %658 : vector<2x32xf32>
    %660 = arith.index_cast %c3_i32 : i32 to index
    %c0_216 = arith.constant 0 : index
    %c0_217 = arith.constant 0 : index
    %661 = vector.load %arg21[%660, %c0_216, %c0_217] : memref<4x2x32xf32, #tpu.memory_space<vmem>>, vector<1x2x32xf32>
    %662 = vector.shape_cast %661 : vector<1x2x32xf32> to vector<2x32xf32>
    %663 = vector.shape_cast %659 : vector<2x32xf32> to vector<1x2x32xf32>
    tpu.vector_store %arg21[%660, %c0_216, %c0_217], %663 {strides = array<i32>} : memref<4x2x32xf32, #tpu.memory_space<vmem>>, vector<1x2x32xf32>,
    %c4_i32 = arith.constant 4 : i32
    %c0_218 = arith.constant 0 : index
    %c0_219 = arith.constant 0 : index
    %664 = vector.load %arg23[%c0_218, %c0_219] : memref<2x32xf32, #tpu.memory_space<vmem>>, vector<2x32xf32>
    tpu.vector_store %arg23[%c0_218, %c0_219], %659 {strides = array<i32>} : memref<2x32xf32, #tpu.memory_space<vmem>>, vector<2x32xf32>,
    %c0_220 = arith.constant 0 : index
    %c0_221 = arith.constant 0 : index
    %665 = vector.load %arg24[%c0_220, %c0_221] : memref<2x32xf32, #tpu.memory_space<vmem>>, vector<2x32xf32>
    tpu.vector_store %arg24[%c0_220, %c0_221], %603 {strides = array<i32>} : memref<2x32xf32, #tpu.memory_space<vmem>>, vector<2x32xf32>,
    %c1_i32_222 = arith.constant 1 : i32
    %666 = arith.cmpi eq, %arg1, %c1_i32_222 : i32
    %667 = arith.extui %666 : i1 to i32
    %c0_i32_223 = arith.constant 0 : i32
    %668 = arith.cmpi ne, %667, %c0_i32_223 : i32
    scf.if %668 {
      %c0_224 = arith.constant 0 : index
      %c0_225 = arith.constant 0 : index
      %669 = vector.load %arg22[%c0_224, %c0_225] : memref<2x32xf32, #tpu.memory_space<vmem>>, vector<2x32xf32>
      tpu.vector_store %arg22[%c0_224, %c0_225], %603 {strides = array<i32>} : memref<2x32xf32, #tpu.memory_space<vmem>>, vector<2x32xf32>,
    } else {
    }
    return
  }
  func.func @transform_0(%arg0: i32, %arg1: i32) -> (i32, i32) {
    %c0_i32 = arith.constant 0 : i32
    %c0_i32_0 = arith.constant 0 : i32
    return %arg0, %c0_i32 : i32, i32
  }
  func.func @transform_1(%arg0: i32, %arg1: i32) -> (i32, i32) {
    %c0_i32 = arith.constant 0 : i32
    %c0_i32_0 = arith.constant 0 : i32
    return %arg0, %c0_i32 : i32, i32
  }
  func.func @transform_2(%arg0: i32, %arg1: i32) -> (i32, i32, i32) {
    %c0_i32 = arith.constant 0 : i32
    %c0_i32_0 = arith.constant 0 : i32
    return %arg1, %arg0, %c0_i32 : i32, i32, i32
  }
  func.func @transform_3(%arg0: i32, %arg1: i32) -> (i32, i32, i32) {
    %c0_i32 = arith.constant 0 : i32
    %c0_i32_0 = arith.constant 0 : i32
    return %arg1, %arg0, %c0_i32 : i32, i32, i32
  }
  func.func @transform_4(%arg0: i32, %arg1: i32) -> (i32, i32, i32) {
    %c0_i32 = arith.constant 0 : i32
    %c0_i32_0 = arith.constant 0 : i32
    return %arg1, %arg0, %c0_i32 : i32, i32, i32
  }
  func.func @transform_5(%arg0: i32, %arg1: i32) -> (i32, i32, i32) {
    %c0_i32 = arith.constant 0 : i32
    %c0_i32_0 = arith.constant 0 : i32
    return %arg1, %arg0, %c0_i32 : i32, i32, i32
  }
  func.func @transform_6(%arg0: i32, %arg1: i32) -> (i32, i32) {
    %c0_i32 = arith.constant 0 : i32
    %c0_i32_0 = arith.constant 0 : i32
    %c0_i32_1 = arith.constant 0 : i32
    return %c0_i32, %c0_i32_0 : i32, i32
  }
  func.func @transform_7(%arg0: i32, %arg1: i32) -> (i32, i32) {
    %c0_i32 = arith.constant 0 : i32
    %c0_i32_0 = arith.constant 0 : i32
    %c0_i32_1 = arith.constant 0 : i32
    return %c0_i32, %c0_i32_0 : i32, i32
  }
  func.func @transform_8(%arg0: i32, %arg1: i32) -> (i32, i32) {
    %c0_i32 = arith.constant 0 : i32
    %c0_i32_0 = arith.constant 0 : i32
    %c0_i32_1 = arith.constant 0 : i32
    return %c0_i32, %c0_i32_0 : i32, i32
  }
  func.func @transform_9(%arg0: i32, %arg1: i32) -> (i32, i32) {
    %c0_i32 = arith.constant 0 : i32
    %c0_i32_0 = arith.constant 0 : i32
    %c0_i32_1 = arith.constant 0 : i32
    return %c0_i32, %c0_i32_0 : i32, i32
  }
  func.func @transform_10(%arg0: i32, %arg1: i32) -> (i32, i32) {
    %c0_i32 = arith.constant 0 : i32
    %c0_i32_0 = arith.constant 0 : i32
    %c0_i32_1 = arith.constant 0 : i32
    return %c0_i32, %c0_i32_0 : i32, i32
  }
  func.func @transform_11(%arg0: i32, %arg1: i32) -> (i32, i32) {
    %c0_i32 = arith.constant 0 : i32
    %c0_i32_0 = arith.constant 0 : i32
    %c0_i32_1 = arith.constant 0 : i32
    return %c0_i32, %c0_i32_0 : i32, i32
  }
  func.func @transform_12(%arg0: i32, %arg1: i32) -> (i32, i32) {
    %c0_i32 = arith.constant 0 : i32
    %c0_i32_0 = arith.constant 0 : i32
    %c0_i32_1 = arith.constant 0 : i32
    return %c0_i32, %c0_i32_0 : i32, i32
  }
  func.func @transform_13(%arg0: i32, %arg1: i32) -> (i32, i32) {
    %c0_i32 = arith.constant 0 : i32
    %c0_i32_0 = arith.constant 0 : i32
    %c0_i32_1 = arith.constant 0 : i32
    return %c0_i32, %c0_i32_0 : i32, i32
  }
  func.func @transform_14(%arg0: i32, %arg1: i32) -> (i32, i32) {
    %c0_i32 = arith.constant 0 : i32
    %c0_i32_0 = arith.constant 0 : i32
    %c0_i32_1 = arith.constant 0 : i32
    return %c0_i32, %c0_i32_0 : i32, i32
  }
  func.func @transform_15(%arg0: i32, %arg1: i32) -> (i32, i32) {
    %c0_i32 = arith.constant 0 : i32
    %c0_i32_0 = arith.constant 0 : i32
    %c0_i32_1 = arith.constant 0 : i32
    return %c0_i32, %c0_i32_0 : i32, i32
  }
  func.func @transform_16(%arg0: i32, %arg1: i32) -> (i32, i32) {
    %c0_i32 = arith.constant 0 : i32
    %c0_i32_0 = arith.constant 0 : i32
    %c0_i32_1 = arith.constant 0 : i32
    return %c0_i32, %c0_i32_0 : i32, i32
  }
  func.func @transform_17(%arg0: i32, %arg1: i32) -> (i32, i32) {
    %c0_i32 = arith.constant 0 : i32
    %c0_i32_0 = arith.constant 0 : i32
    %c0_i32_1 = arith.constant 0 : i32
    return %c0_i32, %c0_i32_0 : i32, i32
  }
  func.func @transform_18(%arg0: i32, %arg1: i32) -> (i32, i32) {
    %c0_i32 = arith.constant 0 : i32
    %c0_i32_0 = arith.constant 0 : i32
    %c0_i32_1 = arith.constant 0 : i32
    return %c0_i32, %c0_i32_0 : i32, i32
  }
  func.func @transform_19(%arg0: i32, %arg1: i32) -> (i32, i32, i32) {
    %c0_i32 = arith.constant 0 : i32
    %c0_i32_0 = arith.constant 0 : i32
    return %arg1, %arg0, %c0_i32 : i32, i32, i32
  }
  func.func @transform_20(%arg0: i32, %arg1: i32) -> (i32, i32) {
    %c0_i32 = arith.constant 0 : i32
    %c0_i32_0 = arith.constant 0 : i32
    return %arg0, %c0_i32 : i32, i32
  }
}

</mosaic_0001>

<bundles_post_ra>
// kernel: tpu_custom_call.1
= control target key start
LH: loop header
LB: loop body
LE: loop exit
PB: predicated region body
PF: predicated region fallthrough
CT: control target
= control target key end

     0   :  { %s4788_s0 = inlined_call_operand.hbm [shape: f32[2,32], index: 0, kind: input, shape index: {}]   ;;  %s4789_s1 = inlined_call_operand.hbm [shape: f32[2,32], index: 1, kind: input, shape index: {}]   ;;  %s4790_s2 = inlined_call_operand.hbm [shape: f32[8,2,32], index: 2, kind: input, shape index: {}]   ;;  %s4791_s3 = inlined_call_operand.hbm [shape: f32[8,2,32], index: 3, kind: input, shape index: {}]   ;;  %s4792_s4 = inlined_call_operand.hbm [shape: f32[8,2,32], index: 4, kind: input, shape index: {}]   ;;  %s4793_s5 = inlined_call_operand.hbm [shape: f32[8,2,32], index: 5, kind: input, shape index: {}]   ;;  %s4794_s6 = inlined_call_operand.hbm [shape: f32[32,32], index: 6, kind: input, shape index: {}]   ;;  %s4795_s7 = inlined_call_operand.hbm [shape: f32[32,32], index: 7, kind: input, shape index: {}]   ;;  %s4796_s8 = inlined_call_operand.hbm [shape: f32[32,32], index: 8, kind: input, shape index: {}]   ;;  %s4797_s9 = inlined_call_operand.hbm [shape: f32[32,32], index: 9, kind: input, shape index: {}]   ;;  %s4798_s10 = inlined_call_operand.vmem [shape: f32[1,32], index: 10, kind: input, shape index: {}]   ;;  %s4799_s11 = inlined_call_operand.vmem [shape: f32[1,32], index: 11, kind: input, shape index: {}]   ;;  %s4800_s12 = inlined_call_operand.vmem [shape: f32[1,32], index: 12, kind: input, shape index: {}]   ;;  %s4801_s13 = inlined_call_operand.vmem [shape: f32[1,32], index: 13, kind: input, shape index: {}]   ;;  %s4802_s14 = inlined_call_operand.vmem [shape: f32[1,32], index: 14, kind: input, shape index: {}]   ;;  %s4803_s15 = inlined_call_operand.vmem [shape: f32[1,32], index: 15, kind: input, shape index: {}]   ;;  %s4804_s16 = inlined_call_operand.vmem [shape: f32[1,32], index: 16, kind: input, shape index: {}]   ;;  %s4805_s17 = inlined_call_operand.vmem [shape: f32[1,32], index: 17, kind: input, shape index: {}]   ;;  %s4806_s18 = inlined_call_operand.vmem [shape: f32[1,32], index: 18, kind: input, shape index: {}]   ;;  %s4807_s19 = inlined_call_operand.hbm [shape: f32[8,2,32], index: 19, kind: output, shape index: {0}]   ;;  %s4808_s20 = inlined_call_operand.hbm [shape: f32[2,32], index: 20, kind: output, shape index: {1}]  }
   0x1   :  { %4835 = sst [smem:[#allocation39_spill]] %s4788_s0 }
   0x2   :  { %4836 = sst [smem:[#allocation40_spill]] %s4789_s1 }
   0x3   :  { %4837 = sst [smem:[#allocation41_spill]] %s4790_s2 }
   0x4   :  { %4838 = sst [smem:[#allocation42_spill]] %s4791_s3 }
   0x5   :  { %4839 = sst [smem:[#allocation43_spill]] %s4792_s4 }
   0x6   :  { %4840 = sst [smem:[#allocation44_spill]] %s4798_s10 }
   0x7   :  { %4841 = sst [smem:[#allocation45_spill]] %s4799_s11 }
   0x8   :  { %4842 = sst [smem:[#allocation46_spill]] %s4800_s12 }
   0x9   :  { %4843 = sst [smem:[#allocation47_spill]] %s4801_s13 }
   0xa   :  { %4844 = sst [smem:[#allocation48_spill]] %s4802_s14 }
   0xb   :  { %4845 = sst [smem:[#allocation49_spill]] %s4803_s15 }
   0xc   :  { %4846 = sst [smem:[#allocation50_spill]] %s4804_s16 }
   0xd   :  { %4847 = sst [smem:[#allocation51_spill]] %s4805_s17 }
   0xe   :  { %4848 = sst [smem:[#allocation52_spill]] %s4806_s18 }
   0xf   :  { %4849 = sst [smem:[#allocation53_spill]] %s4807_s19 }
  0x10   :  { %4850 = sst [smem:[#allocation54_spill]] %s4808_s20 }
  0x11   :  { %26 = vsyncpa [#allocation5], 0 }
  0x12   :  { %27 = vsyncpa [#allocation8], 0 }
  0x13   :  { %28 = vsyncpa [#allocation15], 0 }
  0x14   :  { %29 = vsyncpa [#allocation18], 0 }
  0x15   :  { %30 = vsyncpa [#allocation6], 0 }
  0x16   :  { %32 = vsyncpa [#allocation6 + $0x1], 0 }
  0x17   :  { %33 = vsyncpa [#allocation21], 0  ;;  %s4041_s1 = smov 0   ;;  %s4043_s22 = smov 0  }
  0x18   :  { %s4045_s23 = smov 0   ;;  %s4047_s24 = smov 0  }
  0x19   :  { %s4049_s2 = smov 0   ;;  %s4051_s25 = smov 0  }
  0x1a LB: > { %4851 = sst [smem:[#allocation30_spill]] %s3894_s1  ;;  %s4072_s3 = sadd.s32 4294967295, %s3914_s25   ;;  %s3914_s25 = sphi %s4051_s25, %s39_s25   ;;  %s3910_s2 = sphi %s4049_s2, %s4920_s2   ;;  %s3906_s24 = sphi %s4047_s24, %s4919_s24   ;;  %s3902_s23 = sphi %s4045_s23, %s4918_s23   ;;  %s3898_s22 = sphi %s4043_s22, %s4922_s22   ;;  %s3894_s1 = sphi %s4041_s1, %s4921_s1  }
  0x1b   : > { %4852 = sst [smem:[#allocation31_spill]] %s3902_s23  ;;  %p2890_p0 = scmp.ge.s32.totalorder %s3914_s25, 1 }
  0x1c   : > { %4853 = sst [smem:[#allocation32_spill]] %s3906_s24  ;;  %p4824_p1 = scmp.eq.s32.totalorder %s4072_s3, 0 }
  0x1d   : > { %4854 = sst [smem:[#allocation33_spill]] %s3910_s2  ;;  %p547_p2 = scmp.lt.s32.totalorder %s3914_s25, 3 }
  0x1e   : > { %4855 = sst [smem:[#allocation34_spill]] %s3914_s25  ;;  %s3916_s27 = smov [#allocation4]  }
  0x1f   : > { %p4077_p3 = pnand %p2890_p0, %p547_p2  ;;  %s562_s28 = sshll.u32 %s3916_s27, 4  ;;  %s563_s28 = int_to_ptr.vmem [resolvable:$true] %s562_s28 }
  0x20   : > { %s3529_s30 = scalar_lea.vmem %s563_s28, 32  ;;  %p3537_p11 = scmp.lt.s32.totalorder %s563_s28, %s563_s28 }
  0x21   : > { %s4856_s26 = scalar_select %p4077_p3, 1, 0 }
  0x22   : > { %p3282_p5 = pneg %p4077_p3  ;;  %p3530_p8 = scmp.ne.s32.totalorder %s563_s28, %s3529_s30 }
  0x23   : > { %p3538_p12 = scmp.lt.s32.totalorder %s3529_s30, %s3529_s30 }
  0x24   : > { %p4086_p6 = pnand %p3282_p5, %p4824_p1 }
  0x25   : > { %p3539_p13 = por %p3538_p12, %p3537_p11 }
  0x26   : > { %p4092_p7 = pneg %p4086_p6 }
  0x28   : > { %p3532_p9 = pnand %p3530_p8, %p4092_p7 }
  0x2a   : > { %p3533_p10 = pneg %p3532_p9 }
  0x2c   : > { %p3540_p0 = pnand %p3539_p13, %p3533_p10 }
  0x2e   : > { %3543 = shalt.err (!%p3540_p0)
}
  0x2f   : > { %s4859_s27 = sld [smem:[#allocation39_spill]]  ;;  %s2889_s30 = sadd.s32 4294967294, %s3914_s25  }
  0x30   : > { %s48_s20 = sadd.s32 1, %s3910_s2  ;;  %s112_s19 = sadd.s32 1, %s3902_s23 }
  0x31   : > { %p49_p2 = scmp.ge.s32.totalorder %s48_s20, 2  ;;  %p119_p5 = scmp.ne.s32.totalorder %s3902_s23, %s3898_s22 }
  0x32   : > { %p120_p8 = scmp.eq.s32.totalorder %s3914_s25, 0  ;;  %p125_p9 = scmp.ne.s32.totalorder %s3898_s22, %s3894_s1 }
  0x33   : > { %s4924_s20 = smov (%p49_p2, %s48_s20), 0  ;;  %p4823_p12 = scmp.eq.s32.totalorder %s4072_s3, 1 }
  0x34   : > { %4860 = sst [smem:[#allocation35_spill]] %s4924_s20  ;;  %p4113_p10 = por %p120_p8, %p119_p5 }
  0x35   : > { %3285 = dma.hbm_to_vmem [thread:$0]  (!%p4086_p6), %s4859_s27, 32, %s563_s28, [#allocation5]  }
  0x36   : > { %p4119_p11 = por %p4824_p1, %p125_p9  ;;  %s107_s21 = ssub.s32 %s3910_s2, %s4924_s20 }
  0x37   : > { %p110_p13 = scmp.eq.s32.totalorder %s107_s21, 0  ;;  %p514_p0 = scmp.eq.s32.totalorder %s2889_s30, 1 }
  0x38   : > { %s4862_s28 = scalar_select %p4119_p11, 1, 0 }
  0x39   : > { %p4128_p4 = por %p4823_p12, %p119_p5  ;;  %p3324_p2 = scmp.lt.s32.totalorder %s3914_s25, 2 }
  0x3a   : > { %s4134_s1 = scalar_select %p110_p13, %s3902_s23, %s112_s19  }
  0x3b   : > { %s4863_s27 = scalar_select %p4128_p4, 1, 0 }
  0x3c   : > { %4865 = sst [smem:[#allocation37_spill]] %s4134_s1  ;;  %p4136_p8 = por %p514_p0, %p125_p9 }
  0x3d   : > { %4864 = sst [smem:[#allocation36_spill]] %s4863_s27  ;;  %s665_s17 = sand.u32 1, %s3914_s25  }
  0x3e   : > { %s4866_s18 = scalar_select %p4136_p8, 1, 0 }
  0x3f   : > { %s667_s16 = sand.u32 1, %s3902_s23   ;;  %s4145_s20 = sshll.u32 %s3910_s2, 7 }
  0x40   : > { %4867 = sst [smem:[#allocation38_spill]] %s4866_s18  ;;  %s4142_s12 = sshll.u32 %s667_s16, 3 }
  0x41   : > { %s4868_s15 = sld [smem:[#allocation41_spill]]  ;;  %s669_s27 = scalar_lea.vmem [#allocation9], %s4142_s12 }
  0x42   : > { %s677_s13 = sshll.u32 %s669_s27, 4  ;;  %p4154_p5 = pnand %p3324_p2, %p4113_p10  ;;  %s678_s13 = int_to_ptr.vmem [resolvable:$true] %s677_s13 }
  0x43   : > { %s4158_s16 = scalar_lea.sflag [#allocation5], %s665_s17  ;;  %s3557_s2 = scalar_lea.vmem %s678_s13, 128 }
  0x44   : > { %p4831_p9 = pneg %p4154_p5  ;;  %p3558_p13 = scmp.ne.s32.totalorder %s678_s13, %s3557_s2 }
  0x46   : > { %p3560_p0 = pnand %p3558_p13, %p4831_p9 }
  0x47   : > { %s676_s14 = scalar_lea.hbm %s4868_s15, %s4145_s20  ;;  %s3917_s15 = smov [#allocation9]  }
  0x48   : > { %p3561_p12 = pneg %p3560_p0  ;;  %s3562_s27 = sshll.u32 %s3917_s15, 4  ;;  %s3563_s27 = int_to_ptr.vmem [resolvable:$false] %s3562_s27 }
  0x49   : > { %s3564_s0 = scalar_lea.vmem %s3563_s27, 256  ;;  %p3565_p10 = scmp.lt.s32.totalorder %s678_s13, %s3563_s27 }
  0x4a   : > { %p3566_p2 = scmp.lt.s32.totalorder %s3564_s0, %s3557_s2 }
  0x4c   : > { %p3567_p1 = por %p3566_p2, %p3565_p10 }
  0x4e   : > { %p3568_p8 = pnand %p3567_p1, %p3561_p12 }
  0x50   : > { %3571 = shalt.err (!%p3568_p8)
}
  0x51   : > { %s3918_s30 = smov 32   ;;  %s3919_s17 = smov 2  }
  0x52   : > { %3304 = dma.hbm_to_vmem [thread:$0]  (!%p4154_p5), %s676_s14, 128, %s678_s13, %s4158_s16, %s3918_s30, %s3918_s30, %s3919_s17  }
  0x53   : > { %s4870_s1 = sld [smem:[#allocation42_spill]]  ;;  %s691_s2 = scalar_lea.vmem [#allocation10], %s4142_s12 }
  0x54   : > { %s699_s0 = sshll.u32 %s691_s2, 4  ;;  %s3920_s23 = smov [#allocation7]   ;;  %s700_s0 = int_to_ptr.vmem [resolvable:$true] %s699_s0 }
  0x55   : > { %s575_s25 = sshll.u32 %s3920_s23, 4  ;;  %s3585_s18 = scalar_lea.vmem %s700_s0, 128  ;;  %s576_s25 = int_to_ptr.vmem [resolvable:$true] %s575_s25 }
  0x56   : > { %p3586_p1 = scmp.ne.s32.totalorder %s700_s0, %s3585_s18  ;;  %s3921_s11 = smov [#allocation10]  }
  0x57   : > { %s3590_s10 = sshll.u32 %s3921_s11, 4  ;;  %s3591_s10 = int_to_ptr.vmem [resolvable:$false] %s3590_s10 }
  0x58   : > { %p3588_p12 = pnand %p3586_p1, %p4831_p9  ;;  %s3592_s24 = scalar_lea.vmem %s3591_s10, 256 }
  0x59   : > { %s698_s27 = scalar_lea.hbm %s4870_s1, %s4145_s20  ;;  %p3593_p13 = scmp.lt.s32.totalorder %s700_s0, %s3591_s10 }
  0x5a   : > { %p3589_p8 = pneg %p3588_p12  ;;  %p3594_p0 = scmp.lt.s32.totalorder %s3592_s24, %s3585_s18 }
  0x5c   : > { %p3595_p10 = por %p3594_p0, %p3593_p13 }
  0x5e   : > { %p3596_p2 = pnand %p3595_p10, %p3589_p8 }
  0x60   : > { %3599 = shalt.err (!%p3596_p2)
}
  0x61   : > { %3307 = dma.hbm_to_vmem [thread:$0]  (!%p4154_p5), %s698_s27, 128, %s700_s0, %s4158_s16, %s3918_s30, %s3918_s30, %s3919_s17  }
  0x62   : > { %s3611_s13 = scalar_lea.vmem %s576_s25, 32  ;;  %p3619_p4 = scmp.lt.s32.totalorder %s576_s25, %s576_s25 }
  0x63   : > { %p3612_p1 = scmp.ne.s32.totalorder %s576_s25, %s3611_s13  ;;  %p3620_p11 = scmp.lt.s32.totalorder %s3611_s13, %s3611_s13 }
  0x65   : > { %p3614_p12 = pnand %p3612_p1, %p4092_p7  ;;  %p3621_p3 = por %p3620_p11, %p3619_p4 }
  0x67   : > { %p3615_p9 = pneg %p3614_p12 }
  0x69   : > { %p3622_p13 = pnand %p3621_p3, %p3615_p9 }
  0x6b   : > { %3625 = shalt.err (!%p3622_p13)
}
  0x6c   : > { %s4871_s14 = sld [smem:[#allocation40_spill]]  ;;  %s3922_s18 = smov [#allocation14]  }
  0x6d   : > { %s598_s1 = sshll.u32 %s3922_s18, 4  ;;  %s4872_s21 = sld [smem:[#allocation43_spill]]  ;;  %s599_s1 = int_to_ptr.vmem [resolvable:$true] %s598_s1 }
  0x6e   : > { %s3637_s27 = scalar_lea.vmem %s599_s1, 512  ;;  %p3645_p11 = scmp.lt.s32.totalorder %s599_s1, %s599_s1 }
  0x6f   : > { %p3638_p8 = scmp.ne.s32.totalorder %s599_s1, %s3637_s27  ;;  %p3646_p9 = scmp.lt.s32.totalorder %s3637_s27, %s3637_s27 }
  0x71   : > { %p3640_p3 = pnand %p3638_p8, %p4092_p7  ;;  %p3647_p0 = por %p3646_p9, %p3645_p11 }
  0x72   : > { %3288 = dma.hbm_to_vmem [thread:$0]  (!%p4086_p6), %s4871_s14, 32, %s576_s25, [#allocation8]  }
  0x73   : > { %p3641_p4 = pneg %p3640_p3 }
  0x75   : > { %p3648_p10 = pnand %p3647_p0, %p3641_p4 }
  0x77   : > { %3651 = shalt.err (!%p3648_p10)
}
  0x78   : > { %s3923_s2 = smov 128   ;;  %s3924_s25 = smov 8  }
  0x79   : > { %3294 = dma.hbm_to_vmem [thread:$0]  (!%p4086_p6), %s4795_s7, 512, %s599_s1, [#allocation15], %s3923_s2, %s3923_s2, %s3924_s25  }
  0x7a   : > { %s713_s10 = scalar_lea.vmem [#allocation11], %s4142_s12  ;;  %s3925_s14 = smov [#allocation13]  }
  0x7b   : > { %s721_s11 = sshll.u32 %s713_s10, 4  ;;  %s585_s18 = sshll.u32 %s3925_s14, 4  ;;  %s722_s11 = int_to_ptr.vmem [resolvable:$true] %s721_s11  ;;  %s586_s18 = int_to_ptr.vmem [resolvable:$true] %s585_s18 }
  0x7c   : > { %s3665_s23 = scalar_lea.vmem %s722_s11, 128  ;;  %p4873_p1 = pneg %p4154_p5 }
  0x7d   : > { %p3666_p2 = scmp.ne.s32.totalorder %s722_s11, %s3665_s23  ;;  %s3926_s24 = smov [#allocation11]  }
  0x7e   : > { %s3670_s27 = sshll.u32 %s3926_s24, 4  ;;  %s3671_s27 = int_to_ptr.vmem [resolvable:$false] %s3670_s27 }
  0x7f   : > { %p3668_p12 = pnand %p3666_p2, %p4873_p1  ;;  %s3672_s15 = scalar_lea.vmem %s3671_s27, 256 }
  0x80   : > { %p3673_p8 = scmp.lt.s32.totalorder %s722_s11, %s3671_s27  ;;  %p3674_p3 = scmp.lt.s32.totalorder %s3672_s15, %s3665_s23 }
  0x81   : > { %p3669_p13 = pneg %p3668_p12 }
  0x82   : > { %p3675_p4 = por %p3674_p3, %p3673_p8 }
  0x84   : > { %p3676_p11 = pnand %p3675_p4, %p3669_p13 }
  0x86   : > { %3679 = shalt.err (!%p3676_p11)
}
  0x87   : > { %s4874_s13 = scalar_lea.hbm %s4872_s21, %s4145_s20  ;;  %s3691_s10 = scalar_lea.vmem %s586_s18, 512 }
  0x88   : > { %3310 = dma.hbm_to_vmem [thread:$0]  (!%p4154_p5), %s4874_s13, 128, %s722_s11, %s4158_s16, %s3918_s30, %s3918_s30, %s3919_s17  }
  0x89   : > { %p3692_p9 = scmp.ne.s32.totalorder %s586_s18, %s3691_s10  ;;  %p3699_p2 = scmp.lt.s32.totalorder %s586_s18, %s586_s18 }
  0x8a   : > { %p3700_p1 = scmp.lt.s32.totalorder %s3691_s10, %s3691_s10 }
  0x8b   : > { %p3694_p0 = pnand %p3692_p9, %p4092_p7 }
  0x8c   : > { %p3701_p12 = por %p3700_p1, %p3699_p2 }
  0x8d   : > { %p3695_p10 = pneg %p3694_p0 }
  0x8f   : > { %p3702_p13 = pnand %p3701_p12, %p3695_p10 }
  0x91   : > { %3705 = shalt.err (!%p3702_p13)
}
  0x92   : > { %3291 = dma.hbm_to_vmem [thread:$0]  (!%p4086_p6), %s4794_s6, 512, %s586_s18, [#allocation8], %s3923_s2, %s3923_s2, %s3924_s25  }
  0x93   : > { %s3927_s11 = smov [#allocation16]   ;;  %s3928_s24 = smov [#allocation17]  }
  0x94   : > { %s611_s23 = sshll.u32 %s3927_s11, 4  ;;  %s624_s27 = sshll.u32 %s3928_s24, 4  ;;  %s612_s23 = int_to_ptr.vmem [resolvable:$true] %s611_s23  ;;  %s625_s27 = int_to_ptr.vmem [resolvable:$true] %s624_s27 }
  0x95   : > { %s3717_s1 = scalar_lea.vmem %s612_s23, 512  ;;  %p3725_p11 = scmp.lt.s32.totalorder %s612_s23, %s612_s23 }
  0x96   : > { %p3718_p8 = scmp.ne.s32.totalorder %s612_s23, %s3717_s1  ;;  %p3726_p9 = scmp.lt.s32.totalorder %s3717_s1, %s3717_s1 }
  0x98   : > { %p3720_p3 = pnand %p3718_p8, %p4092_p7  ;;  %p3727_p0 = por %p3726_p9, %p3725_p11 }
  0x9a   : > { %p3721_p4 = pneg %p3720_p3 }
  0x9c   : > { %p3728_p10 = pnand %p3727_p0, %p3721_p4 }
  0x9e   : > { %3731 = shalt.err (!%p3728_p10)
}
  0x9f   : > { %3297 = dma.hbm_to_vmem [thread:$0]  (!%p4086_p6), %s4796_s8, 512, %s612_s23, [#allocation15], %s3923_s2, %s3923_s2, %s3924_s25  }
  0xa0   : > { %s3743_s13 = scalar_lea.vmem %s625_s27, 512  ;;  %p3751_p13 = scmp.lt.s32.totalorder %s625_s27, %s625_s27 }
  0xa1   : > { %p3744_p2 = scmp.ne.s32.totalorder %s625_s27, %s3743_s13  ;;  %p3752_p8 = scmp.lt.s32.totalorder %s3743_s13, %s3743_s13 }
  0xa3   : > { %p3746_p1 = pnand %p3744_p2, %p4092_p7  ;;  %p3753_p3 = por %p3752_p8, %p3751_p13 }
  0xa5   : > { %p3747_p12 = pneg %p3746_p1 }
  0xa7   : > { %p3754_p4 = pnand %p3753_p3, %p3747_p12 }
  0xa9   : > { %3757 = shalt.err (!%p3754_p4)
}
  0xaa   : > { %3300 = dma.hbm_to_vmem [thread:$0]  (!%p4086_p6), %s4797_s9, 512, %s625_s27, [#allocation18], %s3923_s2, %s3923_s2, %s3924_s25  }
  0xab   : > { %s742_s11 = scalar_lea.hbm %s4793_s5, %s4145_s20  ;;  %s735_s23 = scalar_lea.vmem [#allocation12], %s4142_s12 }
  0xac   : > { %s743_s24 = sshll.u32 %s735_s23, 4  ;;  %p4875_p11 = pneg %p4154_p5  ;;  %s744_s24 = int_to_ptr.vmem [resolvable:$true] %s743_s24 }
  0xad   : > { %s3771_s1 = scalar_lea.vmem %s744_s24, 128  ;;  %s3929_s4 = smov [#allocation12]  }
  0xae   : > { %p3772_p7 = scmp.ne.s32.totalorder %s744_s24, %s3771_s1  ;;  %s3776_s18 = sshll.u32 %s3929_s4, 4  ;;  %s3777_s18 = int_to_ptr.vmem [resolvable:$false] %s3776_s18 }
  0xaf   : > { %s3778_s0 = scalar_lea.vmem %s3777_s18, 256  ;;  %p3779_p10 = scmp.lt.s32.totalorder %s744_s24, %s3777_s18 }
  0xb0   : > { %p3774_p9 = pnand %p3772_p7, %p4875_p11  ;;  %p3780_p2 = scmp.lt.s32.totalorder %s3778_s0, %s3771_s1 }
  0xb2   : > { %p3775_p0 = pneg %p3774_p9  ;;  %p3781_p6 = por %p3780_p2, %p3779_p10 }
  0xb4   : > { %p3782_p1 = pnand %p3781_p6, %p3775_p0 }
  0xb6   : > { %3785 = shalt.err (!%p3782_p1)
}
  0xb7   : > { %3313 = dma.hbm_to_vmem [thread:$0]  (!%p4154_p5), %s742_s11, 128, %s744_s24, %s4158_s16, %s3918_s30, %s3918_s30, %s3919_s17  }
  0xb8   : > { %p4876_p12 = scmp.ne.s32.totalorder %s4856_s26, 0 }
  0xb9   : > { %p4877_p13 = scmp.eq.s32.totalorder (!%p4876_p12), %s4072_s3, 0 }
  0xba   : > { %755 = sbr.rel (%p4876_p12) target bundleno = 2721 (0xaa1), region = 96 }
  0xbf   : > { %3861 = dma.done.wait (%p4877_p13), [#allocation5], 32   ;;  %p4878_p8 = pmov %p4877_p13 }
  0xc1   : > { %3863 = vsyncadd (%p4878_p8), [#allocation5], 4294967264  ;;  %p4879_p3 = pmov %p4878_p8 }
  0xc3   : > { %3865 = dma.done.wait (%p4879_p3), [#allocation8], 32   ;;  %p4880_p4 = pmov %p4879_p3 }
  0xc4   : > { %s765_s12 = sand.u32 1, %s4072_s3   ;;  %s767_s20 = sand.u32 1, %s3898_s22  }
  0xc5   : > { %3867 = vsyncadd (%p4880_p4), [#allocation8], 4294967264  ;;  %s2913_s26 = sshll.u32 %s767_s20, 3  ;;  %s766_s19 = scalar_lea.sflag [#allocation5], %s765_s12 }
  0xc6   : > { %s4279_s16 = scalar_lea.vmem [#allocation9], %s2913_s26  ;;  %p4881_p5 = scmp.ne.s32.totalorder %s4862_s28, 0 }
  0xc8   : > { %3869 = dma.done.wait (%p4881_p5), %s766_s19, 512  }
  0xc9   : > { %3871 = vsyncadd (%p4881_p5), %s766_s19, 4294966784  ;;  %s4285_s30 = scalar_lea.vmem [#allocation10], %s2913_s26  ;;  %s4287_s17 = scalar_lea.vmem [#allocation11], %s2913_s26 }
  0xca   : > { %s4289_s2 = scalar_lea.vmem [#allocation12], %s2913_s26  ;;  %p4882_p7 = pmov %p4879_p3 }
  0xcb   : > { %p4883_p11 = pmov %p4879_p3 }
  0xcc   : > { %3873 = dma.done.wait (%p4882_p7), [#allocation8], 512  }
  0xcd   : > { %3875 = vsyncadd (%p4883_p11), [#allocation8], 4294966784  ;;  %p4884_p9 = pmov %p4879_p3 }
  0xce   : > { %p4885_p0 = pmov %p4879_p3 }
  0xcf   : > { %3877 = dma.done.wait (%p4884_p9), [#allocation15], 1024  }
  0xd0   : > { %3879 = vsyncadd (%p4885_p0), [#allocation15], 4294966272  ;;  %p4886_p10 = pmov %p4885_p0 }
  0xd1   : > { %p4887_p2 = pmov %p4885_p0 }
  0xd2   : > { %3881 = dma.done.wait (%p4886_p10), [#allocation18], 512  }
  0xd3   : > { %3883 = vsyncadd (%p4887_p2), [#allocation18], 4294966784  ;;  %s4303_s28 = scalar_lea.vmem [#allocation19], %s2913_s26  ;;  %s4888_s25 = sld [smem:[#allocation32_spill]] }
  0xd9   : > { %p2922_p6 = scmp.ne.s32.totalorder %s4888_s25, 0 }
  0xdb   : > { %892 = sbr.rel (%p2922_p6) target bundleno = 226 (0xe2), region = 140 }
  0xe0   : > { %v893_v0 = vld [vmem:[#allocation4] sm:$0x3]  ;;  %vm894_vm0 = vcmask 254976   ;;  %v896_v1 = vld [vmem:[#allocation7] sm:$0x3] }
  0xe1   : > { %895 = vst.msk [vmem:[#allocation2] sm:$0x3] %vm894_vm0, %v893_v0  ;;  %897 = vst.msk [vmem:[#allocation3] sm:$0x3] %vm894_vm0, %v896_v1 }
  0xe2 PF: > { %v4306_v2 = vld [vmem:[#allocation13 + $0x18] sm:$0xff]  ;;  %v3930_v4 = vmov 0.0   ;;  %v4312_v5 = vld [vmem:[#allocation13 + $0x10] sm:$0xff]  ;;  %v4320_v7 = vld [vmem:[#allocation13 + $0x8] sm:$0xff]  ;;  %vm3931_vm1 = vmmov 0   ;;  %vm979_vm2 = vcmask 261120  }
  0xe3   : > { %v4308_v3 = vld [vmem:[#allocation14 + $0x18] sm:$0xff]  ;;  %3068 = vmatprep.subr.mxu0 %v3930_v4  ;;  %3079 = vmatprep.subr.mxu1 %v3930_v4  ;;  %v4314_v6 = vld [vmem:[#allocation14 + $0x10] sm:$0xff]  ;;  %v4324_v8 = vld [vmem:[#allocation14 + $0x8] sm:$0xff]  ;;  %s4889_s10 = sld [smem:[#allocation44_spill]]  ;;  %vm1267_vm3 = vcmask 254976  }
  0xe4   : > { %3069 = vmatpush3.msra.mxu0 %v4306_v2  ;;  %3080 = vmatpush3.msra.mxu1 %v4308_v3  ;;  %v4328_v9 = vld [vmem:[#allocation13] sm:$0xff]  ;;  %v4339_v12 = vld [vmem:[#allocation16 + $0x18] sm:$0xff]  ;;  %v4346_v13 = vld [vmem:[#allocation16 + $0x10] sm:$0xff]  ;;  %s4890_s14 = sld [smem:[#allocation45_spill]] }
  0xe5   : > { %3070 = vmatprep.subr.mxu0 %v3930_v4  ;;  %3081 = vmatprep.subr.mxu1 %v3930_v4  ;;  %v4333_v11 = vld [vmem:[#allocation14] sm:$0xff]  ;;  %v4351_v14 = vld [vmem:[#allocation16 + $0x8] sm:$0xff]  ;;  %v4377_v16 = vld [vmem:[#allocation17 + $0x18] sm:$0xff]  ;;  %s4891_s24 = sld [smem:[#allocation47_spill]] }
  0xe6   : > { %3071 = vmatpush3.msra.mxu0 %v4312_v5  ;;  %3082 = vmatpush3.msra.mxu1 %v4314_v6  ;;  %v4358_v15 = vld [vmem:[#allocation16] sm:$0xff]  ;;  %v4381_v17 = vld [vmem:[#allocation17 + $0x10] sm:$0xff]  ;;  %v4385_v18 = vld [vmem:[#allocation17 + $0x8] sm:$0xff]  ;;  %s4893_s0 = sld [smem:[#allocation48_spill]] }
  0xe7   : > { %3072 = vmatprep.subr.mxu0 %v3930_v4  ;;  %3083 = vmatprep.subr.mxu1 %v3930_v4  ;;  %v4389_v19 = vld [vmem:[#allocation17] sm:$0xff]  ;;  %v1291_v26 = vld [vmem:[%s4285_s30] sm:$0x3]  ;;  %s4894_s19 = sld [smem:[#allocation49_spill]] }
  0xe8   : > { %3073 = vmatpush3.msra.mxu0 %v4320_v7  ;;  %3076 = vmatprep.mubr.msk.f32.mxu0 %vm3931_vm1, %v3930_v4  ;;  %v977_v10 = vld [vmem:[#allocation2] sm:$0x3]  ;;  %v4409_v21 = vld [vmem:[#allocation3] sm:$0x3]  ;;  %v1263_v22 = vld [vmem:[%s4279_s16] sm:$0x3] }
  0xe9   : > { %3074 = vmatprep.subr.mxu0 %v3930_v4  ;;  %3084 = vmatpush3.msra.mxu1 %v4324_v8  ;;  %v4407_v20 = vld [vmem:[%s4889_s10] ss:$0 sm:$0xff]  ;;  %v1318_v39 = vld [vmem:[%s4287_s17] sm:$0x3]  ;;  %s4895_s13 = sld [smem:[#allocation46_spill]] }
  0xea   : > { %3075 = vmatpush3.msra.mxu0 %v4328_v9  ;;  %3085 = vmatprep.subr.mxu1 %v3930_v4  ;;  %v4415_v23 = vld [vmem:[%s4890_s14] ss:$0 sm:$0xff]  ;;  %v1265_v24 = vmul.f32 %v4407_v20, %v4409_v21  ;;  %s4896_s11 = sld [smem:[#allocation50_spill]] }
  0xeb   : > { %3077 = vmatmul.mubr.msk.f32.vlgmr.msra.gmra.mxu0 %vm979_vm2, %v977_v10  ;;  %3086 = vmatpush3.msra.mxu1 %v4333_v11  ;;  %v1293_v28 = vmul.f32 %v4415_v23, %v4409_v21  ;;  %s4892_s4 = smov %s4891_s24  ;;  %s4897_s1 = sld [smem:[#allocation51_spill]] }
  0xec   : > { %3087 = vmatprep.mubr.msk.f32.mxu1 %vm3931_vm1, %v3930_v4  ;;  %3090 = vmatprep.subr.mxu0 %v3930_v4  ;;  %s4899_s25 = sld [smem:[#allocation52_spill]] }
  0xed   : > { %3088 = vmatmul.mubr.msk.f32.vlgmr.msra.gmra.mxu1 %vm979_vm2, %v977_v10  ;;  %3091 = vmatpush3.msra.mxu0 %v4339_v12 }
  0xee   : > { %3092 = vmatprep.subr.mxu0 %v3930_v4  ;;  %3098 = vmatprep.mubr.msk.f32.mxu0 %vm3931_vm1, %v3930_v4 }
  0xef   : > { %3093 = vmatpush3.msra.mxu0 %v4346_v13  ;;  %3101 = vmatprep.subr.mxu1 %v3930_v4 }
  0xf0   : > { %3094 = vmatprep.subr.mxu0 %v3930_v4  ;;  %3109 = vmatprep.mubr.msk.f32.mxu1 %vm3931_vm1, %v3930_v4 }
  0xf1   : > { %3095 = vmatpush3.msra.mxu0 %v4351_v14  ;;  %3102 = vmatpush3.msra.mxu1 %v4377_v16  ;;  %s4898_s18 = smov %s4897_s1 }
  0xf2   : > { %3096 = vmatprep.subr.mxu0 %v3930_v4  ;;  %3103 = vmatprep.subr.mxu1 %v3930_v4  ;;  %s4900_s27 = smov %s4899_s25 }
  0xf3   : > { %3097 = vmatpush3.msra.mxu0 %v4358_v15  ;;  %3104 = vmatpush3.msra.mxu1 %v4381_v17 }
  0xf4   : > { %3099 = vmatmul.mubr.msk.f32.vlgmr.msra.gmra.mxu0 %vm979_vm2, %v977_v10  ;;  %3112 = vmatprep.subr.mxu0 %v3930_v4 }
  0xf5   : > { %3113 = vmatpush3.msra.mxu0 %v4306_v2  ;;  %3120 = vmatprep.mubr.msk.f32.mxu0 %vm3931_vm1, %v3930_v4 }
  0xf6   : > { %3114 = vmatprep.subr.mxu0 %v3930_v4  ;;  %3105 = vmatprep.subr.mxu1 %v3930_v4 }
  0xf7   : > { %3115 = vmatpush3.msra.mxu0 %v4312_v5  ;;  %3106 = vmatpush3.msra.mxu1 %v4385_v18 }
  0xf8   : > { %3116 = vmatprep.subr.mxu0 %v3930_v4  ;;  %3107 = vmatprep.subr.mxu1 %v3930_v4 }
  0xf9   : > { %3117 = vmatpush3.msra.mxu0 %v4320_v7  ;;  %3108 = vmatpush3.msra.mxu1 %v4389_v19 }
  0xfa   : > { %3118 = vmatprep.subr.mxu0 %v3930_v4  ;;  %3110 = vmatmul.mubr.msk.f32.vlgmr.msra.gmra.mxu1 %vm979_vm2, %v977_v10 }
  0xfb   : > { %3119 = vmatpush3.msra.mxu0 %v4328_v9  ;;  %3123 = vmatprep.subr.mxu1 %v3930_v4 }
  0xfc   : > { %3134 = vmatprep.subr.mxu0 %v3930_v4  ;;  %3124 = vmatpush3.msra.mxu1 %v4308_v3 }
  0xfd   : > { %3131 = vmatprep.mubr.msk.f32.mxu1 %vm3931_vm1, %v3930_v4  ;;  %3125 = vmatprep.subr.mxu1 %v3930_v4 }
  0xfe   : > { %3126 = vmatpush3.msra.mxu1 %v4314_v6 }
  0xff   : > { %3127 = vmatprep.subr.mxu1 %v3930_v4 }
 0x100   : > { %3128 = vmatpush3.msra.mxu1 %v4324_v8 }
 0x101   : > { %3129 = vmatprep.subr.mxu1 %v3930_v4 }
 0x102   : > { %3130 = vmatpush3.msra.mxu1 %v4333_v11 }
 0x103   : > { %3145 = vmatprep.subr.mxu1 %v3930_v4 }
 0x1ab   : > { %v1049_v25 = vpop.f32.mrf.mxu0 }
 0x1ac   : > { %v1264_v27 = vadd.f32 %v1263_v22, %v1049_v25 }
 0x1ad   : > { %v3078_v29 = vpop.f32.mrf.mxu0  ;;  %v1119_v30 = vpop.f32.mrf.mxu1 }
 0x1ae   : > { %v1266_v31 = vadd.f32 %v1265_v24, %v1264_v27  ;;  %v1292_v32 = vadd.f32 %v1291_v26, %v1119_v30 }
 0x1af   : > { %v3089_v33 = vpop.f32.mrf.mxu1 }
 0x1b0   : > { %v1294_v34 = vadd.f32 %v1293_v28, %v1292_v32  ;;  %v1268_v35 = vsel %vm1267_vm3, %v1266_v31, 0.0  ;;  %v1271_v36 = vmul.f32 %v1266_v31, %v1266_v31  ;;  %v4434_v33 = vld [vmem:[%s4891_s24] ss:$0 sm:$0xff] }
 0x1b1   : > { %1269 = vadd.xlane.f32.xlu0 %v1268_v35 }
 0x1b2   : > { %v1272_v37 = vsel %vm1267_vm3, %v1271_v36, 0.0  ;;  %v1295_v38 = vsel %vm1267_vm3, %v1294_v34, 0.0  ;;  %v1298_v40 = vmul.f32 %v1294_v34, %v1294_v34 }
 0x1b3   : > { %1273 = vadd.xlane.f32.xlu1 %v1272_v37 }
 0x1b4   : > { %v1189_v41 = vpop.f32.mrf.mxu0  ;;  %v1299_v42 = vsel %vm1267_vm3, %v1298_v40, 0.0 }
 0x1b5   : > { %1296 = vadd.xlane.f32.xlu0 %v1295_v38  ;;  %v1319_v43 = vadd.f32 %v1318_v39, %v1189_v41  ;;  %v4440_v39 = vld [vmem:[%s4893_s0] ss:$0 sm:$0xff] }
 0x1b6   : > { %v3100_v44 = vpop.f32.mrf.mxu0 }
 0x1b7   : > { %1300 = vadd.xlane.f32.xlu1 %v1299_v42  ;;  %v1320_v45 = vsel %vm1267_vm3, %v1319_v43, 0.0  ;;  %v1323_v46 = vmul.f32 %v1319_v43, %v1319_v43 }
 0x1b9   : > { %1321 = vadd.xlane.f32.xlu0 %v1320_v45  ;;  %v1324_v47 = vsel %vm1267_vm3, %v1323_v46, 0.0 }
 0x1ba   : > { %v4429_v48 = vpop.f32.mrf.mxu1 }
 0x1bb   : > { %1325 = vadd.xlane.f32.xlu1 %v1324_v47 }
 0x1bc   : > { %v3111_v49 = vpop.f32.mrf.mxu1 }
 0x23a   : > { %v1270_v50 = vpop.xlane.xlu0 %1269 }
 0x23b   : > { %v1275_v51 = vmul.f32 0.03125, %v1270_v50 }
 0x23c   : > { %v1274_v52 = vpop.xlane.xlu1 %1273 }
 0x23d   : > { %v1277_v53 = vmul.f32 %v1275_v51, %v1275_v51  ;;  %v1276_v54 = vmul.f32 0.03125, %v1274_v52  ;;  %v1280_v30 = vsub.f32 %v1266_v31, %v1275_v51 }
 0x23e   : > { %v1297_v55 = vpop.xlane.xlu0 %1296 }
 0x23f   : > { %v1278_v56 = vsub.f32 %v1276_v54, %v1277_v53  ;;  %v1302_v57 = vmul.f32 0.03125, %v1297_v55 }
 0x240   : > { %v1301_v58 = vpop.xlane.xlu1 %1300 }
 0x241   : > { %v1279_v59 = vmax.f32 %v1278_v56, 0.0  ;;  %v1304_v60 = vmul.f32 %v1302_v57, %v1302_v57  ;;  %v1303_v61 = vmul.f32 0.03125, %v1301_v58  ;;  %v1307_v37 = vsub.f32 %v1294_v34, %v1302_v57  ;;  %v4446_v34 = vld [vmem:[%s4894_s19] ss:$0 sm:$0xff] }
 0x242   : > { %v1322_v62 = vpop.xlane.xlu0 %1321  ;;  %v1341_v56 = vld [vmem:[%s4289_s2] sm:$0x3] }
 0x243   : > { %v1281_v63 = vadd.f32 1e-05, %v1279_v59  ;;  %v1305_v0 = vsub.f32 %v1303_v61, %v1304_v60  ;;  %v1327_v1 = vmul.f32 0.03125, %v1322_v62  ;;  %v4454_v58 = vld [vmem:[%s4895_s13] ss:$0 sm:$0xff]  ;;  %v1342_v60 = vadd.f32 %v1341_v56, %v4429_v48 }
 0x244   : > { %v1326_v10 = vpop.xlane.xlu1 %1325 }
 0x245   : > { %3397 = vrsqrt.f32 %v1281_v63  ;;  %v1306_v22 = vmax.f32 %v1305_v0, 0.0  ;;  %v1329_v24 = vmul.f32 %v1327_v1, %v1327_v1  ;;  %v1328_v25 = vmul.f32 0.03125, %v1326_v10 }
 0x246   : > { %v1332_v45 = vsub.f32 %v1319_v43, %v1327_v1 }
 0x247   : > { %v1308_v26 = vadd.f32 1e-05, %v1306_v22  ;;  %v1330_v27 = vsub.f32 %v1328_v25, %v1329_v24 }
 0x249   : > { %3399 = vrsqrt.f32 %v1308_v26  ;;  %v1331_v28 = vmax.f32 %v1330_v27, 0.0 }
 0x24b   : > { %v1333_v29 = vadd.f32 1e-05, %v1331_v28 }
 0x24d   : > { %3401 = vrsqrt.f32 %v1333_v29 }
 0x252   : > { %v3398_v32 = vpop.eup %3397 }
 0x253   : > { %v1283_v35 = vmul.f32 %v3398_v32, %v1280_v30 }
 0x255   : > { %v1284_v36 = vmul.f32 %v4434_v33, %v1283_v35 }
 0x256   : > { %v3400_v38 = vpop.eup %3399 }
 0x257   : > { %v2936_v40 = vmul.f32 -1.442695, %v1284_v36  ;;  %v1310_v41 = vmul.f32 %v3400_v38, %v1307_v37 }
 0x259   : > { %3403 = vpow2.f32 %v2936_v40  ;;  %v1311_v31 = vmul.f32 %v4440_v39, %v1310_v41 }
 0x25a   : > { %v3402_v44 = vpop.eup %3401 }
 0x25b   : > { %v2937_v42 = vmul.f32 -1.442695, %v1311_v31  ;;  %v1335_v46 = vmul.f32 %v3402_v44, %v1332_v45  ;;  %v4471_v45 = vld [vmem:[%s4896_s11] ss:$0 sm:$0xff] }
 0x25d   : > { %3405 = vpow2.f32 %v2937_v42  ;;  %v1336_v50 = vmul.f32 %v4446_v34, %v1335_v46 }
 0x266   : > { %v3404_v47 = vpop.eup %3403 }
 0x267   : > { %v1288_v49 = vadd.f32 1.0, %v3404_v47 }
 0x269   : > { %3407 = vrcp.f32 %v1288_v49 }
 0x26a   : > { %v3406_v51 = vpop.eup %3405  ;;  %3409 = vtanh.f32 %v1336_v50 }
 0x26b   : > { %v1315_v52 = vadd.f32 1.0, %v3406_v51 }
 0x26d   : > { %3411 = vrcp.f32 %v1315_v52 }
 0x276   : > { %v3408_v53 = vpop.eup %3407 }
 0x277   : > { %v3410_v54 = vpop.eup %3409  ;;  %v1338_v43 = vmul.f32 %v3408_v53, %v4409_v21  ;;  %v4478_v53 = vld [vmem:[%s4897_s1] ss:$0 sm:$0xff] }
 0x27a   : > { %v3412_v55 = vpop.eup %3411 }
 0x27b   : > { %v1339_v57 = vmul.f32 %v3412_v55, %v3410_v54  ;;  %v4484_v55 = vld [vmem:[%s4899_s25] ss:$0 sm:$0xff] }
 0x27d   : > { %v4456_v59 = vadd.f32 %v1339_v57, %v1338_v43 }
 0x27f   : > { %v1343_v61 = vmul.f32 %v4454_v58, %v4456_v59  ;;  %v1371_v1 = vmul.f32 %v4456_v59, %v4456_v59  ;;  %v1368_v10 = vsel %vm1267_vm3, %v4456_v59, 0.0 }
 0x281   : > { %v1344_v62 = vadd.f32 %v1343_v61, %v1342_v60  ;;  %v1372_v48 = vsel %vm1267_vm3, %v1371_v1, 0.0 }
 0x283   : > { %v1345_v63 = vsel %vm1267_vm3, %v1344_v62, 0.0  ;;  %v1348_v0 = vmul.f32 %v1344_v62, %v1344_v62 }
 0x284   : > { %1346 = vadd.xlane.f32.xlu0 %v1345_v63  ;;  %v2943_v63 = vld [vmem:[%s4279_s16 + $0x2] sm:$0x3] }
 0x285   : > { %v1349_v21 = vsel %vm1267_vm3, %v1348_v0, 0.0  ;;  %v2945_v0 = vld [vmem:[%s4285_s30 + $0x2] sm:$0x3] }
 0x286   : > { %1350 = vadd.xlane.f32.xlu1 %v1349_v21 }
 0x288   : > { %1369 = vadd.xlane.f32.xlu0 %v1368_v10 }
 0x28a   : > { %1373 = vadd.xlane.f32.xlu1 %v1372_v48  ;;  %v1675_v48 = vmul.f32 %v4407_v20, %v4456_v59 }
 0x30d   : > { %v1347_v22 = vpop.xlane.xlu0 %1346 }
 0x30e   : > { %v1352_v24 = vmul.f32 0.03125, %v1347_v22 }
 0x30f   : > { %v1351_v25 = vpop.xlane.xlu1 %1350 }
 0x310   : > { %v1354_v26 = vmul.f32 %v1352_v24, %v1352_v24  ;;  %v1353_v27 = vmul.f32 0.03125, %v1351_v25  ;;  %v1357_v42 = vsub.f32 %v1344_v62, %v1352_v24  ;;  %v1703_v24 = vmul.f32 %v4415_v23, %v4456_v59 }
 0x311   : > { %v1370_v28 = vpop.xlane.xlu0 %1369 }
 0x312   : > { %v1355_v29 = vsub.f32 %v1353_v27, %v1354_v26  ;;  %v1375_v30 = vmul.f32 0.03125, %v1370_v28 }
 0x313   : > { %v1374_v32 = vpop.xlane.xlu1 %1373 }
 0x314   : > { %v1356_v35 = vmax.f32 %v1355_v29, 0.0  ;;  %v1377_v36 = vmul.f32 %v1375_v30, %v1375_v30  ;;  %v1376_v37 = vmul.f32 0.03125, %v1374_v32  ;;  %v1380_v51 = vsub.f32 %v4456_v59, %v1375_v30 }
 0x316   : > { %v1358_v38 = vadd.f32 1e-05, %v1356_v35  ;;  %v1378_v40 = vsub.f32 %v1376_v37, %v1377_v36  ;;  %v2947_v36 = vld [vmem:[%s4287_s17 + $0x2] sm:$0x3] }
 0x318   : > { %3413 = vrsqrt.f32 %v1358_v38  ;;  %v1379_v41 = vmax.f32 %v1378_v40, 0.0 }
 0x31a   : > { %v1381_v31 = vadd.f32 1e-05, %v1379_v41 }
 0x31c   : > { %3415 = vrsqrt.f32 %v1381_v31 }
 0x325   : > { %v3414_v44 = vpop.eup %3413 }
 0x326   : > { %v1360_v46 = vmul.f32 %v3414_v44, %v1357_v42 }
 0x328   : > { %v1361_v47 = vmul.f32 %v4471_v45, %v1360_v46 }
 0x329   : > { %v3416_v50 = vpop.eup %3415 }
 0x32a   : > { %v2938_v49 = vmul.f32 -1.442695, %v1361_v47  ;;  %v1383_v52 = vmul.f32 %v3416_v50, %v1380_v51 }
 0x32c   : > { %3417 = vpow2.f32 %v2938_v49  ;;  %v1384_v54 = vmul.f32 %v4478_v53, %v1383_v52 }
 0x32e   : > { %v1385_v56 = vadd.f32 %v4484_v55, %v1384_v54 }
 0x330   : > { %3419 = vtanh.f32 %v1385_v56 }
 0x339   : > { %v3418_v43 = vpop.eup %3417 }
 0x33a   : > { %v1365_v57 = vadd.f32 1.0, %v3418_v43 }
 0x33c   : > { %3421 = vrcp.f32 %v1365_v57 }
 0x33d   : > { %v3420_v60 = vpop.eup %3419 }
 0x349   : > { %v3422_v61 = vpop.eup %3421 }
 0x34a   : > { %v1387_v62 = vmul.f32 %v3422_v61, %v3420_v60 }
 0x34c   : > { %1388 = vst.msk [vmem:[%s4303_s28] sm:$0x3] %vm1267_vm3, %v1387_v62  ;;  %3121 = vmatmul.mubr.msk.f32.vlgmr.msra.gmra.mxu0 %vm979_vm2, %v1387_v62  ;;  %3132 = vmatmul.mubr.msk.f32.vlgmr.msra.gmra.mxu1 %vm979_vm2, %v1387_v62 }
 0x34d   : > { %3135 = vmatpush3.msra.mxu0 %v4339_v12  ;;  %3146 = vmatpush3.msra.mxu1 %v4377_v16 }
 0x34e   : > { %3136 = vmatprep.subr.mxu0 %v3930_v4  ;;  %3147 = vmatprep.subr.mxu1 %v3930_v4 }
 0x34f   : > { %3137 = vmatpush3.msra.mxu0 %v4346_v13  ;;  %3148 = vmatpush3.msra.mxu1 %v4381_v17 }
 0x350   : > { %3138 = vmatprep.subr.mxu0 %v3930_v4  ;;  %3149 = vmatprep.subr.mxu1 %v3930_v4 }
 0x351   : > { %3139 = vmatpush3.msra.mxu0 %v4351_v14  ;;  %3150 = vmatpush3.msra.mxu1 %v4385_v18 }
 0x352   : > { %3140 = vmatprep.subr.mxu0 %v3930_v4  ;;  %3151 = vmatprep.subr.mxu1 %v3930_v4 }
 0x353   : > { %3141 = vmatpush3.msra.mxu0 %v4358_v15  ;;  %3142 = vmatprep.mubr.msk.f32.mxu0 %vm3931_vm1, %v3930_v4 }
 0x354   : > { %3152 = vmatpush3.msra.mxu1 %v4389_v19  ;;  %3153 = vmatprep.mubr.msk.f32.mxu1 %vm3931_vm1, %v3930_v4 }
 0x355   : > { %3143 = vmatmul.mubr.msk.f32.vlgmr.msra.gmra.mxu0 %vm979_vm2, %v1387_v62  ;;  %3154 = vmatmul.mubr.msk.f32.vlgmr.msra.gmra.mxu1 %vm979_vm2, %v1387_v62 }
 0x356   : > { %3156 = vmatprep.subr.mxu0 %v3930_v4  ;;  %3167 = vmatprep.subr.mxu1 %v3930_v4 }
 0x357   : > { %3157 = vmatpush3.msra.mxu0 %v4306_v2  ;;  %3168 = vmatpush3.msra.mxu1 %v4308_v3 }
 0x358   : > { %3158 = vmatprep.subr.mxu0 %v3930_v4  ;;  %3169 = vmatprep.subr.mxu1 %v3930_v4 }
 0x359   : > { %3159 = vmatpush3.msra.mxu0 %v4312_v5  ;;  %3170 = vmatpush3.msra.mxu1 %v4314_v6 }
 0x35a   : > { %3160 = vmatprep.subr.mxu0 %v3930_v4  ;;  %3171 = vmatprep.subr.mxu1 %v3930_v4 }
 0x35b   : > { %3161 = vmatpush3.msra.mxu0 %v4320_v7  ;;  %3172 = vmatpush3.msra.mxu1 %v4324_v8 }
 0x35c   : > { %3162 = vmatprep.subr.mxu0 %v3930_v4  ;;  %3173 = vmatprep.subr.mxu1 %v3930_v4 }
 0x35d   : > { %3163 = vmatpush3.msra.mxu0 %v4328_v9  ;;  %3174 = vmatpush3.msra.mxu1 %v4333_v11 }
 0x35e   : > { %3164 = vmatprep.mubr.msk.f32.mxu0 %vm3931_vm1, %v3930_v4  ;;  %3175 = vmatprep.mubr.msk.f32.mxu1 %vm3931_vm1, %v3930_v4 }
 0x35f   : > { %3178 = vmatprep.subr.mxu0 %v3930_v4  ;;  %3189 = vmatprep.subr.mxu1 %v3930_v4 }
 0x40c   : > { %v1458_v21 = vpop.f32.mrf.mxu0  ;;  %v1528_v1 = vpop.f32.mrf.mxu1 }
 0x40d   : > { %v1674_v10 = vadd.f32 %v2943_v63, %v1458_v21  ;;  %v1702_v22 = vadd.f32 %v2945_v0, %v1528_v1 }
 0x40e   : > { %v3122_v25 = vpop.f32.mrf.mxu0  ;;  %v3133_v26 = vpop.f32.mrf.mxu1 }
 0x40f   : > { %v1676_v27 = vadd.f32 %v1675_v48, %v1674_v10  ;;  %v1704_v28 = vadd.f32 %v1703_v24, %v1702_v22 }
 0x411   : > { %v1705_v29 = vsel %vm1267_vm3, %v1704_v28, 0.0  ;;  %v1677_v30 = vsel %vm1267_vm3, %v1676_v27, 0.0  ;;  %v1708_v32 = vmul.f32 %v1704_v28, %v1704_v28  ;;  %v1680_v35 = vmul.f32 %v1676_v27, %v1676_v27 }
 0x412   : > { %1706 = vadd.xlane.f32.xlu1 %v1705_v29  ;;  %1678 = vadd.xlane.f32.xlu0 %v1677_v30 }
 0x413   : > { %v1709_v40 = vsel %vm1267_vm3, %v1708_v32, 0.0  ;;  %v1681_v41 = vsel %vm1267_vm3, %v1680_v35, 0.0 }
 0x415   : > { %v1598_v37 = vpop.f32.mrf.mxu0  ;;  %v4542_v38 = vpop.f32.mrf.mxu1 }
 0x416   : > { %v1730_v31 = vadd.f32 %v2947_v36, %v1598_v37  ;;  %1710 = vadd.xlane.f32.xlu1 %v1709_v40  ;;  %1682 = vadd.xlane.f32.xlu0 %v1681_v41 }
 0x417   : > { %v3144_v42 = vpop.f32.mrf.mxu0  ;;  %v3155_v44 = vpop.f32.mrf.mxu1 }
 0x418   : > { %v1734_v46 = vmul.f32 %v1730_v31, %v1730_v31  ;;  %v1731_v47 = vsel %vm1267_vm3, %v1730_v31, 0.0 }
 0x41a   : > { %v1735_v49 = vsel %vm1267_vm3, %v1734_v46, 0.0  ;;  %1732 = vadd.xlane.f32.xlu0 %v1731_v47 }
 0x41b   : > { %1736 = vadd.xlane.f32.xlu1 %v1735_v49 }
 0x49b   : > { %v1707_v50 = vpop.xlane.xlu1 %1706  ;;  %v1679_v51 = vpop.xlane.xlu0 %1678 }
 0x49c   : > { %v1712_v52 = vmul.f32 0.03125, %v1707_v50  ;;  %v1684_v54 = vmul.f32 0.03125, %v1679_v51 }
 0x49e   : > { %v1714_v57 = vmul.f32 %v1712_v52, %v1712_v52  ;;  %v1686_v60 = vmul.f32 %v1684_v54, %v1684_v54  ;;  %v1717_v36 = vsub.f32 %v1704_v28, %v1712_v52  ;;  %v1689_v40 = vsub.f32 %v1676_v27, %v1684_v54 }
 0x49f   : > { %v1711_v56 = vpop.xlane.xlu1 %1710  ;;  %v1683_v43 = vpop.xlane.xlu0 %1682 }
 0x4a0   : > { %v1713_v61 = vmul.f32 0.03125, %v1711_v56  ;;  %v1685_v62 = vmul.f32 0.03125, %v1683_v43 }
 0x4a2   : > { %v1715_v63 = vsub.f32 %v1713_v61, %v1714_v57  ;;  %v1687_v0 = vsub.f32 %v1685_v62, %v1686_v60 }
 0x4a3   : > { %v1733_v21 = vpop.xlane.xlu0 %1732 }
 0x4a4   : > { %v1716_v1 = vmax.f32 %v1715_v63, 0.0  ;;  %v1688_v10 = vmax.f32 %v1687_v0, 0.0  ;;  %v1737_v48 = vpop.xlane.xlu1 %1736  ;;  %v1738_v22 = vmul.f32 0.03125, %v1733_v21  ;;  %v2948_v21 = vld [vmem:[%s4289_s2 + $0x2] sm:$0x3] }
 0x4a5   : > { %v1739_v26 = vmul.f32 0.03125, %v1737_v48 }
 0x4a6   : > { %v1718_v24 = vadd.f32 1e-05, %v1716_v1  ;;  %v1690_v25 = vadd.f32 1e-05, %v1688_v10  ;;  %v1740_v29 = vmul.f32 %v1738_v22, %v1738_v22  ;;  %v1743_v56 = vsub.f32 %v1730_v31, %v1738_v22 }
 0x4a7   : > { %v1754_v31 = vadd.f32 %v2948_v21, %v4542_v38 }
 0x4a8   : > { %3423 = vrsqrt.f32 %v1718_v24  ;;  %v1741_v30 = vsub.f32 %v1739_v26, %v1740_v29 }
 0x4a9   : > { %3425 = vrsqrt.f32 %v1690_v25 }
 0x4aa   : > { %v1742_v32 = vmax.f32 %v1741_v30, 0.0 }
 0x4ac   : > { %v1744_v35 = vadd.f32 1e-05, %v1742_v32 }
 0x4ae   : > { %3427 = vrsqrt.f32 %v1744_v35 }
 0x4b5   : > { %v3424_v37 = vpop.eup %3423 }
 0x4b6   : > { %v3426_v41 = vpop.eup %3425  ;;  %v1720_v42 = vmul.f32 %v3424_v37, %v1717_v36 }
 0x4b7   : > { %v1692_v44 = vmul.f32 %v3426_v41, %v1689_v40 }
 0x4b8   : > { %v1721_v46 = vmul.f32 %v4440_v39, %v1720_v42 }
 0x4b9   : > { %v1693_v47 = vmul.f32 %v4434_v33, %v1692_v44 }
 0x4ba   : > { %v2946_v49 = vmul.f32 -1.442695, %v1721_v46 }
 0x4bb   : > { %v2944_v50 = vmul.f32 -1.442695, %v1693_v47  ;;  %v3428_v51 = vpop.eup %3427 }
 0x4bc   : > { %3429 = vpow2.f32 %v2946_v49  ;;  %v1746_v43 = vmul.f32 %v3428_v51, %v1743_v56 }
 0x4bd   : > { %3431 = vpow2.f32 %v2944_v50 }
 0x4be   : > { %v1747_v57 = vmul.f32 %v4446_v34, %v1746_v43 }
 0x4c0   : > { %3433 = vtanh.f32 %v1747_v57 }
 0x4c9   : > { %v3430_v28 = vpop.eup %3429 }
 0x4ca   : > { %v3432_v52 = vpop.eup %3431  ;;  %v1725_v27 = vadd.f32 1.0, %v3430_v28 }
 0x4cb   : > { %v1697_v54 = vadd.f32 1.0, %v3432_v52 }
 0x4cc   : > { %3435 = vrcp.f32 %v1725_v27 }
 0x4cd   : > { %3437 = vrcp.f32 %v1697_v54  ;;  %v3434_v60 = vpop.eup %3433 }
 0x4d9   : > { %v3436_v61 = vpop.eup %3435 }
 0x4da   : > { %v3438_v62 = vpop.eup %3437  ;;  %v1750_v63 = vmul.f32 %v3436_v61, %v3434_v60 }
 0x4db   : > { %v1749_v0 = vmul.f32 %v3438_v62, %v4456_v59 }
 0x4dd   : > { %v4553_v1 = vadd.f32 %v1750_v63, %v1749_v0 }
 0x4df   : > { %v1755_v10 = vmul.f32 %v4454_v58, %v4553_v1  ;;  %v1783_v26 = vmul.f32 %v4553_v1, %v4553_v1  ;;  %v1780_v59 = vsel %vm1267_vm3, %v4553_v1, 0.0 }
 0x4e1   : > { %v1756_v48 = vadd.f32 %v1755_v10, %v1754_v31  ;;  %v1784_v38 = vsel %vm1267_vm3, %v1783_v26, 0.0 }
 0x4e3   : > { %v1757_v22 = vsel %vm1267_vm3, %v1756_v48, 0.0  ;;  %v1760_v24 = vmul.f32 %v1756_v48, %v1756_v48 }
 0x4e4   : > { %1758 = vadd.xlane.f32.xlu0 %v1757_v22  ;;  %v2959_v22 = vld [vmem:[%s4287_s17 + $0x4] sm:$0x3] }
 0x4e5   : > { %v1761_v25 = vsel %vm1267_vm3, %v1760_v24, 0.0 }
 0x4e6   : > { %1762 = vadd.xlane.f32.xlu1 %v1761_v25 }
 0x4e8   : > { %1781 = vadd.xlane.f32.xlu0 %v1780_v59 }
 0x4ea   : > { %1785 = vadd.xlane.f32.xlu1 %v1784_v38 }
 0x56d   : > { %v1759_v29 = vpop.xlane.xlu0 %1758 }
 0x56e   : > { %v1764_v30 = vmul.f32 0.03125, %v1759_v29 }
 0x56f   : > { %v1763_v32 = vpop.xlane.xlu1 %1762 }
 0x570   : > { %v1766_v35 = vmul.f32 %v1764_v30, %v1764_v30  ;;  %v1765_v36 = vmul.f32 0.03125, %v1763_v32  ;;  %v1769_v43 = vsub.f32 %v1756_v48, %v1764_v30 }
 0x571   : > { %v1782_v37 = vpop.xlane.xlu0 %1781 }
 0x572   : > { %v1767_v40 = vsub.f32 %v1765_v36, %v1766_v35  ;;  %v1787_v41 = vmul.f32 0.03125, %v1782_v37 }
 0x573   : > { %v1786_v42 = vpop.xlane.xlu1 %1785 }
 0x574   : > { %v1768_v44 = vmax.f32 %v1767_v40, 0.0  ;;  %v1789_v46 = vmul.f32 %v1787_v41, %v1787_v41  ;;  %v1788_v47 = vmul.f32 0.03125, %v1786_v42  ;;  %v1792_v60 = vsub.f32 %v4553_v1, %v1787_v41 }
 0x576   : > { %v1770_v49 = vadd.f32 1e-05, %v1768_v44  ;;  %v1790_v50 = vsub.f32 %v1788_v47, %v1789_v46 }
 0x578   : > { %3439 = vrsqrt.f32 %v1770_v49  ;;  %v1791_v51 = vmax.f32 %v1790_v50, 0.0 }
 0x57a   : > { %v1793_v56 = vadd.f32 1e-05, %v1791_v51 }
 0x57c   : > { %3441 = vrsqrt.f32 %v1793_v56 }
 0x585   : > { %v3440_v57 = vpop.eup %3439 }
 0x586   : > { %v1772_v28 = vmul.f32 %v3440_v57, %v1769_v43 }
 0x588   : > { %v1773_v52 = vmul.f32 %v4471_v45, %v1772_v28 }
 0x589   : > { %v3442_v54 = vpop.eup %3441 }
 0x58a   : > { %v2949_v27 = vmul.f32 -1.442695, %v1773_v52  ;;  %v1795_v61 = vmul.f32 %v3442_v54, %v1792_v60 }
 0x58c   : > { %3443 = vpow2.f32 %v2949_v27  ;;  %v1796_v62 = vmul.f32 %v4478_v53, %v1795_v61 }
 0x58e   : > { %v1797_v63 = vadd.f32 %v4484_v55, %v1796_v62 }
 0x590   : > { %3445 = vtanh.f32 %v1797_v63 }
 0x599   : > { %v3444_v0 = vpop.eup %3443 }
 0x59a   : > { %v1777_v21 = vadd.f32 1.0, %v3444_v0 }
 0x59c   : > { %3447 = vrcp.f32 %v1777_v21 }
 0x59d   : > { %v3446_v31 = vpop.eup %3445 }
 0x5a9   : > { %v3448_v10 = vpop.eup %3447 }
 0x5aa   : > { %v1799_v48 = vmul.f32 %v3448_v10, %v3446_v31 }
 0x5ac   : > { %2950 = vst.msk [vmem:[%s4303_s28 + $0x2] sm:$0x3] %vm1267_vm3, %v1799_v48  ;;  %3165 = vmatmul.mubr.msk.f32.vlgmr.msra.gmra.mxu0 %vm979_vm2, %v1799_v48  ;;  %3176 = vmatmul.mubr.msk.f32.vlgmr.msra.gmra.mxu1 %vm979_vm2, %v1799_v48 }
 0x5ad   : > { %3179 = vmatpush3.msra.mxu0 %v4339_v12  ;;  %3190 = vmatpush3.msra.mxu1 %v4377_v16 }
 0x5ae   : > { %3180 = vmatprep.subr.mxu0 %v3930_v4  ;;  %3191 = vmatprep.subr.mxu1 %v3930_v4 }
 0x5af   : > { %3181 = vmatpush3.msra.mxu0 %v4346_v13  ;;  %3192 = vmatpush3.msra.mxu1 %v4381_v17 }
 0x5b0   : > { %3182 = vmatprep.subr.mxu0 %v3930_v4  ;;  %3193 = vmatprep.subr.mxu1 %v3930_v4 }
 0x5b1   : > { %3183 = vmatpush3.msra.mxu0 %v4351_v14  ;;  %3194 = vmatpush3.msra.mxu1 %v4385_v18 }
 0x5b2   : > { %3184 = vmatprep.subr.mxu0 %v3930_v4  ;;  %3195 = vmatprep.subr.mxu1 %v3930_v4 }
 0x5b3   : > { %3185 = vmatpush3.msra.mxu0 %v4358_v15  ;;  %3186 = vmatprep.mubr.msk.f32.mxu0 %vm3931_vm1, %v3930_v4 }
 0x5b4   : > { %3196 = vmatpush3.msra.mxu1 %v4389_v19  ;;  %3197 = vmatprep.mubr.msk.f32.mxu1 %vm3931_vm1, %v3930_v4 }
 0x5b5   : > { %3187 = vmatmul.mubr.msk.f32.vlgmr.msra.gmra.mxu0 %vm979_vm2, %v1799_v48  ;;  %3198 = vmatmul.mubr.msk.f32.vlgmr.msra.gmra.mxu1 %vm979_vm2, %v1799_v48 }
 0x5b6   : > { %3200 = vmatprep.subr.mxu0 %v3930_v4  ;;  %3211 = vmatprep.subr.mxu1 %v3930_v4 }
 0x5b7   : > { %3201 = vmatpush3.msra.mxu0 %v4306_v2  ;;  %3212 = vmatpush3.msra.mxu1 %v4308_v3  ;;  %v2955_v2 = vld [vmem:[%s4279_s16 + $0x4] sm:$0x3]  ;;  %v2957_v3 = vld [vmem:[%s4285_s30 + $0x4] sm:$0x3] }
 0x5b8   : > { %3202 = vmatprep.subr.mxu0 %v3930_v4  ;;  %3213 = vmatprep.subr.mxu1 %v3930_v4 }
 0x5b9   : > { %3203 = vmatpush3.msra.mxu0 %v4312_v5  ;;  %3214 = vmatpush3.msra.mxu1 %v4314_v6 }
 0x5ba   : > { %3204 = vmatprep.subr.mxu0 %v3930_v4  ;;  %3215 = vmatprep.subr.mxu1 %v3930_v4 }
 0x5bb   : > { %3205 = vmatpush3.msra.mxu0 %v4320_v7  ;;  %3216 = vmatpush3.msra.mxu1 %v4324_v8  ;;  %v2088_v8 = vmul.f32 %v4407_v20, %v4553_v1 }
 0x5bc   : > { %3206 = vmatprep.subr.mxu0 %v3930_v4  ;;  %3217 = vmatprep.subr.mxu1 %v3930_v4 }
 0x5bd   : > { %3207 = vmatpush3.msra.mxu0 %v4328_v9  ;;  %3218 = vmatpush3.msra.mxu1 %v4333_v11  ;;  %v2116_v11 = vmul.f32 %v4415_v23, %v4553_v1 }
 0x5be   : > { %3208 = vmatprep.mubr.msk.f32.mxu0 %vm3931_vm1, %v3930_v4  ;;  %3219 = vmatprep.mubr.msk.f32.mxu1 %vm3931_vm1, %v3930_v4 }
 0x5bf   : > { %3222 = vmatprep.subr.mxu0 %v3930_v4  ;;  %3233 = vmatprep.subr.mxu1 %v3930_v4 }
 0x66c   : > { %v1871_v5 = vpop.f32.mrf.mxu0  ;;  %v1941_v6 = vpop.f32.mrf.mxu1 }
 0x66d   : > { %v2087_v7 = vadd.f32 %v2955_v2, %v1871_v5  ;;  %v2115_v9 = vadd.f32 %v2957_v3, %v1941_v6 }
 0x66e   : > { %v3166_v12 = vpop.f32.mrf.mxu0  ;;  %v3177_v13 = vpop.f32.mrf.mxu1 }
 0x66f   : > { %v2089_v14 = vadd.f32 %v2088_v8, %v2087_v7  ;;  %v2117_v15 = vadd.f32 %v2116_v11, %v2115_v9 }
 0x671   : > { %v2118_v16 = vsel %vm1267_vm3, %v2117_v15, 0.0  ;;  %v2090_v17 = vsel %vm1267_vm3, %v2089_v14, 0.0  ;;  %v2121_v18 = vmul.f32 %v2117_v15, %v2117_v15  ;;  %v2093_v19 = vmul.f32 %v2089_v14, %v2089_v14 }
 0x672   : > { %2119 = vadd.xlane.f32.xlu1 %v2118_v16  ;;  %2091 = vadd.xlane.f32.xlu0 %v2090_v17 }
 0x673   : > { %v2122_v20 = vsel %vm1267_vm3, %v2121_v18, 0.0  ;;  %v2094_v23 = vsel %vm1267_vm3, %v2093_v19, 0.0 }
 0x675   : > { %v2011_v24 = vpop.f32.mrf.mxu0  ;;  %v4624_v25 = vpop.f32.mrf.mxu1 }
 0x676   : > { %v2143_v26 = vadd.f32 %v2959_v22, %v2011_v24  ;;  %2123 = vadd.xlane.f32.xlu1 %v2122_v20  ;;  %2095 = vadd.xlane.f32.xlu0 %v2094_v23  ;;  %v2960_v24 = vld [vmem:[%s4289_s2 + $0x4] sm:$0x3] }
 0x677   : > { %v3188_v59 = vpop.f32.mrf.mxu0  ;;  %v3199_v38 = vpop.f32.mrf.mxu1  ;;  %v2167_v23 = vadd.f32 %v2960_v24, %v4624_v25 }
 0x678   : > { %v2147_v29 = vmul.f32 %v2143_v26, %v2143_v26  ;;  %v2144_v30 = vsel %vm1267_vm3, %v2143_v26, 0.0 }
 0x67a   : > { %v2148_v32 = vsel %vm1267_vm3, %v2147_v29, 0.0  ;;  %2145 = vadd.xlane.f32.xlu0 %v2144_v30 }
 0x67b   : > { %2149 = vadd.xlane.f32.xlu1 %v2148_v32 }
 0x6fb   : > { %v2120_v35 = vpop.xlane.xlu1 %2119  ;;  %v2092_v36 = vpop.xlane.xlu0 %2091 }
 0x6fc   : > { %v2125_v37 = vmul.f32 0.03125, %v2120_v35  ;;  %v2097_v40 = vmul.f32 0.03125, %v2092_v36 }
 0x6fe   : > { %v2127_v44 = vmul.f32 %v2125_v37, %v2125_v37  ;;  %v2099_v46 = vmul.f32 %v2097_v40, %v2097_v40  ;;  %v2130_v21 = vsub.f32 %v2117_v15, %v2125_v37  ;;  %v2102_v10 = vsub.f32 %v2089_v14, %v2097_v40 }
 0x6ff   : > { %v2124_v41 = vpop.xlane.xlu1 %2123  ;;  %v2096_v42 = vpop.xlane.xlu0 %2095 }
 0x700   : > { %v2126_v47 = vmul.f32 0.03125, %v2124_v41  ;;  %v2098_v49 = vmul.f32 0.03125, %v2096_v42 }
 0x702   : > { %v2128_v50 = vsub.f32 %v2126_v47, %v2127_v44  ;;  %v2100_v51 = vsub.f32 %v2098_v49, %v2099_v46 }
 0x703   : > { %v2146_v56 = vpop.xlane.xlu0 %2145 }
 0x704   : > { %v2129_v43 = vmax.f32 %v2128_v50, 0.0  ;;  %v2101_v57 = vmax.f32 %v2100_v51, 0.0  ;;  %v2150_v28 = vpop.xlane.xlu1 %2149  ;;  %v2151_v52 = vmul.f32 0.03125, %v2146_v56 }
 0x705   : > { %v2152_v60 = vmul.f32 0.03125, %v2150_v28 }
 0x706   : > { %v2131_v27 = vadd.f32 1e-05, %v2129_v43  ;;  %v2103_v54 = vadd.f32 1e-05, %v2101_v57  ;;  %v2153_v61 = vmul.f32 %v2151_v52, %v2151_v52  ;;  %v2156_v11 = vsub.f32 %v2143_v26, %v2151_v52 }
 0x708   : > { %3449 = vrsqrt.f32 %v2131_v27  ;;  %v2154_v62 = vsub.f32 %v2152_v60, %v2153_v61 }
 0x709   : > { %3451 = vrsqrt.f32 %v2103_v54 }
 0x70a   : > { %v2155_v63 = vmax.f32 %v2154_v62, 0.0 }
 0x70c   : > { %v2157_v0 = vadd.f32 1e-05, %v2155_v63 }
 0x70e   : > { %3453 = vrsqrt.f32 %v2157_v0 }
 0x715   : > { %v3450_v31 = vpop.eup %3449 }
 0x716   : > { %v3452_v48 = vpop.eup %3451  ;;  %v2133_v2 = vmul.f32 %v3450_v31, %v2130_v21 }
 0x717   : > { %v2105_v3 = vmul.f32 %v3452_v48, %v2102_v10 }
 0x718   : > { %v2134_v5 = vmul.f32 %v4440_v39, %v2133_v2 }
 0x719   : > { %v2106_v6 = vmul.f32 %v4434_v33, %v2105_v3  ;;  %v3502_v3 = vld [vmem:[#allocation17 + $0x18] sm:$0xff] }
 0x71a   : > { %v2958_v7 = vmul.f32 -1.442695, %v2134_v5  ;;  %v3505_v5 = vld [vmem:[#allocation16 + $0x8] sm:$0xff] }
 0x71b   : > { %v2956_v8 = vmul.f32 -1.442695, %v2106_v6  ;;  %v3454_v9 = vpop.eup %3453  ;;  %v3506_v6 = vld [vmem:[#allocation17 + $0x8] sm:$0xff] }
 0x71c   : > { %3455 = vpow2.f32 %v2958_v7  ;;  %v2159_v12 = vmul.f32 %v3454_v9, %v2156_v11  ;;  %v3507_v7 = vld [vmem:[#allocation16] sm:$0xff]  ;;  %v2969_v11 = vld [vmem:[%s4285_s30 + $0x6] sm:$0x3] }
 0x71d   : > { %3457 = vpow2.f32 %v2956_v8  ;;  %v3508_v8 = vld [vmem:[#allocation17] sm:$0xff] }
 0x71e   : > { %v2160_v13 = vmul.f32 %v4446_v34, %v2159_v12  ;;  %v2967_v9 = vld [vmem:[%s4279_s16 + $0x6] sm:$0x3] }
 0x720   : > { %3459 = vtanh.f32 %v2160_v13 }
 0x729   : > { %v3456_v15 = vpop.eup %3455 }
 0x72a   : > { %v3458_v16 = vpop.eup %3457  ;;  %v2138_v14 = vadd.f32 1.0, %v3456_v15 }
 0x72b   : > { %v2110_v17 = vadd.f32 1.0, %v3458_v16  ;;  %v3509_v16 = vld [vmem:[%s4889_s10] ss:$0 sm:$0xff] }
 0x72c   : > { %3461 = vrcp.f32 %v2138_v14 }
 0x72d   : > { %3463 = vrcp.f32 %v2110_v17  ;;  %v3460_v39 = vpop.eup %3459 }
 0x739   : > { %v3462_v18 = vpop.eup %3461 }
 0x73a   : > { %v3464_v33 = vpop.eup %3463  ;;  %v2163_v19 = vmul.f32 %v3462_v18, %v3460_v39 }
 0x73b   : > { %v2162_v22 = vmul.f32 %v3464_v33, %v4553_v1 }
 0x73d   : > { %v4635_v20 = vadd.f32 %v2163_v19, %v2162_v22 }
 0x73f   : > { %v2168_v34 = vmul.f32 %v4454_v58, %v4635_v20  ;;  %v2196_v30 = vmul.f32 %v4635_v20, %v4635_v20  ;;  %v2193_v1 = vsel %vm1267_vm3, %v4635_v20, 0.0  ;;  %v2501_v14 = vmul.f32 %v3509_v16, %v4635_v20  ;;  %v3513_v16 = vld [vmem:[%s4894_s19] ss:$0 sm:$0xff] }
 0x741   : > { %v2169_v26 = vadd.f32 %v2168_v34, %v2167_v23  ;;  %v2197_v25 = vsel %vm1267_vm3, %v2196_v30, 0.0 }
 0x743   : > { %v2170_v59 = vsel %vm1267_vm3, %v2169_v26, 0.0  ;;  %v2173_v38 = vmul.f32 %v2169_v26, %v2169_v26 }
 0x744   : > { %2171 = vadd.xlane.f32.xlu0 %v2170_v59  ;;  %v2971_v59 = vld [vmem:[%s4287_s17 + $0x6] sm:$0x3]  ;;  %s4901_s17 = sld [smem:[#allocation32_spill]] }
 0x745   : > { %v2174_v29 = vsel %vm1267_vm3, %v2173_v38, 0.0 }
 0x746   : > { %2175 = vadd.xlane.f32.xlu1 %v2174_v29 }
 0x748   : > { %2194 = vadd.xlane.f32.xlu0 %v2193_v1 }
 0x74a   : > { %2198 = vadd.xlane.f32.xlu1 %v2197_v25  ;;  %p2975_p1 = scmp.ne.s32.totalorder %s4901_s17, 1 }
 0x7cd   : > { %v2172_v32 = vpop.xlane.xlu0 %2171 }
 0x7ce   : > { %v2177_v58 = vmul.f32 0.03125, %v2172_v32 }
 0x7cf   : > { %v2176_v35 = vpop.xlane.xlu1 %2175 }
 0x7d0   : > { %v2179_v36 = vmul.f32 %v2177_v58, %v2177_v58  ;;  %v2178_v37 = vmul.f32 0.03125, %v2176_v35  ;;  %v2182_v57 = vsub.f32 %v2169_v26, %v2177_v58 }
 0x7d1   : > { %v2195_v40 = vpop.xlane.xlu0 %2194 }
 0x7d2   : > { %v2180_v41 = vsub.f32 %v2178_v37, %v2179_v36  ;;  %v2200_v42 = vmul.f32 0.03125, %v2195_v40 }
 0x7d3   : > { %v2199_v44 = vpop.xlane.xlu1 %2198 }
 0x7d4   : > { %v2181_v46 = vmax.f32 %v2180_v41, 0.0  ;;  %v2202_v47 = vmul.f32 %v2200_v42, %v2200_v42  ;;  %v2201_v49 = vmul.f32 0.03125, %v2199_v44  ;;  %v2205_v61 = vsub.f32 %v4635_v20, %v2200_v42 }
 0x7d6   : > { %v2183_v50 = vadd.f32 1e-05, %v2181_v46  ;;  %v2203_v51 = vsub.f32 %v2201_v49, %v2202_v47 }
 0x7d8   : > { %3465 = vrsqrt.f32 %v2183_v50  ;;  %v2204_v56 = vmax.f32 %v2203_v51, 0.0 }
 0x7da   : > { %v2206_v43 = vadd.f32 1e-05, %v2204_v56 }
 0x7dc   : > { %3467 = vrsqrt.f32 %v2206_v43 }
 0x7e5   : > { %v3466_v28 = vpop.eup %3465 }
 0x7e6   : > { %v2185_v52 = vmul.f32 %v3466_v28, %v2182_v57 }
 0x7e8   : > { %v2186_v27 = vmul.f32 %v4471_v45, %v2185_v52  ;;  %v3501_v45 = vld [vmem:[#allocation16 + $0x18] sm:$0xff] }
 0x7e9   : > { %v3468_v60 = vpop.eup %3467 }
 0x7ea   : > { %v2961_v54 = vmul.f32 -1.442695, %v2186_v27  ;;  %v2208_v62 = vmul.f32 %v3468_v60, %v2205_v61 }
 0x7ec   : > { %3469 = vpow2.f32 %v2961_v54  ;;  %v2209_v63 = vmul.f32 %v4478_v53, %v2208_v62  ;;  %v3503_v53 = vld [vmem:[#allocation16 + $0x10] sm:$0xff] }
 0x7ee   : > { %v2210_v0 = vadd.f32 %v4484_v55, %v2209_v63  ;;  %v3504_v55 = vld [vmem:[#allocation17 + $0x10] sm:$0xff] }
 0x7f0   : > { %3471 = vtanh.f32 %v2210_v0 }
 0x7f9   : > { %v3470_v21 = vpop.eup %3469 }
 0x7fa   : > { %v2190_v31 = vadd.f32 1.0, %v3470_v21 }
 0x7fc   : > { %3473 = vrcp.f32 %v2190_v31 }
 0x7fd   : > { %v3472_v10 = vpop.eup %3471 }
 0x809   : > { %v3474_v48 = vpop.eup %3473 }
 0x80a   : > { %v2212_v2 = vmul.f32 %v3474_v48, %v3472_v10 }
 0x80c   : > { %2962 = vst.msk [vmem:[%s4303_s28 + $0x4] sm:$0x3] %vm1267_vm3, %v2212_v2  ;;  %3209 = vmatmul.mubr.msk.f32.vlgmr.msra.gmra.mxu0 %vm979_vm2, %v2212_v2  ;;  %3220 = vmatmul.mubr.msk.f32.vlgmr.msra.gmra.mxu1 %vm979_vm2, %v2212_v2 }
 0x80d   : > { %3223 = vmatpush3.msra.mxu0 %v3501_v45  ;;  %3234 = vmatpush3.msra.mxu1 %v3502_v3 }
 0x80e   : > { %3224 = vmatprep.subr.mxu0 %v3930_v4  ;;  %3235 = vmatprep.subr.mxu1 %v3930_v4 }
 0x80f   : > { %3225 = vmatpush3.msra.mxu0 %v3503_v53  ;;  %3236 = vmatpush3.msra.mxu1 %v3504_v55 }
 0x810   : > { %3226 = vmatprep.subr.mxu0 %v3930_v4  ;;  %3237 = vmatprep.subr.mxu1 %v3930_v4 }
 0x811   : > { %3227 = vmatpush3.msra.mxu0 %v3505_v5  ;;  %3238 = vmatpush3.msra.mxu1 %v3506_v6  ;;  %v3511_v5 = vld [vmem:[%s4893_s0] ss:$0 sm:$0xff] }
 0x812   : > { %3228 = vmatprep.subr.mxu0 %v3930_v4  ;;  %3239 = vmatprep.subr.mxu1 %v3930_v4 }
 0x813   : > { %3229 = vmatpush3.msra.mxu0 %v3507_v7  ;;  %3230 = vmatprep.mubr.msk.f32.mxu0 %vm3931_vm1, %v3930_v4  ;;  %v3512_v7 = vld [vmem:[%s4892_s4] ss:$0 sm:$0xff] }
 0x814   : > { %3240 = vmatpush3.msra.mxu1 %v3508_v8  ;;  %3241 = vmatprep.mubr.msk.f32.mxu1 %vm3931_vm1, %v3930_v4  ;;  %v3510_v4 = vld [vmem:[%s4890_s14] ss:$0 sm:$0xff] }
 0x815   : > { %3231 = vmatmul.mubr.msk.f32.vlgmr.msra.gmra.mxu0 %vm979_vm2, %v2212_v2  ;;  %3242 = vmatmul.mubr.msk.f32.vlgmr.msra.gmra.mxu1 %vm979_vm2, %v2212_v2  ;;  %v2529_v39 = vmul.f32 %v3510_v4, %v4635_v20 }
 0x8cc   : > { %v2284_v12 = vpop.f32.mrf.mxu0  ;;  %v2354_v13 = vpop.f32.mrf.mxu1 }
 0x8cd   : > { %v2500_v15 = vadd.f32 %v2967_v9, %v2284_v12  ;;  %v2528_v17 = vadd.f32 %v2969_v11, %v2354_v13 }
 0x8ce   : > { %v3210_v18 = vpop.f32.mrf.mxu0  ;;  %v3221_v33 = vpop.f32.mrf.mxu1 }
 0x8cf   : > { %v2502_v19 = vadd.f32 %v2501_v14, %v2500_v15  ;;  %v2530_v22 = vadd.f32 %v2529_v39, %v2528_v17 }
 0x8d1   : > { %v2531_v24 = vsel %vm1267_vm3, %v2530_v22, 0.0  ;;  %v2503_v23 = vsel %vm1267_vm3, %v2502_v19, 0.0  ;;  %v2534_v34 = vmul.f32 %v2530_v22, %v2530_v22  ;;  %v2506_v26 = vmul.f32 %v2502_v19, %v2502_v19 }
 0x8d2   : > { %2532 = vadd.xlane.f32.xlu1 %v2531_v24  ;;  %2504 = vadd.xlane.f32.xlu0 %v2503_v23 }
 0x8d3   : > { %v2535_v30 = vsel %vm1267_vm3, %v2534_v34, 0.0  ;;  %v2507_v1 = vsel %vm1267_vm3, %v2506_v26, 0.0  ;;  %v2972_v34 = vld [vmem:[%s4289_s2 + $0x6] sm:$0x3] }
 0x8d5   : > { %v2424_v38 = vpop.f32.mrf.mxu0  ;;  %v4680_v29 = vpop.f32.mrf.mxu1 }
 0x8d6   : > { %v2556_v25 = vadd.f32 %v2971_v59, %v2424_v38  ;;  %2536 = vadd.xlane.f32.xlu1 %v2535_v30  ;;  %2508 = vadd.xlane.f32.xlu0 %v2507_v1  ;;  %v2580_v59 = vadd.f32 %v2972_v34, %v4680_v29  ;;  %v3514_v38 = vld [vmem:[%s4895_s13] ss:$0 sm:$0xff] }
 0x8d7   : > { %v3232_v32 = vpop.f32.mrf.mxu0  ;;  %v3243_v58 = vpop.f32.mrf.mxu1 }
 0x8d8   : > { %v2560_v35 = vmul.f32 %v2556_v25, %v2556_v25  ;;  %v2557_v36 = vsel %vm1267_vm3, %v2556_v25, 0.0 }
 0x8da   : > { %v2561_v37 = vsel %vm1267_vm3, %v2560_v35, 0.0  ;;  %2558 = vadd.xlane.f32.xlu0 %v2557_v36 }
 0x8db   : > { %2562 = vadd.xlane.f32.xlu1 %v2561_v37 }
 0x95b   : > { %v2533_v40 = vpop.xlane.xlu1 %2532  ;;  %v2505_v41 = vpop.xlane.xlu0 %2504 }
 0x95c   : > { %v2538_v42 = vmul.f32 0.03125, %v2533_v40  ;;  %v2510_v44 = vmul.f32 0.03125, %v2505_v41 }
 0x95e   : > { %v2540_v49 = vmul.f32 %v2538_v42, %v2538_v42  ;;  %v2512_v50 = vmul.f32 %v2510_v44, %v2510_v44  ;;  %v2543_v48 = vsub.f32 %v2530_v22, %v2538_v42  ;;  %v2515_v45 = vsub.f32 %v2502_v19, %v2510_v44 }
 0x95f   : > { %v2537_v46 = vpop.xlane.xlu1 %2536  ;;  %v2509_v47 = vpop.xlane.xlu0 %2508 }
 0x960   : > { %v2539_v51 = vmul.f32 0.03125, %v2537_v46  ;;  %v2511_v56 = vmul.f32 0.03125, %v2509_v47 }
 0x962   : > { %v2541_v43 = vsub.f32 %v2539_v51, %v2540_v49  ;;  %v2513_v57 = vsub.f32 %v2511_v56, %v2512_v50 }
 0x963   : > { %v2559_v28 = vpop.xlane.xlu0 %2558 }
 0x964   : > { %v2542_v52 = vmax.f32 %v2541_v43, 0.0  ;;  %v2514_v27 = vmax.f32 %v2513_v57, 0.0  ;;  %v2563_v54 = vpop.xlane.xlu1 %2562  ;;  %v2564_v60 = vmul.f32 0.03125, %v2559_v28 }
 0x965   : > { %v2565_v63 = vmul.f32 0.03125, %v2563_v54 }
 0x966   : > { %v2544_v61 = vadd.f32 1e-05, %v2542_v52  ;;  %v2516_v62 = vadd.f32 1e-05, %v2514_v27  ;;  %v2566_v0 = vmul.f32 %v2564_v60, %v2564_v60  ;;  %v2569_v13 = vsub.f32 %v2556_v25, %v2564_v60 }
 0x968   : > { %3475 = vrsqrt.f32 %v2544_v61  ;;  %v2567_v21 = vsub.f32 %v2565_v63, %v2566_v0  ;;  %v3515_v61 = vld [vmem:[%s4896_s11] ss:$0 sm:$0xff] }
 0x969   : > { %3477 = vrsqrt.f32 %v2516_v62 }
 0x96a   : > { %v2568_v31 = vmax.f32 %v2567_v21, 0.0 }
 0x96c   : > { %v2570_v10 = vadd.f32 1e-05, %v2568_v31 }
 0x96e   : > { %3479 = vrsqrt.f32 %v2570_v10  ;;  %v3516_v10 = vld [vmem:[%s4898_s18] ss:$0 sm:$0xff] }
 0x975   : > { %v3476_v2 = vpop.eup %3475 }
 0x976   : > { %v3478_v3 = vpop.eup %3477  ;;  %v2546_v53 = vmul.f32 %v3476_v2, %v2543_v48  ;;  %v3517_v2 = vld [vmem:[%s4900_s27] ss:$0 sm:$0xff] }
 0x977   : > { %v2518_v55 = vmul.f32 %v3478_v3, %v2515_v45 }
 0x978   : > { %v2547_v6 = vmul.f32 %v3511_v5, %v2546_v53 }
 0x979   : > { %v2519_v8 = vmul.f32 %v3512_v7, %v2518_v55 }
 0x97a   : > { %v2970_v9 = vmul.f32 -1.442695, %v2547_v6 }
 0x97b   : > { %v2968_v11 = vmul.f32 -1.442695, %v2519_v8  ;;  %v3480_v12 = vpop.eup %3479 }
 0x97c   : > { %3481 = vpow2.f32 %v2970_v9  ;;  %v2572_v15 = vmul.f32 %v3480_v12, %v2569_v13 }
 0x97d   : > { %3483 = vpow2.f32 %v2968_v11 }
 0x97e   : > { %v2573_v14 = vmul.f32 %v3513_v16, %v2572_v15 }
 0x980   : > { %3485 = vtanh.f32 %v2573_v14 }
 0x989   : > { %v3482_v17 = vpop.eup %3481 }
 0x98a   : > { %v3484_v4 = vpop.eup %3483  ;;  %v2551_v39 = vadd.f32 1.0, %v3482_v17 }
 0x98b   : > { %v2523_v18 = vadd.f32 1.0, %v3484_v4 }
 0x98c   : > { %3487 = vrcp.f32 %v2551_v39 }
 0x98d   : > { %3489 = vrcp.f32 %v2523_v18  ;;  %v3486_v33 = vpop.eup %3485 }
 0x999   : > { %v3488_v19 = vpop.eup %3487 }
 0x99a   : > { %v3490_v22 = vpop.eup %3489  ;;  %v2576_v24 = vmul.f32 %v3488_v19, %v3486_v33 }
 0x99b   : > { %v2575_v23 = vmul.f32 %v3490_v22, %v4635_v20 }
 0x99d   : > { %v2577_v26 = vadd.f32 %v2576_v24, %v2575_v23 }
 0x99f   : > { %v2581_v30 = vmul.f32 %v3514_v38, %v2577_v26  ;;  %2629 = vst.msk [vmem:[#allocation3] sm:$0x3] %vm1267_vm3, %v2577_v26  ;;  %v2609_v35 = vmul.f32 %v2577_v26, %v2577_v26  ;;  %v2606_v20 = vsel %vm1267_vm3, %v2577_v26, 0.0 }
 0x9a1   : > { %v2582_v1 = vadd.f32 %v2581_v30, %v2580_v59  ;;  %v2610_v29 = vsel %vm1267_vm3, %v2609_v35, 0.0 }
 0x9a3   : > { %v2583_v25 = vsel %vm1267_vm3, %v2582_v1, 0.0  ;;  %v2586_v32 = vmul.f32 %v2582_v1, %v2582_v1 }
 0x9a4   : > { %2584 = vadd.xlane.f32.xlu0 %v2583_v25 }
 0x9a5   : > { %v2587_v58 = vsel %vm1267_vm3, %v2586_v32, 0.0 }
 0x9a6   : > { %2588 = vadd.xlane.f32.xlu1 %v2587_v58 }
 0x9a8   : > { %2607 = vadd.xlane.f32.xlu0 %v2606_v20 }
 0x9aa   : > { %2611 = vadd.xlane.f32.xlu1 %v2610_v29 }
 0xa2d   : > { %v2585_v36 = vpop.xlane.xlu0 %2584 }
 0xa2e   : > { %v2590_v37 = vmul.f32 0.03125, %v2585_v36 }
 0xa2f   : > { %v2589_v40 = vpop.xlane.xlu1 %2588 }
 0xa30   : > { %v2592_v41 = vmul.f32 %v2590_v37, %v2590_v37  ;;  %v2591_v42 = vmul.f32 0.03125, %v2589_v40  ;;  %v2595_v27 = vsub.f32 %v2582_v1, %v2590_v37 }
 0xa31   : > { %v2608_v44 = vpop.xlane.xlu0 %2607 }
 0xa32   : > { %v2593_v46 = vsub.f32 %v2591_v42, %v2592_v41  ;;  %v2613_v47 = vmul.f32 0.03125, %v2608_v44 }
 0xa33   : > { %v2612_v49 = vpop.xlane.xlu1 %2611 }
 0xa34   : > { %v2594_v50 = vmax.f32 %v2593_v46, 0.0  ;;  %v2615_v51 = vmul.f32 %v2613_v47, %v2613_v47  ;;  %v2614_v56 = vmul.f32 0.03125, %v2612_v49  ;;  %v2618_v21 = vsub.f32 %v2577_v26, %v2613_v47 }
 0xa36   : > { %v2596_v43 = vadd.f32 1e-05, %v2594_v50  ;;  %v2616_v57 = vsub.f32 %v2614_v56, %v2615_v51 }
 0xa38   : > { %3491 = vrsqrt.f32 %v2596_v43  ;;  %v2617_v28 = vmax.f32 %v2616_v57, 0.0 }
 0xa3a   : > { %v2619_v52 = vadd.f32 1e-05, %v2617_v28 }
 0xa3c   : > { %3493 = vrsqrt.f32 %v2619_v52 }
 0xa45   : > { %v3492_v54 = vpop.eup %3491 }
 0xa46   : > { %v2598_v60 = vmul.f32 %v3492_v54, %v2595_v27 }
 0xa48   : > { %v2599_v62 = vmul.f32 %v3515_v61, %v2598_v60 }
 0xa49   : > { %v3494_v0 = vpop.eup %3493 }
 0xa4a   : > { %v2973_v63 = vmul.f32 -1.442695, %v2599_v62  ;;  %v2621_v31 = vmul.f32 %v3494_v0, %v2618_v21 }
 0xa4c   : > { %3495 = vpow2.f32 %v2973_v63  ;;  %v2622_v48 = vmul.f32 %v3516_v10, %v2621_v31 }
 0xa4e   : > { %v2623_v45 = vadd.f32 %v3517_v2, %v2622_v48 }
 0xa50   : > { %3497 = vtanh.f32 %v2623_v45 }
 0xa59   : > { %v3496_v3 = vpop.eup %3495 }
 0xa5a   : > { %v2603_v53 = vadd.f32 1.0, %v3496_v3 }
 0xa5c   : > { %3499 = vrcp.f32 %v2603_v53 }
 0xa5d   : > { %v3498_v55 = vpop.eup %3497 }
 0xa68   : > { %2633 = sbr.rel (%p2975_p1) target bundleno = 2670 (0xa6e), region = 144 }
 0xa69   : > { %v3500_v5 = vpop.eup %3499 }
 0xa6a   : > { %v2625_v6 = vmul.f32 %v3500_v5, %v3498_v55 }
 0xa6c   : > { %2974 = vst.msk [vmem:[%s4303_s28 + $0x6] sm:$0x3] %vm1267_vm3, %v2625_v6  ;;  %2628 = vst.msk [vmem:[#allocation2] sm:$0x3] %vm1267_vm3, %v2625_v6 }
 0xa6d   : > { %2634 = vst.msk [vmem:[#allocation20] sm:$0x3] %vm1267_vm3, %v2577_v26 }
 0xa6e PF: > { %s4902_s1 = sld [smem:[#allocation32_spill]]  ;;  %s2650_s24 = sshll.u32 %s4303_s28, 4  ;;  %s4727_s24 = int_to_ptr.vmem [resolvable:$true] %s2650_s24 }
 0xa6f   : > { %s4903_s12 = sld [smem:[#allocation36_spill]]  ;;  %s4731_s16 = scalar_lea.sflag [#allocation6], %s767_s20 }
 0xa70   : > { %s4904_s2 = sld [smem:[#allocation53_spill]]  ;;  %s3786_s30 = scalar_lea.vmem %s4727_s24, 128 }
 0xa71   : > { %p3787_p12 = scmp.ne.s32.totalorder %s4727_s24, %s3786_s30  ;;  %s3932_s17 = smov [#allocation19]  }
 0xa74   : > { %s2987_s26 = sshll.u32 %s4902_s1, 7  ;;  %s3790_s1 = sshll.u32 %s3932_s17, 4  ;;  %s3791_s1 = int_to_ptr.vmem [resolvable:$false] %s3790_s1 }
 0xa75   : > { %p4906_p13 = scmp.ne.s32.totalorder %s4903_s12, 0  ;;  %s3792_s25 = scalar_lea.vmem %s3791_s1, 256 }
 0xa76   : > { %s4905_s29 = smov %s4904_s2  ;;  %s4724_s23 = scalar_lea.hbm %s4904_s2, %s2987_s26 }
 0xa77   : > { %p3788_p8 = pnand %p3787_p12, %p4906_p13  ;;  %p3793_p4 = scmp.lt.s32.totalorder %s4727_s24, %s3791_s1 }
 0xa78   : > { %p3794_p5 = scmp.lt.s32.totalorder %s3792_s25, %s3786_s30 }
 0xa79   : > { %p3789_p3 = pneg %p3788_p8 }
 0xa7a   : > { %p3795_p7 = por %p3794_p5, %p3793_p4 }
 0xa7c   : > { %p3796_p11 = pnand %p3795_p7, %p3789_p3 }
 0xa7e   : > { %3799 = shalt.err (!%p3796_p11)
}
 0xa7f   : > { %s3800_s20 = scalar_lea.hbm %s4724_s23, 128  ;;  %s3804_s15 = scalar_lea.hbm %s4905_s29, 256 }
 0xa80   : > { %p3801_p9 = scmp.ne.s32.totalorder %s4724_s23, %s3800_s20  ;;  %p3805_p2 = scmp.lt.s32.totalorder %s4724_s23, %s4905_s29 }
 0xa81   : > { %p3806_p6 = scmp.lt.s32.totalorder %s3804_s15, %s3800_s20 }
 0xa82   : > { %p3802_p0 = pnand %p3801_p9, %p4906_p13 }
 0xa83   : > { %p3807_p1 = por %p3806_p6, %p3805_p2 }
 0xa84   : > { %p3803_p10 = pneg %p3802_p0 }
 0xa86   : > { %p3808_p12 = pnand %p3807_p1, %p3803_p10 }
 0xa88   : > { %3811 = shalt.err (!%p3808_p12)
}
 0xa89   : > { %s3933_s30 = smov 32   ;;  %s3934_s1 = smov 2  }
 0xa8a   : > { %3276 = dma.vmem_to_hbm [thread:$0]  (%p4906_p13), %s4727_s24, 128, %s4724_s23, %s4731_s16, %s3933_s30, %s3933_s30, %s3934_s1  }
 0xa8b   : > { %s3935_s25 = smov [#allocation20]   ;;  %p4907_p3 = scmp.eq.s32.totalorder %s4072_s3, 1 }
 0xa8c   : > { %s2666_s28 = sshll.u32 %s3935_s25, 4  ;;  %s2667_s28 = int_to_ptr.vmem [resolvable:$true] %s2666_s28 }
 0xa8d   : > { %s3812_s26 = scalar_lea.vmem %s2667_s28, 32  ;;  %p3819_p7 = scmp.lt.s32.totalorder %s2667_s28, %s2667_s28 }
 0xa8e   : > { %p3813_p8 = scmp.ne.s32.totalorder %s2667_s28, %s3812_s26  ;;  %p3820_p11 = scmp.lt.s32.totalorder %s3812_s26, %s3812_s26 }
 0xa90   : > { %p3814_p4 = pnand %p3813_p8, %p4907_p3  ;;  %p3821_p9 = por %p3820_p11, %p3819_p7 }
 0xa92   : > { %p3815_p5 = pneg %p3814_p4 }
 0xa94   : > { %p3822_p0 = pnand %p3821_p9, %p3815_p5 }
 0xa96   : > { %3825 = shalt.err (!%p3822_p0)
}
 0xa97   : > { %p4908_p10 = pmov %p4907_p3  ;;  %s4909_s2 = sld [smem:[#allocation54_spill]] }
 0xa98   : > { %p4910_p13 = pmov %p4907_p3 }
 0xa9d   : > { %3278 = dma.vmem_to_hbm [thread:$0]  (%p4908_p10), %s2667_s28, 32, %s4909_s2, [#allocation21]  }
 0xa9e   : > { %3885 = dma.done.wait (%p4910_p13), [#allocation21], 32   ;;  %p4911_p2 = pmov %p4907_p3 }
 0xaa0   : > { %3887 = vsyncadd (%p4911_p2), [#allocation21], 4294967264 }
 0xaa1 PF: > { %s4912_s12 = sld [smem:[#allocation30_spill]] }
 0xaa2   : > { %s4913_s23 = sld [smem:[#allocation38_spill]] }
 0xaa3   : > { %s4914_s24 = sld [smem:[#allocation34_spill]] }
 0xaa7   : > { %s2682_s16 = sand.u32 1, %s4912_s12  }
 0xaa8   : > { %p4915_p6 = scmp.ne.s32.totalorder %s4913_s23, 0  ;;  %s2683_s17 = scalar_lea.sflag [#allocation6], %s2682_s16 }
 0xaa9   : > { %p4916_p1 = scmp.ge.s32.totalorder %s4914_s24, 2 }
 0xaab   : > { %p3315_p12 = pnand %p4916_p1, %p4915_p6 }
 0xaad   : > { %p3316_p8 = pneg %p3315_p12 }
 0xaaf   : > { %3889 = dma.done.wait (%p3316_p8), %s2683_s17, 128  }
 0xab0   : > { %3891 = vsyncadd (%p3316_p8), %s2683_s17, 4294967168  ;;  %s39_s25 = sadd.s32 1, %s4914_s24   ;;  %s4917_s30 = sld [smem:[#allocation31_spill]] }
 0xab1   : > { %p36_p3 = scmp.ge.s32.totalorder %s39_s25, 4   ;;  %s4918_s23 = sld [smem:[#allocation37_spill]] }
 0xab2   : > { %s4919_s24 = sld [smem:[#allocation33_spill]]  ;;  %s4921_s1 = smov %s3898_s22 }
 0xab3   : > { %s4920_s2 = sld [smem:[#allocation35_spill]]  ;;  %38 = sbr.rel (!%p36_p3) target bundleno = 26 (0x1a), region = 231 }
 0xab6   : > { %s4922_s22 = smov %s4917_s30 }
 0xab8   :  { %2688 = vsyncpa [#allocation5], 1 }
 0xab9   :  { %2690 = vsyncpa [#allocation5 + $0x1], 1 }
 0xaba   :  { %2691 = vsyncpa [#allocation8], 1 }
 0xabb   :  { %2692 = vsyncpa [#allocation15], 1 }
 0xabc   :  { %2693 = vsyncpa [#allocation18], 1 }
 0xabd   :  { %2694 = vsyncpa [#allocation6], 1 }
 0xabe   :  { %2696 = vsyncpa [#allocation6 + $0x1], 1 }
 0xabf   :  { %2697 = vsyncpa [#allocation21], 1 }

</bundles_post_ra>
